<compile_context>
chip_gen: v6e
topology: v6e:2x2x1
jax: 0.10.0
libtpu: 0.0.40
codegen_flags: <defaults>
</compile_context>

<pallas_src>
import functools

import jax
import jax.numpy as jnp
from jax.experimental import pallas as pl
from jax.experimental.pallas import tpu as pltpu


# ----------------------------------------------------------------------------
# Fused kernel: dwconv + instnorm + qkv matmul + MHA + proj matmul (one batch)
# ----------------------------------------------------------------------------
def fused_attention_kernel(xp_ref, wdw_ref, bdw_ref, wqkv_ref, bqkv_ref,
                           wproj_ref, bproj_ref, o_ref, *,
                           H, W, D, num_heads, head_dim, scale, eps):
    # xp_ref   : (1, H+2, W+2, D+2, C) f32   padded channels-last input
    # wdw_ref  : (27, C) f32                 depthwise taps (kh,kw,kd)-major
    # bdw_ref  : (1, C)  f32
    # wqkv_ref : (3C, C) bf16,  bqkv_ref : (3C, 1) f32
    # wproj_ref: (C, C)  bf16,  bproj_ref: (C, 1)  f32
    # o_ref    : (1, C, N) f32               channels-first output
    C = num_heads * head_dim
    N = H * W * D

    # ---- depthwise 3x3x3 conv: 27-tap MAC over statically shifted views ----
    w_dw = wdw_ref[...]                                      # load once (hoisted)
    acc = jnp.zeros((H, W, D, C), jnp.float32)
    t = 0
    for i in range(3):
        for j in range(3):
            for l in range(3):
                acc = acc + xp_ref[0, i:i + H, j:j + W, l:l + D, :] * w_dw[t]
                t += 1
    y = acc.reshape(N, C) + bdw_ref[...]                     # (N, C) + bias

    # ---- InstanceNorm3d (affine=False), f32 statistics ----
    mean = jnp.mean(y, axis=0, keepdims=True)
    var = jnp.mean((y - mean) ** 2, axis=0, keepdims=True)   # biased variance
    y = (y - mean) * jax.lax.rsqrt(var + eps)                # (N, C)

    # ---- qkv 1x1x1 conv as one matmul (bf16 operands, f32 accumulation) ----
    qkv = jnp.einsum("oc,nc->on", wqkv_ref[...], y.astype(jnp.bfloat16),
                     preferred_element_type=jnp.float32) + bqkv_ref[...]  # (3C, N)

    # split heads, channels-first: (C, N) -> (nh, hd, N)
    q_hd = qkv[0 * C:1 * C].reshape(num_heads, head_dim, N)
    k_hd = qkv[1 * C:2 * C].reshape(num_heads, head_dim, N)
    v_hd = qkv[2 * C:3 * C].reshape(num_heads, head_dim, N)

    q = jnp.swapaxes(q_hd, 1, 2).astype(jnp.bfloat16)        # (nh, N, hd)
    k = jnp.swapaxes(k_hd, 1, 2).astype(jnp.bfloat16)        # (nh, N, hd)

    # ---- attention: all heads in a single batched matmul pair ----
    s = jnp.einsum("hnd,hmd->hnm", q, k,
                   preferred_element_type=jnp.float32) * scale       # (nh, N, N)
    s = s - jnp.max(s, axis=-1, keepdims=True)
    p = jnp.exp(s)
    p = p * pl.reciprocal(jnp.sum(p, axis=-1, keepdims=True), approx=True)

    o_hd = jnp.einsum("hdm,hnm->hdn", v_hd.astype(jnp.bfloat16),
                      p.astype(jnp.bfloat16),
                      preferred_element_type=jnp.float32)             # (nh, hd, N)
    o_cn = o_hd.reshape(C, N)                                         # (C, N)

    # ---- output 1x1x1 projection (channels-first) ----
    out = jnp.dot(wproj_ref[...], o_cn.astype(jnp.bfloat16),
                  preferred_element_type=jnp.float32) + bproj_ref[...]  # (C, N)
    o_ref[0] = out


# ----------------------------------------------------------------------------
# Wrapper
# ----------------------------------------------------------------------------
def attention_forward(x, params, num_heads):
    """x: (B, C, H, W, D) float32 -> (B, C, H, W, D) float32."""
    B, C, H, W, D = x.shape
    N = H * W * D
    head_dim = C // num_heads
    scale = head_dim ** (-0.5)

    # glue: channels-last + halo padding for the depthwise conv (no im2col)
    xl = jnp.transpose(x, (0, 2, 3, 4, 1))                          # (B,H,W,D,C)
    xp = jnp.pad(xl, ((0, 0), (1, 1), (1, 1), (1, 1), (0, 0)))      # (B,H+2,W+2,D+2,C)

    w_dw = params["w_dw"].reshape(C, 27).T                          # (27, C) f32
    b_dw = params["b_dw"].reshape(1, C)
    w_qkv = params["w_qkv"][:, :, 0, 0, 0].astype(jnp.bfloat16)     # (3C, C)
    b_qkv = params["b_qkv"].reshape(3 * C, 1)
    w_proj = params["w_proj"][:, :, 0, 0, 0].astype(jnp.bfloat16)   # (C, C)
    b_proj = params["b_proj"].reshape(C, 1)

    out = pl.pallas_call(
        functools.partial(fused_attention_kernel, H=H, W=W, D=D,
                          num_heads=num_heads, head_dim=head_dim,
                          scale=scale, eps=1e-5),
        out_shape=jax.ShapeDtypeStruct((B, C, N), jnp.float32),
        grid=(B,),
        in_specs=[
            pl.BlockSpec((1, H + 2, W + 2, D + 2, C), lambda b: (b, 0, 0, 0, 0)),
            pl.BlockSpec((27, C), lambda b: (0, 0)),
            pl.BlockSpec((1, C), lambda b: (0, 0)),
            pl.BlockSpec((3 * C, C), lambda b: (0, 0)),
            pl.BlockSpec((3 * C, 1), lambda b: (0, 0)),
            pl.BlockSpec((C, C), lambda b: (0, 0)),
            pl.BlockSpec((C, 1), lambda b: (0, 0)),
        ],
        out_specs=pl.BlockSpec((1, C, N), lambda b: (b, 0, 0)),
        compiler_params=pltpu.CompilerParams(
            dimension_semantics=("parallel",)),
    )(xp, w_dw, b_dw, w_qkv, b_qkv, w_proj, b_proj)

    # (B, C, N) -> (B, C, H, W, D): pure reshape, no transpose needed
    return out.reshape(B, C, H, W, D)


# ----------------------------------------------------------------------------
# Pure-JAX reference (mirrors the PyTorch forward exactly) for verification
# ----------------------------------------------------------------------------
def reference_forward(x, params, num_heads):
    B, C, H, W, D = x.shape
    hp = jax.lax.Precision.HIGHEST
    # depthwise conv3d, k=3, pad=1, groups=C (+ bias)
    y = jax.lax.conv_general_dilated(
        x, params["w_dw"], window_strides=(1, 1, 1),
        padding=((1, 1), (1, 1), (1, 1)), feature_group_count=C,
        dimension_numbers=("NCHWD", "OIHWD", "NCHWD"), precision=hp)
    y = y + params["b_dw"][None, :, None, None, None]
    # InstanceNorm3d (affine=False, eps=1e-5, biased var)
    mean = jnp.mean(y, axis=(2, 3, 4), keepdims=True)
    var = jnp.mean((y - mean) ** 2, axis=(2, 3, 4), keepdims=True)
    y = (y - mean) / jnp.sqrt(var + 1e-5)
    # qkv 1x1x1 conv
    qkv = jnp.einsum("oc,bchwd->bohwd", params["w_qkv"][:, :, 0, 0, 0], y,
                     precision=hp) + params["b_qkv"][None, :, None, None, None]
    nh, hd, N = num_heads, C // num_heads, H * W * D
    qkv = qkv.reshape(B, 3, nh, hd, H, W, D).reshape(B, 3, nh, hd, N)
    qkv = jnp.transpose(qkv, (1, 0, 2, 4, 3))                       # (3,B,nh,N,hd)
    q, k, v = qkv[0], qkv[1], qkv[2]
    attn = jnp.einsum("bhqd,bhkd->bhqk", q, k, precision=hp) * (hd ** -0.5)
    attn = jax.nn.softmax(attn, axis=-1)
    o = jnp.einsum("bhqk,bhkd->bhqd", attn, v, precision=hp)
    o = jnp.transpose(o, (0, 1, 3, 2)).reshape(B, C, N).reshape(B, C, H, W, D)
    o = jnp.einsum("oc,bchwd->bohwd", params["w_proj"][:, :, 0, 0, 0], o,
                   precision=hp) + params["b_proj"][None, :, None, None, None]
    return o


if __name__ == "__main__":
    B, C, H, W, D = 2, 32, 4, 4, 4
    num_heads = 8  # module default; C % num_heads == 0

    key = jax.random.PRNGKey(0)
    ks = jax.random.split(key, 7)
    params = {
        "w_dw": 0.2 * jax.random.normal(ks[0], (C, 1, 3, 3, 3), jnp.float32),
        "b_dw": 0.1 * jax.random.normal(ks[1], (C,), jnp.float32),
        "w_qkv": 0.2 * jax.random.normal(ks[2], (3 * C, C, 1, 1, 1), jnp.float32),
        "b_qkv": 0.1 * jax.random.normal(ks[3], (3 * C,), jnp.float32),
        "w_proj": 0.2 * jax.random.normal(ks[4], (C, C, 1, 1, 1), jnp.float32),
        "b_proj": 0.1 * jax.random.normal(ks[5], (C,), jnp.float32),
    }
    x = jax.random.normal(ks[6], (B, C, H, W, D), jnp.float32)

    out = jax.block_until_ready(attention_forward(x, params, num_heads))
    ref = jax.block_until_ready(reference_forward(x, params, num_heads))

    assert out.shape == (B, C, H, W, D)
    assert jnp.allclose(out, ref, rtol=2e-2, atol=2e-2), \
        f"max abs err {float(jnp.max(jnp.abs(out - ref)))}"

    print("KERNEL_OK")
</pallas_src>

<mosaic_0001>
module attributes {stable_mosaic.version = 11 : i64} {
  func.func @fused_attention_kernel(%arg0: i32, %arg1: memref<1x6x6x6x32xf32, #tpu.memory_space<vmem>>, %arg2: memref<27x32xf32, #tpu.memory_space<vmem>>, %arg3: memref<1x32xf32, #tpu.memory_space<vmem>>, %arg4: memref<96x32xbf16, #tpu.memory_space<vmem>>, %arg5: memref<96x1xf32, #tpu.memory_space<vmem>>, %arg6: memref<32x32xbf16, #tpu.memory_space<vmem>>, %arg7: memref<32x1xf32, #tpu.memory_space<vmem>>, %arg8: memref<1x32x64xf32, #tpu.memory_space<vmem>>) attributes {dimension_semantics = [#tpu.dimension_semantics<parallel>], iteration_bounds = array<i64: 2>, scalar_prefetch = 0 : i64, scratch_operands = 0 : i64, tpu.core_type = #tpu.core_type<tc>, window_params = [{transform_indices = @transform_0, window_bounds = array<i64: 1, 6, 6, 6, 32>}, {pipeline_mode = #tpu.pipeline_mode<synchronous>, transform_indices = @transform_1, window_bounds = array<i64: 27, 32>}, {pipeline_mode = #tpu.pipeline_mode<synchronous>, transform_indices = @transform_2, window_bounds = array<i64: 1, 32>}, {pipeline_mode = #tpu.pipeline_mode<synchronous>, transform_indices = @transform_3, window_bounds = array<i64: 96, 32>}, {pipeline_mode = #tpu.pipeline_mode<synchronous>, transform_indices = @transform_4, window_bounds = array<i64: 96, 1>}, {pipeline_mode = #tpu.pipeline_mode<synchronous>, transform_indices = @transform_5, window_bounds = array<i64: 32, 32>}, {pipeline_mode = #tpu.pipeline_mode<synchronous>, transform_indices = @transform_6, window_bounds = array<i64: 32, 1>}, {transform_indices = @transform_7, window_bounds = array<i64: 1, 32, 64>}]} {
    %c0 = arith.constant 0 : index
    %c0_0 = arith.constant 0 : index
    %0 = vector.load %arg2[%c0, %c0_0] : memref<27x32xf32, #tpu.memory_space<vmem>>, vector<27x32xf32>
    %cst = arith.constant 0.000000e+00 : f32
    %1 = vector.broadcast %cst : f32 to vector<4x4x4x32xf32>
    %c0_1 = arith.constant 0 : index
    %c0_2 = arith.constant 0 : index
    %c0_3 = arith.constant 0 : index
    %c0_4 = arith.constant 0 : index
    %c0_5 = arith.constant 0 : index
    %2 = vector.load %arg1[%c0_1, %c0_2, %c0_3, %c0_4, %c0_5] : memref<1x6x6x6x32xf32, #tpu.memory_space<vmem>>, vector<1x4x4x4x32xf32>
    %3 = vector.shape_cast %2 : vector<1x4x4x4x32xf32> to vector<4x4x4x32xf32>
    %4 = vector.extract_strided_slice %0 {offsets = [0, 0], sizes = [1, 32], strides = [1, 1]} : vector<27x32xf32> to vector<1x32xf32>
    %5 = vector.shape_cast %4 : vector<1x32xf32> to vector<32xf32>
    %6 = vector.shape_cast %5 : vector<32xf32> to vector<1x1x1x32xf32>
    %7 = vector.broadcast %6 : vector<1x1x1x32xf32> to vector<4x4x4x32xf32>
    %8 = arith.mulf %3, %7 : vector<4x4x4x32xf32>
    %9 = arith.addf %1, %8 : vector<4x4x4x32xf32>
    %c0_6 = arith.constant 0 : index
    %c0_7 = arith.constant 0 : index
    %c0_8 = arith.constant 0 : index
    %c1 = arith.constant 1 : index
    %c0_9 = arith.constant 0 : index
    %10 = vector.load %arg1[%c0_6, %c0_7, %c0_8, %c1, %c0_9] : memref<1x6x6x6x32xf32, #tpu.memory_space<vmem>>, vector<1x4x4x4x32xf32>
    %11 = vector.shape_cast %10 : vector<1x4x4x4x32xf32> to vector<4x4x4x32xf32>
    %12 = vector.extract_strided_slice %0 {offsets = [1, 0], sizes = [1, 32], strides = [1, 1]} : vector<27x32xf32> to vector<1x32xf32>
    %13 = vector.shape_cast %12 : vector<1x32xf32> to vector<32xf32>
    %14 = vector.shape_cast %13 : vector<32xf32> to vector<1x1x1x32xf32>
    %15 = vector.broadcast %14 : vector<1x1x1x32xf32> to vector<4x4x4x32xf32>
    %16 = arith.mulf %11, %15 : vector<4x4x4x32xf32>
    %17 = arith.addf %9, %16 : vector<4x4x4x32xf32>
    %c0_10 = arith.constant 0 : index
    %c0_11 = arith.constant 0 : index
    %c0_12 = arith.constant 0 : index
    %c2 = arith.constant 2 : index
    %c0_13 = arith.constant 0 : index
    %18 = vector.load %arg1[%c0_10, %c0_11, %c0_12, %c2, %c0_13] : memref<1x6x6x6x32xf32, #tpu.memory_space<vmem>>, vector<1x4x4x4x32xf32>
    %19 = vector.shape_cast %18 : vector<1x4x4x4x32xf32> to vector<4x4x4x32xf32>
    %20 = vector.extract_strided_slice %0 {offsets = [2, 0], sizes = [1, 32], strides = [1, 1]} : vector<27x32xf32> to vector<1x32xf32>
    %21 = vector.shape_cast %20 : vector<1x32xf32> to vector<32xf32>
    %22 = vector.shape_cast %21 : vector<32xf32> to vector<1x1x1x32xf32>
    %23 = vector.broadcast %22 : vector<1x1x1x32xf32> to vector<4x4x4x32xf32>
    %24 = arith.mulf %19, %23 : vector<4x4x4x32xf32>
    %25 = arith.addf %17, %24 : vector<4x4x4x32xf32>
    %c0_14 = arith.constant 0 : index
    %c0_15 = arith.constant 0 : index
    %c1_16 = arith.constant 1 : index
    %c0_17 = arith.constant 0 : index
    %c0_18 = arith.constant 0 : index
    %26 = vector.load %arg1[%c0_14, %c0_15, %c1_16, %c0_17, %c0_18] : memref<1x6x6x6x32xf32, #tpu.memory_space<vmem>>, vector<1x4x4x4x32xf32>
    %27 = vector.shape_cast %26 : vector<1x4x4x4x32xf32> to vector<4x4x4x32xf32>
    %28 = vector.extract_strided_slice %0 {offsets = [3, 0], sizes = [1, 32], strides = [1, 1]} : vector<27x32xf32> to vector<1x32xf32>
    %29 = vector.shape_cast %28 : vector<1x32xf32> to vector<32xf32>
    %30 = vector.shape_cast %29 : vector<32xf32> to vector<1x1x1x32xf32>
    %31 = vector.broadcast %30 : vector<1x1x1x32xf32> to vector<4x4x4x32xf32>
    %32 = arith.mulf %27, %31 : vector<4x4x4x32xf32>
    %33 = arith.addf %25, %32 : vector<4x4x4x32xf32>
    %c0_19 = arith.constant 0 : index
    %c0_20 = arith.constant 0 : index
    %c1_21 = arith.constant 1 : index
    %c1_22 = arith.constant 1 : index
    %c0_23 = arith.constant 0 : index
    %34 = vector.load %arg1[%c0_19, %c0_20, %c1_21, %c1_22, %c0_23] : memref<1x6x6x6x32xf32, #tpu.memory_space<vmem>>, vector<1x4x4x4x32xf32>
    %35 = vector.shape_cast %34 : vector<1x4x4x4x32xf32> to vector<4x4x4x32xf32>
    %36 = vector.extract_strided_slice %0 {offsets = [4, 0], sizes = [1, 32], strides = [1, 1]} : vector<27x32xf32> to vector<1x32xf32>
    %37 = vector.shape_cast %36 : vector<1x32xf32> to vector<32xf32>
    %38 = vector.shape_cast %37 : vector<32xf32> to vector<1x1x1x32xf32>
    %39 = vector.broadcast %38 : vector<1x1x1x32xf32> to vector<4x4x4x32xf32>
    %40 = arith.mulf %35, %39 : vector<4x4x4x32xf32>
    %41 = arith.addf %33, %40 : vector<4x4x4x32xf32>
    %c0_24 = arith.constant 0 : index
    %c0_25 = arith.constant 0 : index
    %c1_26 = arith.constant 1 : index
    %c2_27 = arith.constant 2 : index
    %c0_28 = arith.constant 0 : index
    %42 = vector.load %arg1[%c0_24, %c0_25, %c1_26, %c2_27, %c0_28] : memref<1x6x6x6x32xf32, #tpu.memory_space<vmem>>, vector<1x4x4x4x32xf32>
    %43 = vector.shape_cast %42 : vector<1x4x4x4x32xf32> to vector<4x4x4x32xf32>
    %44 = vector.extract_strided_slice %0 {offsets = [5, 0], sizes = [1, 32], strides = [1, 1]} : vector<27x32xf32> to vector<1x32xf32>
    %45 = vector.shape_cast %44 : vector<1x32xf32> to vector<32xf32>
    %46 = vector.shape_cast %45 : vector<32xf32> to vector<1x1x1x32xf32>
    %47 = vector.broadcast %46 : vector<1x1x1x32xf32> to vector<4x4x4x32xf32>
    %48 = arith.mulf %43, %47 : vector<4x4x4x32xf32>
    %49 = arith.addf %41, %48 : vector<4x4x4x32xf32>
    %c0_29 = arith.constant 0 : index
    %c0_30 = arith.constant 0 : index
    %c2_31 = arith.constant 2 : index
    %c0_32 = arith.constant 0 : index
    %c0_33 = arith.constant 0 : index
    %50 = vector.load %arg1[%c0_29, %c0_30, %c2_31, %c0_32, %c0_33] : memref<1x6x6x6x32xf32, #tpu.memory_space<vmem>>, vector<1x4x4x4x32xf32>
    %51 = vector.shape_cast %50 : vector<1x4x4x4x32xf32> to vector<4x4x4x32xf32>
    %52 = vector.extract_strided_slice %0 {offsets = [6, 0], sizes = [1, 32], strides = [1, 1]} : vector<27x32xf32> to vector<1x32xf32>
    %53 = vector.shape_cast %52 : vector<1x32xf32> to vector<32xf32>
    %54 = vector.shape_cast %53 : vector<32xf32> to vector<1x1x1x32xf32>
    %55 = vector.broadcast %54 : vector<1x1x1x32xf32> to vector<4x4x4x32xf32>
    %56 = arith.mulf %51, %55 : vector<4x4x4x32xf32>
    %57 = arith.addf %49, %56 : vector<4x4x4x32xf32>
    %c0_34 = arith.constant 0 : index
    %c0_35 = arith.constant 0 : index
    %c2_36 = arith.constant 2 : index
    %c1_37 = arith.constant 1 : index
    %c0_38 = arith.constant 0 : index
    %58 = vector.load %arg1[%c0_34, %c0_35, %c2_36, %c1_37, %c0_38] : memref<1x6x6x6x32xf32, #tpu.memory_space<vmem>>, vector<1x4x4x4x32xf32>
    %59 = vector.shape_cast %58 : vector<1x4x4x4x32xf32> to vector<4x4x4x32xf32>
    %60 = vector.extract_strided_slice %0 {offsets = [7, 0], sizes = [1, 32], strides = [1, 1]} : vector<27x32xf32> to vector<1x32xf32>
    %61 = vector.shape_cast %60 : vector<1x32xf32> to vector<32xf32>
    %62 = vector.shape_cast %61 : vector<32xf32> to vector<1x1x1x32xf32>
    %63 = vector.broadcast %62 : vector<1x1x1x32xf32> to vector<4x4x4x32xf32>
    %64 = arith.mulf %59, %63 : vector<4x4x4x32xf32>
    %65 = arith.addf %57, %64 : vector<4x4x4x32xf32>
    %c0_39 = arith.constant 0 : index
    %c0_40 = arith.constant 0 : index
    %c2_41 = arith.constant 2 : index
    %c2_42 = arith.constant 2 : index
    %c0_43 = arith.constant 0 : index
    %66 = vector.load %arg1[%c0_39, %c0_40, %c2_41, %c2_42, %c0_43] : memref<1x6x6x6x32xf32, #tpu.memory_space<vmem>>, vector<1x4x4x4x32xf32>
    %67 = vector.shape_cast %66 : vector<1x4x4x4x32xf32> to vector<4x4x4x32xf32>
    %68 = vector.extract_strided_slice %0 {offsets = [8, 0], sizes = [1, 32], strides = [1, 1]} : vector<27x32xf32> to vector<1x32xf32>
    %69 = vector.shape_cast %68 : vector<1x32xf32> to vector<32xf32>
    %70 = vector.shape_cast %69 : vector<32xf32> to vector<1x1x1x32xf32>
    %71 = vector.broadcast %70 : vector<1x1x1x32xf32> to vector<4x4x4x32xf32>
    %72 = arith.mulf %67, %71 : vector<4x4x4x32xf32>
    %73 = arith.addf %65, %72 : vector<4x4x4x32xf32>
    %c0_44 = arith.constant 0 : index
    %c1_45 = arith.constant 1 : index
    %c0_46 = arith.constant 0 : index
    %c0_47 = arith.constant 0 : index
    %c0_48 = arith.constant 0 : index
    %74 = vector.load %arg1[%c0_44, %c1_45, %c0_46, %c0_47, %c0_48] : memref<1x6x6x6x32xf32, #tpu.memory_space<vmem>>, vector<1x4x4x4x32xf32>
    %75 = vector.shape_cast %74 : vector<1x4x4x4x32xf32> to vector<4x4x4x32xf32>
    %76 = vector.extract_strided_slice %0 {offsets = [9, 0], sizes = [1, 32], strides = [1, 1]} : vector<27x32xf32> to vector<1x32xf32>
    %77 = vector.shape_cast %76 : vector<1x32xf32> to vector<32xf32>
    %78 = vector.shape_cast %77 : vector<32xf32> to vector<1x1x1x32xf32>
    %79 = vector.broadcast %78 : vector<1x1x1x32xf32> to vector<4x4x4x32xf32>
    %80 = arith.mulf %75, %79 : vector<4x4x4x32xf32>
    %81 = arith.addf %73, %80 : vector<4x4x4x32xf32>
    %c0_49 = arith.constant 0 : index
    %c1_50 = arith.constant 1 : index
    %c0_51 = arith.constant 0 : index
    %c1_52 = arith.constant 1 : index
    %c0_53 = arith.constant 0 : index
    %82 = vector.load %arg1[%c0_49, %c1_50, %c0_51, %c1_52, %c0_53] : memref<1x6x6x6x32xf32, #tpu.memory_space<vmem>>, vector<1x4x4x4x32xf32>
    %83 = vector.shape_cast %82 : vector<1x4x4x4x32xf32> to vector<4x4x4x32xf32>
    %84 = vector.extract_strided_slice %0 {offsets = [10, 0], sizes = [1, 32], strides = [1, 1]} : vector<27x32xf32> to vector<1x32xf32>
    %85 = vector.shape_cast %84 : vector<1x32xf32> to vector<32xf32>
    %86 = vector.shape_cast %85 : vector<32xf32> to vector<1x1x1x32xf32>
    %87 = vector.broadcast %86 : vector<1x1x1x32xf32> to vector<4x4x4x32xf32>
    %88 = arith.mulf %83, %87 : vector<4x4x4x32xf32>
    %89 = arith.addf %81, %88 : vector<4x4x4x32xf32>
    %c0_54 = arith.constant 0 : index
    %c1_55 = arith.constant 1 : index
    %c0_56 = arith.constant 0 : index
    %c2_57 = arith.constant 2 : index
    %c0_58 = arith.constant 0 : index
    %90 = vector.load %arg1[%c0_54, %c1_55, %c0_56, %c2_57, %c0_58] : memref<1x6x6x6x32xf32, #tpu.memory_space<vmem>>, vector<1x4x4x4x32xf32>
    %91 = vector.shape_cast %90 : vector<1x4x4x4x32xf32> to vector<4x4x4x32xf32>
    %92 = vector.extract_strided_slice %0 {offsets = [11, 0], sizes = [1, 32], strides = [1, 1]} : vector<27x32xf32> to vector<1x32xf32>
    %93 = vector.shape_cast %92 : vector<1x32xf32> to vector<32xf32>
    %94 = vector.shape_cast %93 : vector<32xf32> to vector<1x1x1x32xf32>
    %95 = vector.broadcast %94 : vector<1x1x1x32xf32> to vector<4x4x4x32xf32>
    %96 = arith.mulf %91, %95 : vector<4x4x4x32xf32>
    %97 = arith.addf %89, %96 : vector<4x4x4x32xf32>
    %c0_59 = arith.constant 0 : index
    %c1_60 = arith.constant 1 : index
    %c1_61 = arith.constant 1 : index
    %c0_62 = arith.constant 0 : index
    %c0_63 = arith.constant 0 : index
    %98 = vector.load %arg1[%c0_59, %c1_60, %c1_61, %c0_62, %c0_63] : memref<1x6x6x6x32xf32, #tpu.memory_space<vmem>>, vector<1x4x4x4x32xf32>
    %99 = vector.shape_cast %98 : vector<1x4x4x4x32xf32> to vector<4x4x4x32xf32>
    %100 = vector.extract_strided_slice %0 {offsets = [12, 0], sizes = [1, 32], strides = [1, 1]} : vector<27x32xf32> to vector<1x32xf32>
    %101 = vector.shape_cast %100 : vector<1x32xf32> to vector<32xf32>
    %102 = vector.shape_cast %101 : vector<32xf32> to vector<1x1x1x32xf32>
    %103 = vector.broadcast %102 : vector<1x1x1x32xf32> to vector<4x4x4x32xf32>
    %104 = arith.mulf %99, %103 : vector<4x4x4x32xf32>
    %105 = arith.addf %97, %104 : vector<4x4x4x32xf32>
    %c0_64 = arith.constant 0 : index
    %c1_65 = arith.constant 1 : index
    %c1_66 = arith.constant 1 : index
    %c1_67 = arith.constant 1 : index
    %c0_68 = arith.constant 0 : index
    %106 = vector.load %arg1[%c0_64, %c1_65, %c1_66, %c1_67, %c0_68] : memref<1x6x6x6x32xf32, #tpu.memory_space<vmem>>, vector<1x4x4x4x32xf32>
    %107 = vector.shape_cast %106 : vector<1x4x4x4x32xf32> to vector<4x4x4x32xf32>
    %108 = vector.extract_strided_slice %0 {offsets = [13, 0], sizes = [1, 32], strides = [1, 1]} : vector<27x32xf32> to vector<1x32xf32>
    %109 = vector.shape_cast %108 : vector<1x32xf32> to vector<32xf32>
    %110 = vector.shape_cast %109 : vector<32xf32> to vector<1x1x1x32xf32>
    %111 = vector.broadcast %110 : vector<1x1x1x32xf32> to vector<4x4x4x32xf32>
    %112 = arith.mulf %107, %111 : vector<4x4x4x32xf32>
    %113 = arith.addf %105, %112 : vector<4x4x4x32xf32>
    %c0_69 = arith.constant 0 : index
    %c1_70 = arith.constant 1 : index
    %c1_71 = arith.constant 1 : index
    %c2_72 = arith.constant 2 : index
    %c0_73 = arith.constant 0 : index
    %114 = vector.load %arg1[%c0_69, %c1_70, %c1_71, %c2_72, %c0_73] : memref<1x6x6x6x32xf32, #tpu.memory_space<vmem>>, vector<1x4x4x4x32xf32>
    %115 = vector.shape_cast %114 : vector<1x4x4x4x32xf32> to vector<4x4x4x32xf32>
    %116 = vector.extract_strided_slice %0 {offsets = [14, 0], sizes = [1, 32], strides = [1, 1]} : vector<27x32xf32> to vector<1x32xf32>
    %117 = vector.shape_cast %116 : vector<1x32xf32> to vector<32xf32>
    %118 = vector.shape_cast %117 : vector<32xf32> to vector<1x1x1x32xf32>
    %119 = vector.broadcast %118 : vector<1x1x1x32xf32> to vector<4x4x4x32xf32>
    %120 = arith.mulf %115, %119 : vector<4x4x4x32xf32>
    %121 = arith.addf %113, %120 : vector<4x4x4x32xf32>
    %c0_74 = arith.constant 0 : index
    %c1_75 = arith.constant 1 : index
    %c2_76 = arith.constant 2 : index
    %c0_77 = arith.constant 0 : index
    %c0_78 = arith.constant 0 : index
    %122 = vector.load %arg1[%c0_74, %c1_75, %c2_76, %c0_77, %c0_78] : memref<1x6x6x6x32xf32, #tpu.memory_space<vmem>>, vector<1x4x4x4x32xf32>
    %123 = vector.shape_cast %122 : vector<1x4x4x4x32xf32> to vector<4x4x4x32xf32>
    %124 = vector.extract_strided_slice %0 {offsets = [15, 0], sizes = [1, 32], strides = [1, 1]} : vector<27x32xf32> to vector<1x32xf32>
    %125 = vector.shape_cast %124 : vector<1x32xf32> to vector<32xf32>
    %126 = vector.shape_cast %125 : vector<32xf32> to vector<1x1x1x32xf32>
    %127 = vector.broadcast %126 : vector<1x1x1x32xf32> to vector<4x4x4x32xf32>
    %128 = arith.mulf %123, %127 : vector<4x4x4x32xf32>
    %129 = arith.addf %121, %128 : vector<4x4x4x32xf32>
    %c0_79 = arith.constant 0 : index
    %c1_80 = arith.constant 1 : index
    %c2_81 = arith.constant 2 : index
    %c1_82 = arith.constant 1 : index
    %c0_83 = arith.constant 0 : index
    %130 = vector.load %arg1[%c0_79, %c1_80, %c2_81, %c1_82, %c0_83] : memref<1x6x6x6x32xf32, #tpu.memory_space<vmem>>, vector<1x4x4x4x32xf32>
    %131 = vector.shape_cast %130 : vector<1x4x4x4x32xf32> to vector<4x4x4x32xf32>
    %132 = vector.extract_strided_slice %0 {offsets = [16, 0], sizes = [1, 32], strides = [1, 1]} : vector<27x32xf32> to vector<1x32xf32>
    %133 = vector.shape_cast %132 : vector<1x32xf32> to vector<32xf32>
    %134 = vector.shape_cast %133 : vector<32xf32> to vector<1x1x1x32xf32>
    %135 = vector.broadcast %134 : vector<1x1x1x32xf32> to vector<4x4x4x32xf32>
    %136 = arith.mulf %131, %135 : vector<4x4x4x32xf32>
    %137 = arith.addf %129, %136 : vector<4x4x4x32xf32>
    %c0_84 = arith.constant 0 : index
    %c1_85 = arith.constant 1 : index
    %c2_86 = arith.constant 2 : index
    %c2_87 = arith.constant 2 : index
    %c0_88 = arith.constant 0 : index
    %138 = vector.load %arg1[%c0_84, %c1_85, %c2_86, %c2_87, %c0_88] : memref<1x6x6x6x32xf32, #tpu.memory_space<vmem>>, vector<1x4x4x4x32xf32>
    %139 = vector.shape_cast %138 : vector<1x4x4x4x32xf32> to vector<4x4x4x32xf32>
    %140 = vector.extract_strided_slice %0 {offsets = [17, 0], sizes = [1, 32], strides = [1, 1]} : vector<27x32xf32> to vector<1x32xf32>
    %141 = vector.shape_cast %140 : vector<1x32xf32> to vector<32xf32>
    %142 = vector.shape_cast %141 : vector<32xf32> to vector<1x1x1x32xf32>
    %143 = vector.broadcast %142 : vector<1x1x1x32xf32> to vector<4x4x4x32xf32>
    %144 = arith.mulf %139, %143 : vector<4x4x4x32xf32>
    %145 = arith.addf %137, %144 : vector<4x4x4x32xf32>
    %c0_89 = arith.constant 0 : index
    %c2_90 = arith.constant 2 : index
    %c0_91 = arith.constant 0 : index
    %c0_92 = arith.constant 0 : index
    %c0_93 = arith.constant 0 : index
    %146 = vector.load %arg1[%c0_89, %c2_90, %c0_91, %c0_92, %c0_93] : memref<1x6x6x6x32xf32, #tpu.memory_space<vmem>>, vector<1x4x4x4x32xf32>
    %147 = vector.shape_cast %146 : vector<1x4x4x4x32xf32> to vector<4x4x4x32xf32>
    %148 = vector.extract_strided_slice %0 {offsets = [18, 0], sizes = [1, 32], strides = [1, 1]} : vector<27x32xf32> to vector<1x32xf32>
    %149 = vector.shape_cast %148 : vector<1x32xf32> to vector<32xf32>
    %150 = vector.shape_cast %149 : vector<32xf32> to vector<1x1x1x32xf32>
    %151 = vector.broadcast %150 : vector<1x1x1x32xf32> to vector<4x4x4x32xf32>
    %152 = arith.mulf %147, %151 : vector<4x4x4x32xf32>
    %153 = arith.addf %145, %152 : vector<4x4x4x32xf32>
    %c0_94 = arith.constant 0 : index
    %c2_95 = arith.constant 2 : index
    %c0_96 = arith.constant 0 : index
    %c1_97 = arith.constant 1 : index
    %c0_98 = arith.constant 0 : index
    %154 = vector.load %arg1[%c0_94, %c2_95, %c0_96, %c1_97, %c0_98] : memref<1x6x6x6x32xf32, #tpu.memory_space<vmem>>, vector<1x4x4x4x32xf32>
    %155 = vector.shape_cast %154 : vector<1x4x4x4x32xf32> to vector<4x4x4x32xf32>
    %156 = vector.extract_strided_slice %0 {offsets = [19, 0], sizes = [1, 32], strides = [1, 1]} : vector<27x32xf32> to vector<1x32xf32>
    %157 = vector.shape_cast %156 : vector<1x32xf32> to vector<32xf32>
    %158 = vector.shape_cast %157 : vector<32xf32> to vector<1x1x1x32xf32>
    %159 = vector.broadcast %158 : vector<1x1x1x32xf32> to vector<4x4x4x32xf32>
    %160 = arith.mulf %155, %159 : vector<4x4x4x32xf32>
    %161 = arith.addf %153, %160 : vector<4x4x4x32xf32>
    %c0_99 = arith.constant 0 : index
    %c2_100 = arith.constant 2 : index
    %c0_101 = arith.constant 0 : index
    %c2_102 = arith.constant 2 : index
    %c0_103 = arith.constant 0 : index
    %162 = vector.load %arg1[%c0_99, %c2_100, %c0_101, %c2_102, %c0_103] : memref<1x6x6x6x32xf32, #tpu.memory_space<vmem>>, vector<1x4x4x4x32xf32>
    %163 = vector.shape_cast %162 : vector<1x4x4x4x32xf32> to vector<4x4x4x32xf32>
    %164 = vector.extract_strided_slice %0 {offsets = [20, 0], sizes = [1, 32], strides = [1, 1]} : vector<27x32xf32> to vector<1x32xf32>
    %165 = vector.shape_cast %164 : vector<1x32xf32> to vector<32xf32>
    %166 = vector.shape_cast %165 : vector<32xf32> to vector<1x1x1x32xf32>
    %167 = vector.broadcast %166 : vector<1x1x1x32xf32> to vector<4x4x4x32xf32>
    %168 = arith.mulf %163, %167 : vector<4x4x4x32xf32>
    %169 = arith.addf %161, %168 : vector<4x4x4x32xf32>
    %c0_104 = arith.constant 0 : index
    %c2_105 = arith.constant 2 : index
    %c1_106 = arith.constant 1 : index
    %c0_107 = arith.constant 0 : index
    %c0_108 = arith.constant 0 : index
    %170 = vector.load %arg1[%c0_104, %c2_105, %c1_106, %c0_107, %c0_108] : memref<1x6x6x6x32xf32, #tpu.memory_space<vmem>>, vector<1x4x4x4x32xf32>
    %171 = vector.shape_cast %170 : vector<1x4x4x4x32xf32> to vector<4x4x4x32xf32>
    %172 = vector.extract_strided_slice %0 {offsets = [21, 0], sizes = [1, 32], strides = [1, 1]} : vector<27x32xf32> to vector<1x32xf32>
    %173 = vector.shape_cast %172 : vector<1x32xf32> to vector<32xf32>
    %174 = vector.shape_cast %173 : vector<32xf32> to vector<1x1x1x32xf32>
    %175 = vector.broadcast %174 : vector<1x1x1x32xf32> to vector<4x4x4x32xf32>
    %176 = arith.mulf %171, %175 : vector<4x4x4x32xf32>
    %177 = arith.addf %169, %176 : vector<4x4x4x32xf32>
    %c0_109 = arith.constant 0 : index
    %c2_110 = arith.constant 2 : index
    %c1_111 = arith.constant 1 : index
    %c1_112 = arith.constant 1 : index
    %c0_113 = arith.constant 0 : index
    %178 = vector.load %arg1[%c0_109, %c2_110, %c1_111, %c1_112, %c0_113] : memref<1x6x6x6x32xf32, #tpu.memory_space<vmem>>, vector<1x4x4x4x32xf32>
    %179 = vector.shape_cast %178 : vector<1x4x4x4x32xf32> to vector<4x4x4x32xf32>
    %180 = vector.extract_strided_slice %0 {offsets = [22, 0], sizes = [1, 32], strides = [1, 1]} : vector<27x32xf32> to vector<1x32xf32>
    %181 = vector.shape_cast %180 : vector<1x32xf32> to vector<32xf32>
    %182 = vector.shape_cast %181 : vector<32xf32> to vector<1x1x1x32xf32>
    %183 = vector.broadcast %182 : vector<1x1x1x32xf32> to vector<4x4x4x32xf32>
    %184 = arith.mulf %179, %183 : vector<4x4x4x32xf32>
    %185 = arith.addf %177, %184 : vector<4x4x4x32xf32>
    %c0_114 = arith.constant 0 : index
    %c2_115 = arith.constant 2 : index
    %c1_116 = arith.constant 1 : index
    %c2_117 = arith.constant 2 : index
    %c0_118 = arith.constant 0 : index
    %186 = vector.load %arg1[%c0_114, %c2_115, %c1_116, %c2_117, %c0_118] : memref<1x6x6x6x32xf32, #tpu.memory_space<vmem>>, vector<1x4x4x4x32xf32>
    %187 = vector.shape_cast %186 : vector<1x4x4x4x32xf32> to vector<4x4x4x32xf32>
    %188 = vector.extract_strided_slice %0 {offsets = [23, 0], sizes = [1, 32], strides = [1, 1]} : vector<27x32xf32> to vector<1x32xf32>
    %189 = vector.shape_cast %188 : vector<1x32xf32> to vector<32xf32>
    %190 = vector.shape_cast %189 : vector<32xf32> to vector<1x1x1x32xf32>
    %191 = vector.broadcast %190 : vector<1x1x1x32xf32> to vector<4x4x4x32xf32>
    %192 = arith.mulf %187, %191 : vector<4x4x4x32xf32>
    %193 = arith.addf %185, %192 : vector<4x4x4x32xf32>
    %c0_119 = arith.constant 0 : index
    %c2_120 = arith.constant 2 : index
    %c2_121 = arith.constant 2 : index
    %c0_122 = arith.constant 0 : index
    %c0_123 = arith.constant 0 : index
    %194 = vector.load %arg1[%c0_119, %c2_120, %c2_121, %c0_122, %c0_123] : memref<1x6x6x6x32xf32, #tpu.memory_space<vmem>>, vector<1x4x4x4x32xf32>
    %195 = vector.shape_cast %194 : vector<1x4x4x4x32xf32> to vector<4x4x4x32xf32>
    %196 = vector.extract_strided_slice %0 {offsets = [24, 0], sizes = [1, 32], strides = [1, 1]} : vector<27x32xf32> to vector<1x32xf32>
    %197 = vector.shape_cast %196 : vector<1x32xf32> to vector<32xf32>
    %198 = vector.shape_cast %197 : vector<32xf32> to vector<1x1x1x32xf32>
    %199 = vector.broadcast %198 : vector<1x1x1x32xf32> to vector<4x4x4x32xf32>
    %200 = arith.mulf %195, %199 : vector<4x4x4x32xf32>
    %201 = arith.addf %193, %200 : vector<4x4x4x32xf32>
    %c0_124 = arith.constant 0 : index
    %c2_125 = arith.constant 2 : index
    %c2_126 = arith.constant 2 : index
    %c1_127 = arith.constant 1 : index
    %c0_128 = arith.constant 0 : index
    %202 = vector.load %arg1[%c0_124, %c2_125, %c2_126, %c1_127, %c0_128] : memref<1x6x6x6x32xf32, #tpu.memory_space<vmem>>, vector<1x4x4x4x32xf32>
    %203 = vector.shape_cast %202 : vector<1x4x4x4x32xf32> to vector<4x4x4x32xf32>
    %204 = vector.extract_strided_slice %0 {offsets = [25, 0], sizes = [1, 32], strides = [1, 1]} : vector<27x32xf32> to vector<1x32xf32>
    %205 = vector.shape_cast %204 : vector<1x32xf32> to vector<32xf32>
    %206 = vector.shape_cast %205 : vector<32xf32> to vector<1x1x1x32xf32>
    %207 = vector.broadcast %206 : vector<1x1x1x32xf32> to vector<4x4x4x32xf32>
    %208 = arith.mulf %203, %207 : vector<4x4x4x32xf32>
    %209 = arith.addf %201, %208 : vector<4x4x4x32xf32>
    %c0_129 = arith.constant 0 : index
    %c2_130 = arith.constant 2 : index
    %c2_131 = arith.constant 2 : index
    %c2_132 = arith.constant 2 : index
    %c0_133 = arith.constant 0 : index
    %210 = vector.load %arg1[%c0_129, %c2_130, %c2_131, %c2_132, %c0_133] : memref<1x6x6x6x32xf32, #tpu.memory_space<vmem>>, vector<1x4x4x4x32xf32>
    %211 = vector.shape_cast %210 : vector<1x4x4x4x32xf32> to vector<4x4x4x32xf32>
    %212 = vector.extract_strided_slice %0 {offsets = [26, 0], sizes = [1, 32], strides = [1, 1]} : vector<27x32xf32> to vector<1x32xf32>
    %213 = vector.shape_cast %212 : vector<1x32xf32> to vector<32xf32>
    %214 = vector.shape_cast %213 : vector<32xf32> to vector<1x1x1x32xf32>
    %215 = vector.broadcast %214 : vector<1x1x1x32xf32> to vector<4x4x4x32xf32>
    %216 = arith.mulf %211, %215 : vector<4x4x4x32xf32>
    %217 = arith.addf %209, %216 : vector<4x4x4x32xf32>
    %218 = vector.shape_cast %217 : vector<4x4x4x32xf32> to vector<64x32xf32>
    %c0_134 = arith.constant 0 : index
    %c0_135 = arith.constant 0 : index
    %219 = vector.load %arg3[%c0_134, %c0_135] : memref<1x32xf32, #tpu.memory_space<vmem>>, vector<1x32xf32>
    %220 = vector.broadcast %219 : vector<1x32xf32> to vector<64x32xf32>
    %221 = arith.addf %218, %220 : vector<64x32xf32>
    %cst_136 = arith.constant dense<0.000000e+00> : vector<32xf32>
    %222 = vector.multi_reduction <add>, %221, %cst_136 [0] : vector<64x32xf32> to vector<32xf32>
    %223 = vector.shape_cast %222 : vector<32xf32> to vector<1x32xf32>
    %cst_137 = arith.constant 6.400000e+01 : f32
    %224 = vector.broadcast %cst_137 : f32 to vector<1x32xf32>
    %225 = arith.divf %223, %224 : vector<1x32xf32>
    %226 = vector.broadcast %225 : vector<1x32xf32> to vector<64x32xf32>
    %227 = arith.subf %221, %226 : vector<64x32xf32>
    %228 = arith.mulf %227, %227 : vector<64x32xf32>
    %cst_138 = arith.constant dense<0.000000e+00> : vector<32xf32>
    %229 = vector.multi_reduction <add>, %228, %cst_138 [0] : vector<64x32xf32> to vector<32xf32>
    %230 = vector.shape_cast %229 : vector<32xf32> to vector<1x32xf32>
    %cst_139 = arith.constant 6.400000e+01 : f32
    %231 = vector.broadcast %cst_139 : f32 to vector<1x32xf32>
    %232 = arith.divf %230, %231 : vector<1x32xf32>
    %233 = vector.broadcast %225 : vector<1x32xf32> to vector<64x32xf32>
    %234 = arith.subf %221, %233 : vector<64x32xf32>
    %cst_140 = arith.constant 9.99999974E-6 : f32
    %235 = vector.broadcast %cst_140 : f32 to vector<1x32xf32>
    %236 = arith.addf %232, %235 : vector<1x32xf32>
    %237 = math.rsqrt %236 : vector<1x32xf32>
    %238 = vector.broadcast %237 : vector<1x32xf32> to vector<64x32xf32>
    %239 = arith.mulf %234, %238 : vector<64x32xf32>
    %c0_141 = arith.constant 0 : index
    %c0_142 = arith.constant 0 : index
    %240 = vector.load %arg4[%c0_141, %c0_142] : memref<96x32xbf16, #tpu.memory_space<vmem>>, vector<96x32xbf16>
    %241 = arith.truncf %239 : vector<64x32xf32> to vector<64x32xbf16>
    "tpu.trace_start"() <{level = 10 : i32, message = "oc,nc->on"}> : () -> ()
    %cst_143 = arith.constant dense<0.000000e+00> : vector<96x64xf32>
    %242 = tpu.matmul %240, %241, %cst_143 {dimension_numbers = #tpu.dot_dimension_numbers<[1], [1], [0], [0], [0, 0, 1, 0], [], []>} : vector<96x32xbf16>, vector<64x32xbf16>, vector<96x64xf32> -> vector<96x64xf32>
    "tpu.trace_stop"() : () -> ()
    %c0_144 = arith.constant 0 : index
    %c0_145 = arith.constant 0 : index
    %243 = vector.load %arg5[%c0_144, %c0_145] : memref<96x1xf32, #tpu.memory_space<vmem>>, vector<96x1xf32>
    %244 = vector.broadcast %243 : vector<96x1xf32> to vector<96x64xf32>
    %245 = arith.addf %242, %244 : vector<96x64xf32>
    %246 = vector.extract_strided_slice %245 {offsets = [0, 0], sizes = [32, 64], strides = [1, 1]} : vector<96x64xf32> to vector<32x64xf32>
    %247 = vector.shape_cast %246 : vector<32x64xf32> to vector<8x4x64xf32>
    %248 = vector.extract_strided_slice %245 {offsets = [32, 0], sizes = [32, 64], strides = [1, 1]} : vector<96x64xf32> to vector<32x64xf32>
    %249 = vector.shape_cast %248 : vector<32x64xf32> to vector<8x4x64xf32>
    %250 = vector.extract_strided_slice %245 {offsets = [64, 0], sizes = [32, 64], strides = [1, 1]} : vector<96x64xf32> to vector<32x64xf32>
    %251 = vector.shape_cast %250 : vector<32x64xf32> to vector<8x4x64xf32>
    %252 = tpu.transpose %247, [0, 2, 1] : vector<8x4x64xf32> -> vector<8x64x4xf32>
    %253 = arith.truncf %252 : vector<8x64x4xf32> to vector<8x64x4xbf16>
    %254 = tpu.transpose %249, [0, 2, 1] : vector<8x4x64xf32> -> vector<8x64x4xf32>
    %255 = arith.truncf %254 : vector<8x64x4xf32> to vector<8x64x4xbf16>
    "tpu.trace_start"() <{level = 10 : i32, message = "hnd,hmd->hnm"}> : () -> ()
    %cst_146 = arith.constant dense<0.000000e+00> : vector<8x64x64xf32>
    %256 = tpu.matmul %253, %255, %cst_146 {dimension_numbers = #tpu.dot_dimension_numbers<[2], [2], [1], [1], [0, 0, 0, 1, 1, 1], [0], [0]>} : vector<8x64x4xbf16>, vector<8x64x4xbf16>, vector<8x64x64xf32> -> vector<8x64x64xf32>
    "tpu.trace_stop"() : () -> ()
    %cst_147 = arith.constant 5.000000e-01 : f32
    %257 = vector.broadcast %cst_147 : f32 to vector<8x64x64xf32>
    %258 = arith.mulf %256, %257 : vector<8x64x64xf32>
    %cst_148 = arith.constant dense<0xFF800000> : vector<8x64xf32>
    %259 = vector.multi_reduction <maximumf>, %258, %cst_148 [2] : vector<8x64x64xf32> to vector<8x64xf32>
    %260 = vector.shape_cast %259 : vector<8x64xf32> to vector<8x64x1xf32>
    %261 = vector.broadcast %260 : vector<8x64x1xf32> to vector<8x64x64xf32>
    %262 = arith.subf %258, %261 : vector<8x64x64xf32>
    %263 = math.exp %262 : vector<8x64x64xf32>
    %cst_149 = arith.constant dense<0.000000e+00> : vector<8x64xf32>
    %264 = vector.multi_reduction <add>, %263, %cst_149 [2] : vector<8x64x64xf32> to vector<8x64xf32>
    %265 = vector.shape_cast %264 : vector<8x64xf32> to vector<8x64x1xf32>
    %266 = tpu.reciprocal %265 {approx = true} : vector<8x64x1xf32> -> vector<8x64x1xf32>
    %267 = vector.broadcast %266 : vector<8x64x1xf32> to vector<8x64x64xf32>
    %268 = arith.mulf %263, %267 : vector<8x64x64xf32>
    %269 = arith.truncf %251 : vector<8x4x64xf32> to vector<8x4x64xbf16>
    %270 = arith.truncf %268 : vector<8x64x64xf32> to vector<8x64x64xbf16>
    "tpu.trace_start"() <{level = 10 : i32, message = "hdm,hnm->hdn"}> : () -> ()
    %cst_150 = arith.constant dense<0.000000e+00> : vector<8x4x64xf32>
    %271 = tpu.matmul %269, %270, %cst_150 {dimension_numbers = #tpu.dot_dimension_numbers<[2], [2], [1], [1], [0, 0, 0, 1, 1, 1], [0], [0]>} : vector<8x4x64xbf16>, vector<8x64x64xbf16>, vector<8x4x64xf32> -> vector<8x4x64xf32>
    "tpu.trace_stop"() : () -> ()
    %272 = vector.shape_cast %271 : vector<8x4x64xf32> to vector<32x64xf32>
    %c0_151 = arith.constant 0 : index
    %c0_152 = arith.constant 0 : index
    %273 = vector.load %arg6[%c0_151, %c0_152] : memref<32x32xbf16, #tpu.memory_space<vmem>>, vector<32x32xbf16>
    %274 = arith.truncf %272 : vector<32x64xf32> to vector<32x64xbf16>
    %cst_153 = arith.constant dense<0.000000e+00> : vector<32x64xf32>
    %275 = tpu.matmul %273, %274, %cst_153 {dimension_numbers = #tpu.dot_dimension_numbers<[1], [0], [0], [1], [0, 0, 1, 1], [], []>} : vector<32x32xbf16>, vector<32x64xbf16>, vector<32x64xf32> -> vector<32x64xf32>
    %c0_154 = arith.constant 0 : index
    %c0_155 = arith.constant 0 : index
    %276 = vector.load %arg7[%c0_154, %c0_155] : memref<32x1xf32, #tpu.memory_space<vmem>>, vector<32x1xf32>
    %277 = vector.broadcast %276 : vector<32x1xf32> to vector<32x64xf32>
    %278 = arith.addf %275, %277 : vector<32x64xf32>
    %c0_156 = arith.constant 0 : index
    %c0_157 = arith.constant 0 : index
    %c0_158 = arith.constant 0 : index
    %279 = vector.load %arg8[%c0_156, %c0_157, %c0_158] : memref<1x32x64xf32, #tpu.memory_space<vmem>>, vector<1x32x64xf32>
    %280 = vector.shape_cast %279 : vector<1x32x64xf32> to vector<32x64xf32>
    %281 = vector.shape_cast %278 : vector<32x64xf32> to vector<1x32x64xf32>
    tpu.vector_store %arg8[%c0_156, %c0_157, %c0_158], %281 {strides = array<i32>} : memref<1x32x64xf32, #tpu.memory_space<vmem>>, vector<1x32x64xf32>,
    return
  }
  func.func @transform_0(%arg0: i32) -> (i32, i32, i32, i32, i32) {
    %c0_i32 = arith.constant 0 : i32
    %c0_i32_0 = arith.constant 0 : i32
    %c0_i32_1 = arith.constant 0 : i32
    %c0_i32_2 = arith.constant 0 : i32
    %c0_i32_3 = arith.constant 0 : i32
    return %arg0, %c0_i32, %c0_i32_0, %c0_i32_1, %c0_i32_2 : i32, i32, i32, i32, i32
  }
  func.func @transform_1(%arg0: i32) -> (i32, i32) {
    %c0_i32 = arith.constant 0 : i32
    %c0_i32_0 = arith.constant 0 : i32
    %c0_i32_1 = arith.constant 0 : i32
    return %c0_i32, %c0_i32_0 : i32, i32
  }
  func.func @transform_2(%arg0: i32) -> (i32, i32) {
    %c0_i32 = arith.constant 0 : i32
    %c0_i32_0 = arith.constant 0 : i32
    %c0_i32_1 = arith.constant 0 : i32
    return %c0_i32, %c0_i32_0 : i32, i32
  }
  func.func @transform_3(%arg0: i32) -> (i32, i32) {
    %c0_i32 = arith.constant 0 : i32
    %c0_i32_0 = arith.constant 0 : i32
    %c0_i32_1 = arith.constant 0 : i32
    return %c0_i32, %c0_i32_0 : i32, i32
  }
  func.func @transform_4(%arg0: i32) -> (i32, i32) {
    %c0_i32 = arith.constant 0 : i32
    %c0_i32_0 = arith.constant 0 : i32
    %c0_i32_1 = arith.constant 0 : i32
    return %c0_i32, %c0_i32_0 : i32, i32
  }
  func.func @transform_5(%arg0: i32) -> (i32, i32) {
    %c0_i32 = arith.constant 0 : i32
    %c0_i32_0 = arith.constant 0 : i32
    %c0_i32_1 = arith.constant 0 : i32
    return %c0_i32, %c0_i32_0 : i32, i32
  }
  func.func @transform_6(%arg0: i32) -> (i32, i32) {
    %c0_i32 = arith.constant 0 : i32
    %c0_i32_0 = arith.constant 0 : i32
    %c0_i32_1 = arith.constant 0 : i32
    return %c0_i32, %c0_i32_0 : i32, i32
  }
  func.func @transform_7(%arg0: i32) -> (i32, i32, i32) {
    %c0_i32 = arith.constant 0 : i32
    %c0_i32_0 = arith.constant 0 : i32
    %c0_i32_1 = arith.constant 0 : i32
    return %arg0, %c0_i32, %c0_i32_0 : i32, i32, i32
  }
}

</mosaic_0001>

<bundles_post_ra>
// kernel: tpu_custom_call.1
= control target key start
LH: loop header
LB: loop body
LE: loop exit
PB: predicated region body
PF: predicated region fallthrough
CT: control target
= control target key end

     0   :  { %12 = vsyncpa [#allocation3], 0  ;;  %s8824_s0 = inlined_call_operand.vmem [shape: f32[2,6,6,6,32], index: 0, kind: input, shape index: {}]   ;;  %s8825_s1 = inlined_call_operand.vmem [shape: f32[27,32], index: 1, kind: input, shape index: {}]   ;;  %s8826_s2 = inlined_call_operand.vmem [shape: f32[1,32], index: 2, kind: input, shape index: {}]   ;;  %s8827_s3 = inlined_call_operand.vmem [shape: bf16[96,32], index: 3, kind: input, shape index: {}]   ;;  %s8828_s4 = inlined_call_operand.vmem [shape: f32[96,1], index: 4, kind: input, shape index: {}]   ;;  %s8829_s5 = inlined_call_operand.vmem [shape: bf16[32,32], index: 5, kind: input, shape index: {}]   ;;  %s8830_s6 = inlined_call_operand.vmem [shape: f32[32,1], index: 6, kind: input, shape index: {}]   ;;  %s8831_s7 = inlined_call_operand.hbm [shape: f32[2,32,64], index: 7, kind: output, shape index: {}]  }
   0x1   :  { %14 = vsyncpa [#allocation3 + $0x1], 0  ;;  %s6528_s24 = smov 0   ;;  %s6530_s25 = smov 0  }
   0x2   :  { %s6532_s26 = smov 0   ;;  %s6534_s27 = smov 0  }
   0x3 LB: > { %s6549_s28 = sadd.s32 4294967295, %s6480_s27   ;;  %s4911_s29 = sadd.s32 4294967294, %s6480_s27   ;;  %s6480_s27 = sphi %s6534_s27, %s8949_s27   ;;  %s6476_s26 = sphi %s6532_s26, %s8948_s26   ;;  %s6472_s25 = sphi %s6530_s25, %s8947_s25   ;;  %s6468_s24 = sphi %s6528_s24, %s8946_s24  }
   0x4   : > { %s6553_s30 = sadd.s32 1, %s6480_s27   ;;  %s179_s8 = sadd.s32 1, %s6476_s26 }
   0x5   : > { %s176_s9 = ssub.s32 %s6480_s27, %s6553_s30  ;;  %p189_p0 = scmp.ne.s32.totalorder %s6476_s26, %s6472_s25 }
   0x6   : > { %p177_p1 = scmp.eq.s32.totalorder %s176_s9, 0  ;;  %p190_p2 = scmp.eq.s32.totalorder %s6549_s28, 1 }
   0x7   : > { %p195_p3 = scmp.ne.s32.totalorder %s6472_s25, %s6468_s24  ;;  %p196_p4 = scmp.eq.s32.totalorder %s4911_s29, 1 }
   0x8   : > { %s6564_s10 = scalar_select %p177_p1, %s6476_s26, %s179_s8  }
   0x9   : > { %p6566_p5 = por %p190_p2, %p189_p0  ;;  %p6570_p6 = por %p196_p4, %p195_p3 }
   0xa   : > { %p4914_p7 = scmp.ge.s32.totalorder %s6480_s27, 1  ;;  %p240_p8 = scmp.lt.s32.totalorder %s6480_s27, 3 }
   0xc   : > { %p241_p9 = pnand %p4914_p7, %p240_p8 }
   0xe   : > { %244 = sbr.rel (%p241_p9) target bundleno = 1921 (0x781), region = 48 }
  0x13   : > { %p272_p10 = scmp.lt.s32.totalorder %s6549_s28, 1  ;;  %v298_v0 = vlaneseq  ;;  %v278_v1 = vld [vmem:[%s8825_s1] sm:$0xff]  ;;  %v6584_v3 = vld [vmem:[%s8825_s1 + $0x8] sm:$0xff]  ;;  %vm1751_vm0 = vcmask 261120   ;;  %vm2758_vm1 = vcmask 31744   ;;  %vm3535_vm2 = vcmask 523264  }
  0x14   : > { %vm6484_vm3 = vmmov 0   ;;  %s269_s22 = sand.u32 1, %s6472_s25   ;;  %s5363_s9 = sshll.u32 %s6549_s28, 9 }
  0x15   : > { %s273_s15 = scalar_select %p272_p10, %s6549_s28, 1  ;;  %v299_v2 = vshrl.u32 %v298_v0, 7 }
  0x16   : > { %s4915_s23 = sshll.u32 %s269_s22, 5  ;;  %s8784_s28 = scalar_lea.sflag [#allocation3], %s269_s22 }
  0x17   : > { %s5770_s16 = smul.u32 288, %s273_s15  ;;  %v6586_v4 = vsub.s32 0, %v299_v2  ;;  %v6588_v5 = vsub.s32 1, %v299_v2  ;;  %v6590_v6 = vsub.s32 2, %v299_v2  ;;  %v6592_v7 = vsub.s32 3, %v299_v2  ;;  %s271_s29 = scalar_lea.vmem [#allocation2], %s4915_s23 }
  0x18   : > { %v6594_v8 = vsub.s32 4, %v299_v2  ;;  %v6596_v9 = vsub.s32 5, %v299_v2  ;;  %v6598_v10 = vsub.s32 6, %v299_v2  ;;  %v6600_v11 = vsub.s32 7, %v299_v2  ;;  %s4849_s8 = sshll.u32 %s271_s29, 4  ;;  %s8781_s15 = scalar_lea.hbm %s8831_s7, %s5363_s9  ;;  %s8775_s8 = int_to_ptr.vmem [resolvable:$true] %s4849_s8 }
  0x19   : > { %8869 = vst [vmem:[#allocation5_spill] sm:$0xff] %v6592_v7  ;;  %s6605_s21 = scalar_lea.vmem %s8824_s0, %s5770_s16  ;;  %v301_v12 = vrot.slane %v278_v1, %v6586_v4  ;;  %v6612_v16 = vrot.slane %v278_v1, %v6588_v5  ;;  %v6615_v17 = vrot.slane %v278_v1, %v6590_v6  ;;  %v6618_v18 = vrot.slane %v278_v1, %v6592_v7  ;;  %s6420_s16 = scalar_lea.vmem %s8775_s8, 512 }
  0x1a   : > { %8870 = vst [vmem:[#allocation6_spill] sm:$0xff] %v6594_v8  ;;  %8871 = vst [vmem:[#allocation7_spill] sm:$0xff] %v6596_v9  ;;  %v282_v13 = vld [vmem:[%s6605_s21] sm:$0xf]  ;;  %v283_v14 = vld [vmem:[%s6605_s21 + $0x8] sm:$0xf]  ;;  %v6624_v22 = vrot.slane %v278_v1, %v6594_v8  ;;  %v6627_v23 = vrot.slane %v278_v1, %v6596_v9  ;;  %v6630_v24 = vrot.slane %v278_v1, %v6598_v10  ;;  %p6421_p11 = scmp.ne.s32.totalorder %s8775_s8, %s6420_s16 }
  0x1b   : > { %8872 = vst [vmem:[#allocation8_spill] sm:$0xff] %v6598_v10  ;;  %v284_v15 = vld [vmem:[%s6605_s21 + $0x10] sm:$0xf]  ;;  %v285_v19 = vld [vmem:[%s6605_s21 + $0x18] sm:$0xf]  ;;  %v6633_v25 = vrot.slane %v278_v1, %v6600_v11  ;;  %v302_v29 = vmul.f32 %v301_v12, %v282_v13  ;;  %v6638_v30 = vmul.f32 %v301_v12, %v283_v14  ;;  %v6644_v32 = vrot.slane %v6584_v3, %v6586_v4  ;;  %s6485_s17 = smov [#allocation2]  }
  0x1c   : > { %v286_v20 = vld [vmem:[%s6605_s21 + $0x30] sm:$0xf]  ;;  %v287_v21 = vld [vmem:[%s6605_s21 + $0x38] sm:$0xf]  ;;  %v288_v26 = vld [vmem:[%s6605_s21 + $0x40] sm:$0xf]  ;;  %v6640_v31 = vmul.f32 %v301_v12, %v284_v15  ;;  %v305_v36 = vmul.f32 %v301_v12, %v285_v19  ;;  %v6651_v39 = vrot.slane %v6584_v3, %v6588_v5  ;;  %v6658_v46 = vrot.slane %v6584_v3, %v6590_v6  ;;  %p6422_p12 = pnand %p6421_p11, %p6566_p5 }
  0x1d   : > { %v289_v27 = vld [vmem:[%s6605_s21 + $0x48] sm:$0xf]  ;;  %v290_v28 = vld [vmem:[%s6605_s21 + $0x60] sm:$0xf]  ;;  %v292_v34 = vld [vmem:[%s6605_s21 + $0x70] sm:$0xf]  ;;  %v306_v37 = vmul.f32 %v301_v12, %v286_v20  ;;  %v307_v38 = vmul.f32 %v301_v12, %v287_v21  ;;  %v308_v43 = vmul.f32 %v301_v12, %v288_v26  ;;  %v6665_v53 = vrot.slane %v6584_v3, %v6592_v7 }
  0x1e   : > { %v291_v33 = vld [vmem:[%s6605_s21 + $0x68] sm:$0xf]  ;;  %v293_v35 = vld [vmem:[%s6605_s21 + $0x78] sm:$0xf]  ;;  %v294_v40 = vld [vmem:[%s6605_s21 + $0x90] sm:$0xf]  ;;  %v309_v44 = vmul.f32 %v301_v12, %v289_v27  ;;  %v310_v45 = vmul.f32 %v301_v12, %v290_v28  ;;  %v312_v49 = vmul.f32 %v301_v12, %v292_v34  ;;  %v6672_v60 = vrot.slane %v6584_v3, %v6594_v8  ;;  %p6423_p13 = pneg %p6422_p12 }
  0x1f   : > { %v295_v41 = vld [vmem:[%s6605_s21 + $0x98] sm:$0xf]  ;;  %v296_v42 = vld [vmem:[%s6605_s21 + $0xa0] sm:$0xf]  ;;  %v297_v47 = vld [vmem:[%s6605_s21 + $0xa8] sm:$0xf]  ;;  %v311_v48 = vmul.f32 %v301_v12, %v291_v33  ;;  %v313_v50 = vmul.f32 %v301_v12, %v293_v35  ;;  %v314_v54 = vmul.f32 %v301_v12, %v294_v40  ;;  %v6681_v13 = vrot.slane %v6584_v3, %v6596_v9 }
  0x20   : > { %v334_v51 = vld [vmem:[%s6605_s21 + $0x1] sm:$0xf]  ;;  %v335_v52 = vld [vmem:[%s6605_s21 + $0x9] sm:$0xf]  ;;  %v315_v55 = vmul.f32 %v301_v12, %v295_v41  ;;  %v316_v56 = vmul.f32 %v301_v12, %v296_v42  ;;  %v336_v57 = vld [vmem:[%s6605_s21 + $0x11] sm:$0xf]  ;;  %v317_v61 = vmul.f32 %v301_v12, %v297_v47  ;;  %v6691_v26 = vrot.slane %v6584_v3, %v6598_v10 }
  0x21   : > { %v337_v58 = vld [vmem:[%s6605_s21 + $0x19] sm:$0xf]  ;;  %v338_v59 = vld [vmem:[%s6605_s21 + $0x31] sm:$0xf]  ;;  %v340_v63 = vld [vmem:[%s6605_s21 + $0x41] sm:$0xf]  ;;  %v354_v1 = vmul.f32 %v6612_v16, %v334_v51  ;;  %v355_v2 = vmul.f32 %v6612_v16, %v335_v52  ;;  %v356_v20 = vmul.f32 %v6612_v16, %v336_v57 }
  0x22   : > { %v339_v62 = vld [vmem:[%s6605_s21 + $0x39] sm:$0xf]  ;;  %v341_v0 = vld [vmem:[%s6605_s21 + $0x49] sm:$0xf]  ;;  %v342_v14 = vld [vmem:[%s6605_s21 + $0x61] sm:$0xf]  ;;  %v357_v12 = vmul.f32 %v6612_v16, %v337_v58  ;;  %v358_v21 = vmul.f32 %v6612_v16, %v338_v59  ;;  %v360_v35 = vmul.f32 %v6612_v16, %v340_v63 }
  0x23   : > { %v343_v15 = vld [vmem:[%s6605_s21 + $0x69] sm:$0xf]  ;;  %v344_v19 = vld [vmem:[%s6605_s21 + $0x71] sm:$0xf]  ;;  %v345_v27 = vld [vmem:[%s6605_s21 + $0x79] sm:$0xf]  ;;  %v359_v34 = vmul.f32 %v6612_v16, %v339_v62  ;;  %v361_v40 = vmul.f32 %v6612_v16, %v341_v0  ;;  %v362_v41 = vmul.f32 %v6612_v16, %v342_v14  ;;  %v370_v63 = vadd.f32 %v354_v1, %v302_v29 }
  0x24   : > { %v346_v28 = vld [vmem:[%s6605_s21 + $0x91] sm:$0xf]  ;;  %v347_v33 = vld [vmem:[%s6605_s21 + $0x99] sm:$0xf]  ;;  %v348_v42 = vld [vmem:[%s6605_s21 + $0xa1] sm:$0xf]  ;;  %v363_v3 = vmul.f32 %v6612_v16, %v343_v15  ;;  %v364_v51 = vmul.f32 %v6612_v16, %v344_v19  ;;  %v365_v52 = vmul.f32 %v6612_v16, %v345_v27  ;;  %v371_v14 = vadd.f32 %v355_v2, %v6638_v30 }
  0x25   : > { %v349_v47 = vld [vmem:[%s6605_s21 + $0xa9] sm:$0xf]  ;;  %v366_v57 = vmul.f32 %v6612_v16, %v346_v28  ;;  %v367_v58 = vmul.f32 %v6612_v16, %v347_v33  ;;  %v368_v59 = vmul.f32 %v6612_v16, %v348_v42  ;;  %v386_v0 = vld [vmem:[%s6605_s21 + $0x2] sm:$0xf]  ;;  %v372_v15 = vadd.f32 %v356_v20, %v6640_v31  ;;  %v388_v33 = vld [vmem:[%s6605_s21 + $0x12] sm:$0xf] }
  0x26   : > { %v369_v62 = vmul.f32 %v6612_v16, %v349_v47  ;;  %v373_v19 = vadd.f32 %v357_v12, %v305_v36  ;;  %v374_v27 = vadd.f32 %v358_v21, %v306_v37  ;;  %v387_v28 = vld [vmem:[%s6605_s21 + $0xa] sm:$0xf]  ;;  %v389_v10 = vld [vmem:[%s6605_s21 + $0x1a] sm:$0xf]  ;;  %v375_v9 = vadd.f32 %v359_v34, %v307_v38  ;;  %v390_v29 = vld [vmem:[%s6605_s21 + $0x32] sm:$0xf] }
  0x27   : > { %v376_v42 = vadd.f32 %v360_v35, %v308_v43  ;;  %v377_v8 = vadd.f32 %v361_v40, %v309_v44  ;;  %v378_v16 = vadd.f32 %v362_v41, %v310_v45  ;;  %v391_v1 = vld [vmem:[%s6605_s21 + $0x3a] sm:$0xf]  ;;  %v392_v30 = vld [vmem:[%s6605_s21 + $0x42] sm:$0xf]  ;;  %v379_v31 = vadd.f32 %v363_v3, %v311_v48  ;;  %v393_v20 = vld [vmem:[%s6605_s21 + $0x4a] sm:$0xf] }
  0x28   : > { %v380_v36 = vadd.f32 %v364_v51, %v312_v49  ;;  %v381_v37 = vadd.f32 %v365_v52, %v313_v50  ;;  %v382_v2 = vadd.f32 %v366_v57, %v314_v54  ;;  %v394_v12 = vld [vmem:[%s6605_s21 + $0x62] sm:$0xf]  ;;  %v395_v21 = vld [vmem:[%s6605_s21 + $0x6a] sm:$0xf]  ;;  %v383_v38 = vadd.f32 %v367_v58, %v315_v55  ;;  %v396_v44 = vld [vmem:[%s6605_s21 + $0x72] sm:$0xf] }
  0x29   : > { %v384_v43 = vadd.f32 %v368_v59, %v316_v56  ;;  %v385_v34 = vadd.f32 %v369_v62, %v317_v61  ;;  %v397_v35 = vld [vmem:[%s6605_s21 + $0x7a] sm:$0xf]  ;;  %v398_v45 = vld [vmem:[%s6605_s21 + $0x92] sm:$0xf]  ;;  %v406_v40 = vmul.f32 %v6615_v17, %v386_v0  ;;  %v400_v47 = vld [vmem:[%s6605_s21 + $0xa2] sm:$0xf]  ;;  %v407_v48 = vmul.f32 %v6615_v17, %v387_v28 }
  0x2a   : > { %v399_v41 = vld [vmem:[%s6605_s21 + $0x9a] sm:$0xf]  ;;  %v401_v7 = vld [vmem:[%s6605_s21 + $0xaa] sm:$0xf]  ;;  %v408_v49 = vmul.f32 %v6615_v17, %v388_v33  ;;  %v409_v50 = vmul.f32 %v6615_v17, %v389_v10  ;;  %v410_v54 = vmul.f32 %v6615_v17, %v390_v29  ;;  %v411_v55 = vmul.f32 %v6615_v17, %v391_v1  ;;  %s6424_s18 = sshll.u32 %s6485_s17, 4  ;;  %s6425_s18 = int_to_ptr.vmem [resolvable:$false] %s6424_s18 }
  0x2b   : > { %v412_v56 = vmul.f32 %v6615_v17, %v392_v30  ;;  %v413_v61 = vmul.f32 %v6615_v17, %v393_v20  ;;  %v414_v3 = vmul.f32 %v6615_v17, %v394_v12  ;;  %v415_v51 = vmul.f32 %v6615_v17, %v395_v21  ;;  %v4917_v28 = vld [vmem:[%s6605_s21 + $0x8] sm:$0xf]  ;;  %v4918_v20 = vld [vmem:[%s6605_s21 + $0x10] sm:$0xf]  ;;  %v4919_v12 = vld [vmem:[%s6605_s21 + $0x18] sm:$0xf]  ;;  %p6427_p0 = scmp.lt.s32.totalorder %s8775_s8, %s6425_s18 }
  0x2c   : > { %v416_v52 = vmul.f32 %v6615_v17, %v396_v44  ;;  %v417_v57 = vmul.f32 %v6615_v17, %v397_v35  ;;  %v418_v10 = vmul.f32 %v6615_v17, %v398_v45  ;;  %v419_v58 = vmul.f32 %v6615_v17, %v399_v41  ;;  %v4920_v21 = vld [vmem:[%s6605_s21 + $0x20] sm:$0xf]  ;;  %s6426_s19 = scalar_lea.vmem %s6425_s18, 1024 }
  0x2d   : > { %v420_v59 = vmul.f32 %v6615_v17, %v400_v47  ;;  %v421_v62 = vmul.f32 %v6615_v17, %v401_v7  ;;  %v422_v0 = vadd.f32 %v406_v40, %v370_v63  ;;  %v423_v33 = vadd.f32 %v407_v48, %v371_v14  ;;  %v4921_v7 = vld [vmem:[%s6605_s21 + $0x38] sm:$0xf]  ;;  %v4922_v17 = vld [vmem:[%s6605_s21 + $0x40] sm:$0xf]  ;;  %v4923_v63 = vld [vmem:[%s6605_s21 + $0x48] sm:$0xf]  ;;  %p6428_p1 = scmp.lt.s32.totalorder %s6426_s19, %s6420_s16 }
  0x2e   : > { %v424_v29 = vadd.f32 %v408_v49, %v372_v15  ;;  %v425_v1 = vadd.f32 %v409_v50, %v373_v19  ;;  %v426_v30 = vadd.f32 %v410_v54, %v374_v27  ;;  %v427_v44 = vadd.f32 %v411_v55, %v375_v9  ;;  %v4924_v40 = vld [vmem:[%s6605_s21 + $0x50] sm:$0xf]  ;;  %v4925_v47 = vld [vmem:[%s6605_s21 + $0x68] sm:$0xf]  ;;  %v4928_v50 = vld [vmem:[%s6605_s21 + $0x80] sm:$0xf] }
  0x2f   : > { %v428_v35 = vadd.f32 %v412_v56, %v376_v42  ;;  %v429_v45 = vadd.f32 %v413_v61, %v377_v8  ;;  %v430_v41 = vadd.f32 %v414_v3, %v378_v16  ;;  %v431_v14 = vadd.f32 %v415_v51, %v379_v31  ;;  %v4926_v48 = vld [vmem:[%s6605_s21 + $0x70] sm:$0xf]  ;;  %v4927_v8 = vld [vmem:[%s6605_s21 + $0x78] sm:$0xf]  ;;  %v4930_v55 = vld [vmem:[%s6605_s21 + $0xa0] sm:$0xf]  ;;  %p6429_p2 = por %p6428_p1, %p6427_p0 }
  0x30   : > { %v432_v15 = vadd.f32 %v416_v52, %v380_v36  ;;  %v433_v19 = vadd.f32 %v417_v57, %v381_v37  ;;  %v434_v27 = vadd.f32 %v418_v10, %v382_v2  ;;  %v435_v9 = vadd.f32 %v419_v58, %v383_v38  ;;  %v4929_v16 = vld [vmem:[%s6605_s21 + $0x98] sm:$0xf]  ;;  %v4931_v56 = vld [vmem:[%s6605_s21 + $0xa8] sm:$0xf]  ;;  %v4932_v61 = vld [vmem:[%s6605_s21 + $0xb0] sm:$0xf] }
  0x31   : > { %v436_v42 = vadd.f32 %v420_v59, %v384_v43  ;;  %v437_v49 = vadd.f32 %v421_v62, %v385_v34  ;;  %v459_v54 = vmul.f32 %v4917_v28, %v6618_v18  ;;  %v460_v31 = vmul.f32 %v4918_v20, %v6618_v18  ;;  %v4933_v20 = vld [vmem:[%s6605_s21 + $0x9] sm:$0xf]  ;;  %p6430_p3 = pnand %p6429_p2, %p6423_p13 }
  0x32   : > { %v461_v36 = vmul.f32 %v4919_v12, %v6618_v18  ;;  %v462_v37 = vmul.f32 %v4920_v21, %v6618_v18  ;;  %v463_v2 = vmul.f32 %v4921_v7, %v6618_v18  ;;  %v464_v38 = vmul.f32 %v4922_v17, %v6618_v18 }
  0x33   : > { %v465_v43 = vmul.f32 %v4923_v63, %v6618_v18  ;;  %v466_v34 = vmul.f32 %v4924_v40, %v6618_v18  ;;  %v467_v3 = vmul.f32 %v4925_v47, %v6618_v18  ;;  %v468_v51 = vmul.f32 %v4926_v48, %v6618_v18  ;;  %v4934_v63 = vld [vmem:[%s6605_s21 + $0x11] sm:$0xf]  ;;  %v4935_v40 = vld [vmem:[%s6605_s21 + $0x19] sm:$0xf]  ;;  %v4936_v47 = vld [vmem:[%s6605_s21 + $0x21] sm:$0xf] }
  0x34   : > { %v469_v52 = vmul.f32 %v4927_v8, %v6618_v18  ;;  %v470_v57 = vmul.f32 %v4928_v50, %v6618_v18  ;;  %v471_v10 = vmul.f32 %v4929_v16, %v6618_v18  ;;  %v472_v58 = vmul.f32 %v4930_v55, %v6618_v18  ;;  %v4940_v55 = vld [vmem:[%s6605_s21 + $0x51] sm:$0xf] }
  0x35   : > { %v473_v59 = vmul.f32 %v4931_v56, %v6618_v18  ;;  %v474_v62 = vmul.f32 %v4932_v61, %v6618_v18  ;;  %v475_v28 = vadd.f32 %v459_v54, %v422_v0  ;;  %v476_v12 = vadd.f32 %v460_v31, %v423_v33  ;;  %v4937_v18 = vld [vmem:[%s6605_s21 + $0x39] sm:$0xf]  ;;  %v4938_v0 = vld [vmem:[%s6605_s21 + $0x41] sm:$0xf]  ;;  %v4939_v33 = vld [vmem:[%s6605_s21 + $0x49] sm:$0xf] }
  0x36   : > { %v477_v21 = vadd.f32 %v461_v36, %v424_v29  ;;  %v478_v7 = vadd.f32 %v462_v37, %v425_v1  ;;  %v479_v17 = vadd.f32 %v463_v2, %v426_v30  ;;  %v480_v48 = vadd.f32 %v464_v38, %v427_v44  ;;  %v4941_v56 = vld [vmem:[%s6605_s21 + $0x69] sm:$0xf]  ;;  %v4942_v61 = vld [vmem:[%s6605_s21 + $0x71] sm:$0xf]  ;;  %v4944_v36 = vld [vmem:[%s6605_s21 + $0x81] sm:$0xf] }
  0x37   : > { %v481_v8 = vadd.f32 %v465_v43, %v428_v35  ;;  %v482_v50 = vadd.f32 %v466_v34, %v429_v45  ;;  %v483_v16 = vadd.f32 %v467_v3, %v430_v41  ;;  %v484_v29 = vadd.f32 %v468_v51, %v431_v14  ;;  %v4943_v45 = vld [vmem:[%s6605_s21 + $0x79] sm:$0xf]  ;;  %v4946_v2 = vld [vmem:[%s6605_s21 + $0xa1] sm:$0xf]  ;;  %v4947_v38 = vld [vmem:[%s6605_s21 + $0xa9] sm:$0xf] }
  0x38   : > { %v485_v1 = vadd.f32 %v469_v52, %v432_v15  ;;  %v486_v30 = vadd.f32 %v470_v57, %v433_v19  ;;  %v487_v54 = vadd.f32 %v471_v10, %v434_v27  ;;  %v488_v44 = vadd.f32 %v472_v58, %v435_v9  ;;  %v4945_v41 = vld [vmem:[%s6605_s21 + $0x99] sm:$0xf]  ;;  %v4948_v43 = vld [vmem:[%s6605_s21 + $0xb1] sm:$0xf] }
  0x39   : > { %v489_v35 = vadd.f32 %v473_v59, %v436_v42  ;;  %v490_v31 = vadd.f32 %v474_v62, %v437_v49  ;;  %v511_v37 = vmul.f32 %v4933_v20, %v6624_v22  ;;  %v512_v14 = vmul.f32 %v4934_v63, %v6624_v22  ;;  %v4949_v20 = vld [vmem:[%s6605_s21 + $0xa] sm:$0xf] }
  0x3a   : > { %v513_v15 = vmul.f32 %v4935_v40, %v6624_v22  ;;  %v514_v19 = vmul.f32 %v4936_v47, %v6624_v22  ;;  %v515_v27 = vmul.f32 %v4937_v18, %v6624_v22  ;;  %v516_v9 = vmul.f32 %v4938_v0, %v6624_v22  ;;  %v4950_v0 = vld [vmem:[%s6605_s21 + $0x12] sm:$0xf] }
  0x3b   : > { %v517_v42 = vmul.f32 %v4939_v33, %v6624_v22  ;;  %v518_v49 = vmul.f32 %v4940_v55, %v6624_v22  ;;  %v519_v34 = vmul.f32 %v4941_v56, %v6624_v22  ;;  %v520_v3 = vmul.f32 %v4942_v61, %v6624_v22  ;;  %v4951_v33 = vld [vmem:[%s6605_s21 + $0x1a] sm:$0xf]  ;;  %v4952_v55 = vld [vmem:[%s6605_s21 + $0x22] sm:$0xf] }
  0x3c   : > { %v521_v51 = vmul.f32 %v4943_v45, %v6624_v22  ;;  %v522_v52 = vmul.f32 %v4944_v36, %v6624_v22  ;;  %v523_v57 = vmul.f32 %v4945_v41, %v6624_v22  ;;  %v524_v10 = vmul.f32 %v4946_v2, %v6624_v22  ;;  %v4957_v2 = vld [vmem:[%s6605_s21 + $0x6a] sm:$0xf] }
  0x3d   : > { %v525_v58 = vmul.f32 %v4947_v38, %v6624_v22  ;;  %v526_v59 = vmul.f32 %v4948_v43, %v6624_v22  ;;  %v527_v62 = vadd.f32 %v511_v37, %v475_v28  ;;  %v528_v63 = vadd.f32 %v512_v14, %v476_v12  ;;  %v4953_v22 = vld [vmem:[%s6605_s21 + $0x3a] sm:$0xf]  ;;  %v4954_v28 = vld [vmem:[%s6605_s21 + $0x42] sm:$0xf]  ;;  %v4955_v12 = vld [vmem:[%s6605_s21 + $0x4a] sm:$0xf] }
  0x3e   : > { %v529_v40 = vadd.f32 %v513_v15, %v477_v21  ;;  %v530_v47 = vadd.f32 %v514_v19, %v478_v7  ;;  %v531_v18 = vadd.f32 %v515_v27, %v479_v17  ;;  %v532_v56 = vadd.f32 %v516_v9, %v480_v48  ;;  %v4956_v37 = vld [vmem:[%s6605_s21 + $0x52] sm:$0xf]  ;;  %v4960_v14 = vld [vmem:[%s6605_s21 + $0x82] sm:$0xf]  ;;  %v4963_v27 = vld [vmem:[%s6605_s21 + $0xaa] sm:$0xf] }
  0x3f   : > { %v533_v61 = vadd.f32 %v517_v42, %v481_v8  ;;  %v534_v45 = vadd.f32 %v518_v49, %v482_v50  ;;  %v535_v36 = vadd.f32 %v519_v34, %v483_v16  ;;  %v536_v21 = vadd.f32 %v520_v3, %v484_v29  ;;  %v4958_v38 = vld [vmem:[%s6605_s21 + $0x72] sm:$0xf]  ;;  %v4959_v50 = vld [vmem:[%s6605_s21 + $0x7a] sm:$0xf]  ;;  %v4962_v19 = vld [vmem:[%s6605_s21 + $0xa2] sm:$0xf] }
  0x40   : > { %v537_v7 = vadd.f32 %v521_v51, %v485_v1  ;;  %v538_v17 = vadd.f32 %v522_v52, %v486_v30  ;;  %v539_v41 = vadd.f32 %v523_v57, %v487_v54  ;;  %v540_v48 = vadd.f32 %v524_v10, %v488_v44  ;;  %v4961_v16 = vld [vmem:[%s6605_s21 + $0x9a] sm:$0xf]  ;;  %v4964_v9 = vld [vmem:[%s6605_s21 + $0xb2] sm:$0xf] }
  0x41   : > { %v541_v8 = vadd.f32 %v525_v58, %v489_v35  ;;  %v542_v43 = vadd.f32 %v526_v59, %v490_v31  ;;  %v563_v15 = vmul.f32 %v4949_v20, %v6627_v23  ;;  %v564_v29 = vmul.f32 %v4950_v0, %v6627_v23  ;;  %v4965_v59 = vld [vmem:[%s6605_s21 + $0x10] sm:$0xf] }
  0x42   : > { %v565_v1 = vmul.f32 %v4951_v33, %v6627_v23  ;;  %v566_v30 = vmul.f32 %v4952_v55, %v6627_v23  ;;  %v567_v54 = vmul.f32 %v4953_v22, %v6627_v23  ;;  %v568_v44 = vmul.f32 %v4954_v28, %v6627_v23  ;;  %v4966_v22 = vld [vmem:[%s6605_s21 + $0x18] sm:$0xf]  ;;  %v4967_v28 = vld [vmem:[%s6605_s21 + $0x20] sm:$0xf] }
  0x43   : > { %v569_v35 = vmul.f32 %v4955_v12, %v6627_v23  ;;  %v570_v31 = vmul.f32 %v4956_v37, %v6627_v23  ;;  %v571_v42 = vmul.f32 %v4957_v2, %v6627_v23  ;;  %v572_v49 = vmul.f32 %v4958_v38, %v6627_v23  ;;  %v4968_v12 = vld [vmem:[%s6605_s21 + $0x28] sm:$0xf] }
  0x44   : > { %v573_v34 = vmul.f32 %v4959_v50, %v6627_v23  ;;  %v574_v3 = vmul.f32 %v4960_v14, %v6627_v23  ;;  %v575_v51 = vmul.f32 %v4961_v16, %v6627_v23  ;;  %v576_v52 = vmul.f32 %v4962_v19, %v6627_v23  ;;  %v4972_v16 = vld [vmem:[%s6605_s21 + $0x58] sm:$0xf] }
  0x45   : > { %v577_v57 = vmul.f32 %v4963_v27, %v6627_v23  ;;  %v578_v10 = vmul.f32 %v4964_v9, %v6627_v23  ;;  %v579_v58 = vadd.f32 %v563_v15, %v527_v62  ;;  %v580_v20 = vadd.f32 %v564_v29, %v528_v63  ;;  %v4969_v23 = vld [vmem:[%s6605_s21 + $0x40] sm:$0xf]  ;;  %v4970_v62 = vld [vmem:[%s6605_s21 + $0x48] sm:$0xf]  ;;  %v4971_v63 = vld [vmem:[%s6605_s21 + $0x50] sm:$0xf] }
  0x46   : > { %v581_v0 = vadd.f32 %v565_v1, %v529_v40  ;;  %v582_v33 = vadd.f32 %v566_v30, %v530_v47  ;;  %v583_v55 = vadd.f32 %v567_v54, %v531_v18  ;;  %v584_v37 = vadd.f32 %v568_v44, %v532_v56  ;;  %v4973_v15 = vld [vmem:[%s6605_s21 + $0x70] sm:$0xf]  ;;  %v4974_v19 = vld [vmem:[%s6605_s21 + $0x78] sm:$0xf]  ;;  %v4976_v9 = vld [vmem:[%s6605_s21 + $0x88] sm:$0xf] }
  0x47   : > { %v585_v2 = vadd.f32 %v569_v35, %v533_v61  ;;  %v586_v38 = vadd.f32 %v570_v31, %v534_v45  ;;  %v587_v50 = vadd.f32 %v571_v42, %v535_v36  ;;  %v588_v40 = vadd.f32 %v572_v49, %v536_v21  ;;  %v4975_v45 = vld [vmem:[%s6605_s21 + $0x80] sm:$0xf]  ;;  %v4978_v1 = vld [vmem:[%s6605_s21 + $0xa8] sm:$0xf]  ;;  %v4979_v30 = vld [vmem:[%s6605_s21 + $0xb0] sm:$0xf] }
  0x48   : > { %v589_v47 = vadd.f32 %v573_v34, %v537_v7  ;;  %v590_v18 = vadd.f32 %v574_v3, %v538_v17  ;;  %v591_v14 = vadd.f32 %v575_v51, %v539_v41  ;;  %v592_v56 = vadd.f32 %v576_v52, %v540_v48  ;;  %v4977_v36 = vld [vmem:[%s6605_s21 + $0xa0] sm:$0xf]  ;;  %v4980_v54 = vld [vmem:[%s6605_s21 + $0xb8] sm:$0xf] }
  0x49   : > { %v593_v61 = vadd.f32 %v577_v57, %v541_v8  ;;  %v594_v27 = vadd.f32 %v578_v10, %v542_v43  ;;  %v616_v29 = vmul.f32 %v4965_v59, %v6630_v24  ;;  %v617_v21 = vmul.f32 %v4966_v22, %v6630_v24  ;;  %v4981_v57 = vld [vmem:[%s6605_s21 + $0x11] sm:$0xf] }
  0x4a   : > { %v618_v7 = vmul.f32 %v4967_v28, %v6630_v24  ;;  %v619_v17 = vmul.f32 %v4968_v12, %v6630_v24  ;;  %v620_v41 = vmul.f32 %v4969_v23, %v6630_v24  ;;  %v621_v48 = vmul.f32 %v4970_v62, %v6630_v24  ;;  %v4982_v12 = vld [vmem:[%s6605_s21 + $0x19] sm:$0xf]  ;;  %v4983_v23 = vld [vmem:[%s6605_s21 + $0x21] sm:$0xf]  ;;  %v4984_v62 = vld [vmem:[%s6605_s21 + $0x29] sm:$0xf] }
  0x4b   : > { %v622_v8 = vmul.f32 %v4971_v63, %v6630_v24  ;;  %v623_v43 = vmul.f32 %v4972_v16, %v6630_v24  ;;  %v624_v44 = vmul.f32 %v4973_v15, %v6630_v24  ;;  %v625_v35 = vmul.f32 %v4974_v19, %v6630_v24 }
  0x4c   : > { %v626_v31 = vmul.f32 %v4975_v45, %v6630_v24  ;;  %v627_v42 = vmul.f32 %v4976_v9, %v6630_v24  ;;  %v628_v49 = vmul.f32 %v4977_v36, %v6630_v24  ;;  %v629_v34 = vmul.f32 %v4978_v1, %v6630_v24  ;;  %v4988_v9 = vld [vmem:[%s6605_s21 + $0x59] sm:$0xf]  ;;  %v4989_v36 = vld [vmem:[%s6605_s21 + $0x71] sm:$0xf] }
  0x4d   : > { %v630_v3 = vmul.f32 %v4979_v30, %v6630_v24  ;;  %v631_v51 = vmul.f32 %v4980_v54, %v6630_v24  ;;  %v632_v52 = vadd.f32 %v616_v29, %v579_v58  ;;  %v633_v10 = vadd.f32 %v617_v21, %v580_v20  ;;  %v4985_v24 = vld [vmem:[%s6605_s21 + $0x41] sm:$0xf]  ;;  %v4986_v58 = vld [vmem:[%s6605_s21 + $0x49] sm:$0xf]  ;;  %v4987_v20 = vld [vmem:[%s6605_s21 + $0x51] sm:$0xf] }
  0x4e   : > { %v634_v59 = vadd.f32 %v618_v7, %v581_v0  ;;  %v635_v22 = vadd.f32 %v619_v17, %v582_v33  ;;  %v636_v28 = vadd.f32 %v620_v41, %v583_v55  ;;  %v637_v63 = vadd.f32 %v621_v48, %v584_v37  ;;  %v4990_v29 = vld [vmem:[%s6605_s21 + $0x79] sm:$0xf]  ;;  %v4992_v30 = vld [vmem:[%s6605_s21 + $0x89] sm:$0xf]  ;;  %v4995_v7 = vld [vmem:[%s6605_s21 + $0xb1] sm:$0xf] }
  0x4f   : > { %v638_v16 = vadd.f32 %v622_v8, %v585_v2  ;;  %v639_v15 = vadd.f32 %v623_v43, %v586_v38  ;;  %v640_v19 = vadd.f32 %v624_v44, %v587_v50  ;;  %v641_v0 = vadd.f32 %v625_v35, %v588_v40  ;;  %v4991_v38 = vld [vmem:[%s6605_s21 + $0x81] sm:$0xf]  ;;  %v4994_v21 = vld [vmem:[%s6605_s21 + $0xa9] sm:$0xf]  ;;  %v4996_v17 = vld [vmem:[%s6605_s21 + $0xb9] sm:$0xf] }
  0x50   : > { %v642_v33 = vadd.f32 %v626_v31, %v589_v47  ;;  %v643_v55 = vadd.f32 %v627_v42, %v590_v18  ;;  %v644_v45 = vadd.f32 %v628_v49, %v591_v14  ;;  %v645_v37 = vadd.f32 %v629_v34, %v592_v56  ;;  %v4993_v50 = vld [vmem:[%s6605_s21 + $0xa1] sm:$0xf]  ;;  %v4997_v34 = vld [vmem:[%s6605_s21 + $0x12] sm:$0xf] }
  0x51   : > { %v646_v2 = vadd.f32 %v630_v3, %v593_v61  ;;  %v647_v1 = vadd.f32 %v631_v51, %v594_v27  ;;  %v668_v54 = vmul.f32 %v4981_v57, %v6633_v25  ;;  %v669_v40 = vmul.f32 %v4982_v12, %v6633_v25 }
  0x52   : > { %v670_v47 = vmul.f32 %v4983_v23, %v6633_v25  ;;  %v671_v18 = vmul.f32 %v4984_v62, %v6633_v25  ;;  %v672_v14 = vmul.f32 %v4985_v24, %v6633_v25  ;;  %v673_v56 = vmul.f32 %v4986_v58, %v6633_v25  ;;  %v4998_v23 = vld [vmem:[%s6605_s21 + $0x1a] sm:$0xf]  ;;  %v4999_v62 = vld [vmem:[%s6605_s21 + $0x22] sm:$0xf]  ;;  %v5000_v24 = vld [vmem:[%s6605_s21 + $0x2a] sm:$0xf] }
  0x53   : > { %v674_v61 = vmul.f32 %v4987_v20, %v6633_v25  ;;  %v675_v27 = vmul.f32 %v4988_v9, %v6633_v25  ;;  %v676_v41 = vmul.f32 %v4989_v36, %v6633_v25  ;;  %v677_v48 = vmul.f32 %v4990_v29, %v6633_v25 }
  0x54   : > { %v678_v8 = vmul.f32 %v4991_v38, %v6633_v25  ;;  %v679_v43 = vmul.f32 %v4992_v30, %v6633_v25  ;;  %v680_v44 = vmul.f32 %v4993_v50, %v6633_v25  ;;  %v681_v35 = vmul.f32 %v4994_v21, %v6633_v25  ;;  %v5004_v38 = vld [vmem:[%s6605_s21 + $0x5a] sm:$0xf]  ;;  %v5005_v30 = vld [vmem:[%s6605_s21 + $0x72] sm:$0xf]  ;;  %v5008_v21 = vld [vmem:[%s6605_s21 + $0x8a] sm:$0xf] }
  0x55   : > { %v682_v31 = vmul.f32 %v4995_v7, %v6633_v25  ;;  %v683_v42 = vmul.f32 %v4996_v17, %v6633_v25  ;;  %v684_v49 = vadd.f32 %v668_v54, %v632_v52  ;;  %v685_v3 = vadd.f32 %v669_v40, %v633_v10  ;;  %v5001_v25 = vld [vmem:[%s6605_s21 + $0x42] sm:$0xf]  ;;  %v5002_v52 = vld [vmem:[%s6605_s21 + $0x4a] sm:$0xf]  ;;  %v5003_v10 = vld [vmem:[%s6605_s21 + $0x52] sm:$0xf] }
  0x56   : > { %v686_v51 = vadd.f32 %v670_v47, %v634_v59  ;;  %v687_v57 = vadd.f32 %v671_v18, %v635_v22  ;;  %v688_v12 = vadd.f32 %v672_v14, %v636_v28  ;;  %v689_v58 = vadd.f32 %v673_v56, %v637_v63  ;;  %v5006_v50 = vld [vmem:[%s6605_s21 + $0x7a] sm:$0xf]  ;;  %v5010_v17 = vld [vmem:[%s6605_s21 + $0xaa] sm:$0xf]  ;;  %v5011_v40 = vld [vmem:[%s6605_s21 + $0xb2] sm:$0xf] }
  0x57   : > { %v690_v20 = vadd.f32 %v674_v61, %v638_v16  ;;  %v691_v9 = vadd.f32 %v675_v27, %v639_v15  ;;  %v692_v36 = vadd.f32 %v676_v41, %v640_v19  ;;  %v693_v59 = vadd.f32 %v677_v48, %v641_v0  ;;  %v5007_v15 = vld [vmem:[%s6605_s21 + $0x82] sm:$0xf]  ;;  %v5012_v47 = vld [vmem:[%s6605_s21 + $0xba] sm:$0xf] }
  0x58   : > { %v694_v22 = vadd.f32 %v678_v8, %v642_v33  ;;  %v695_v28 = vadd.f32 %v679_v43, %v643_v55  ;;  %v696_v29 = vadd.f32 %v680_v44, %v644_v45  ;;  %v697_v63 = vadd.f32 %v681_v35, %v645_v37  ;;  %v5009_v19 = vld [vmem:[%s6605_s21 + $0xa2] sm:$0xf]  ;;  %v5013_v44 = vld [vmem:[%s6605_s21 + $0x30] sm:$0xf] }
  0x59   : > { %v698_v16 = vadd.f32 %v682_v31, %v646_v2  ;;  %v699_v54 = vadd.f32 %v683_v42, %v647_v1  ;;  %v720_v7 = vmul.f32 %v4997_v34, %v6644_v32  ;;  %v721_v0 = vmul.f32 %v4998_v23, %v6644_v32  ;;  %v5014_v23 = vld [vmem:[%s6605_s21 + $0x38] sm:$0xf] }
  0x5a   : > { %v722_v33 = vmul.f32 %v4999_v62, %v6644_v32  ;;  %v723_v55 = vmul.f32 %v5000_v24, %v6644_v32  ;;  %v724_v45 = vmul.f32 %v5001_v25, %v6644_v32  ;;  %v725_v37 = vmul.f32 %v5002_v52, %v6644_v32  ;;  %v5015_v62 = vld [vmem:[%s6605_s21 + $0x40] sm:$0xf]  ;;  %v5016_v24 = vld [vmem:[%s6605_s21 + $0x48] sm:$0xf] }
  0x5b   : > { %v726_v2 = vmul.f32 %v5003_v10, %v6644_v32  ;;  %v727_v1 = vmul.f32 %v5004_v38, %v6644_v32  ;;  %v728_v18 = vmul.f32 %v5005_v30, %v6644_v32  ;;  %v729_v14 = vmul.f32 %v5006_v50, %v6644_v32  ;;  %v5020_v50 = vld [vmem:[%s6605_s21 + $0x78] sm:$0xf] }
  0x5c   : > { %v730_v56 = vmul.f32 %v5007_v15, %v6644_v32  ;;  %v731_v61 = vmul.f32 %v5008_v21, %v6644_v32  ;;  %v732_v27 = vmul.f32 %v5009_v19, %v6644_v32  ;;  %v733_v41 = vmul.f32 %v5010_v17, %v6644_v32  ;;  %v5021_v15 = vld [vmem:[%s6605_s21 + $0x90] sm:$0xf]  ;;  %v5022_v21 = vld [vmem:[%s6605_s21 + $0x98] sm:$0xf] }
  0x5d   : > { %v734_v48 = vmul.f32 %v5011_v40, %v6644_v32  ;;  %v735_v8 = vmul.f32 %v5012_v47, %v6644_v32  ;;  %v736_v43 = vadd.f32 %v720_v7, %v684_v49  ;;  %v737_v35 = vadd.f32 %v721_v0, %v685_v3  ;;  %v5017_v32 = vld [vmem:[%s6605_s21 + $0x60] sm:$0xf]  ;;  %v5018_v49 = vld [vmem:[%s6605_s21 + $0x68] sm:$0xf]  ;;  %v5019_v3 = vld [vmem:[%s6605_s21 + $0x70] sm:$0xf] }
  0x5e   : > { %v738_v31 = vadd.f32 %v722_v33, %v686_v51  ;;  %v739_v42 = vadd.f32 %v723_v55, %v687_v57  ;;  %v740_v34 = vadd.f32 %v724_v45, %v688_v12  ;;  %v741_v25 = vadd.f32 %v725_v37, %v689_v58  ;;  %v5024_v7 = vld [vmem:[%s6605_s21 + $0xa8] sm:$0xf]  ;;  %v5027_v47 = vld [vmem:[%s6605_s21 + $0xd0] sm:$0xf]  ;;  %v5028_v0 = vld [vmem:[%s6605_s21 + $0xd8] sm:$0xf] }
  0x5f   : > { %v742_v52 = vadd.f32 %v726_v2, %v690_v20  ;;  %v743_v10 = vadd.f32 %v727_v1, %v691_v9  ;;  %v744_v38 = vadd.f32 %v728_v18, %v692_v36  ;;  %v745_v51 = vadd.f32 %v729_v14, %v693_v59  ;;  %v5023_v9 = vld [vmem:[%s6605_s21 + $0xa0] sm:$0xf]  ;;  %v5026_v40 = vld [vmem:[%s6605_s21 + $0xc8] sm:$0xf] }
  0x60   : > { %v746_v57 = vadd.f32 %v730_v56, %v694_v22  ;;  %v747_v12 = vadd.f32 %v731_v61, %v695_v28  ;;  %v748_v30 = vadd.f32 %v732_v27, %v696_v29  ;;  %v749_v58 = vadd.f32 %v733_v41, %v697_v63  ;;  %v5025_v36 = vld [vmem:[%s6605_s21 + $0xc0] sm:$0xf]  ;;  %v5029_v61 = vld [vmem:[%s6605_s21 + $0x31] sm:$0xf] }
  0x61   : > { %v750_v20 = vadd.f32 %v734_v48, %v698_v16  ;;  %v751_v19 = vadd.f32 %v735_v8, %v699_v54  ;;  %v773_v17 = vmul.f32 %v5013_v44, %v6651_v39  ;;  %v774_v59 = vmul.f32 %v5014_v23, %v6651_v39  ;;  %v5030_v44 = vld [vmem:[%s6605_s21 + $0x39] sm:$0xf]  ;;  %v5031_v23 = vld [vmem:[%s6605_s21 + $0x41] sm:$0xf] }
  0x62   : > { %v775_v22 = vmul.f32 %v5015_v62, %v6651_v39  ;;  %v776_v28 = vmul.f32 %v5016_v24, %v6651_v39  ;;  %v777_v29 = vmul.f32 %v5017_v32, %v6651_v39  ;;  %v778_v63 = vmul.f32 %v5018_v49, %v6651_v39  ;;  %v5032_v62 = vld [vmem:[%s6605_s21 + $0x49] sm:$0xf] }
  0x63   : > { %v779_v16 = vmul.f32 %v5019_v3, %v6651_v39  ;;  %v780_v54 = vmul.f32 %v5020_v50, %v6651_v39  ;;  %v781_v33 = vmul.f32 %v5021_v15, %v6651_v39  ;;  %v782_v55 = vmul.f32 %v5022_v21, %v6651_v39  ;;  %v5036_v15 = vld [vmem:[%s6605_s21 + $0x79] sm:$0xf]  ;;  %v5037_v21 = vld [vmem:[%s6605_s21 + $0x91] sm:$0xf] }
  0x64   : > { %v783_v45 = vmul.f32 %v5023_v9, %v6651_v39  ;;  %v784_v37 = vmul.f32 %v5024_v7, %v6651_v39  ;;  %v785_v2 = vmul.f32 %v5025_v36, %v6651_v39  ;;  %v786_v1 = vmul.f32 %v5026_v40, %v6651_v39  ;;  %v5038_v9 = vld [vmem:[%s6605_s21 + $0x99] sm:$0xf]  ;;  %v5040_v36 = vld [vmem:[%s6605_s21 + $0xa9] sm:$0xf] }
  0x65   : > { %v787_v18 = vmul.f32 %v5027_v47, %v6651_v39  ;;  %v788_v14 = vmul.f32 %v5028_v0, %v6651_v39  ;;  %v789_v56 = vadd.f32 %v773_v17, %v736_v43  ;;  %v790_v27 = vadd.f32 %v774_v59, %v737_v35  ;;  %v5033_v39 = vld [vmem:[%s6605_s21 + $0x61] sm:$0xf]  ;;  %v5034_v43 = vld [vmem:[%s6605_s21 + $0x69] sm:$0xf]  ;;  %v5035_v35 = vld [vmem:[%s6605_s21 + $0x71] sm:$0xf] }
  0x66   : > { %v791_v41 = vadd.f32 %v775_v22, %v738_v31  ;;  %v792_v48 = vadd.f32 %v776_v28, %v739_v42  ;;  %v793_v8 = vadd.f32 %v777_v29, %v740_v34  ;;  %v794_v24 = vadd.f32 %v778_v63, %v741_v25  ;;  %v5042_v40 = vld [vmem:[%s6605_s21 + $0xc9] sm:$0xf]  ;;  %v5043_v47 = vld [vmem:[%s6605_s21 + $0xd1] sm:$0xf]  ;;  %v5044_v0 = vld [vmem:[%s6605_s21 + $0xd9] sm:$0xf] }
  0x67   : > { %v795_v32 = vadd.f32 %v779_v16, %v742_v52  ;;  %v796_v49 = vadd.f32 %v780_v54, %v743_v10  ;;  %v797_v3 = vadd.f32 %v781_v33, %v744_v38  ;;  %v798_v31 = vadd.f32 %v782_v55, %v745_v51  ;;  %v5039_v10 = vld [vmem:[%s6605_s21 + $0xa1] sm:$0xf] }
  0x68   : > { %v799_v42 = vadd.f32 %v783_v45, %v746_v57  ;;  %v800_v34 = vadd.f32 %v784_v37, %v747_v12  ;;  %v801_v50 = vadd.f32 %v785_v2, %v748_v30  ;;  %v802_v25 = vadd.f32 %v786_v1, %v749_v58  ;;  %v5041_v38 = vld [vmem:[%s6605_s21 + $0xc1] sm:$0xf]  ;;  %v5045_v45 = vld [vmem:[%s6605_s21 + $0x32] sm:$0xf] }
  0x69   : > { %v803_v52 = vadd.f32 %v787_v18, %v750_v20  ;;  %v804_v7 = vadd.f32 %v788_v14, %v751_v19  ;;  %v825_v17 = vmul.f32 %v5029_v61, %v6658_v46  ;;  %v826_v51 = vmul.f32 %v5030_v44, %v6658_v46  ;;  %v5046_v14 = vld [vmem:[%s6605_s21 + $0x3a] sm:$0xf]  ;;  %v5047_v61 = vld [vmem:[%s6605_s21 + $0x42] sm:$0xf]  ;;  %v5048_v44 = vld [vmem:[%s6605_s21 + $0x4a] sm:$0xf] }
  0x6a   : > { %v827_v57 = vmul.f32 %v5031_v23, %v6658_v46  ;;  %v828_v12 = vmul.f32 %v5032_v62, %v6658_v46  ;;  %v829_v30 = vmul.f32 %v5033_v39, %v6658_v46  ;;  %v830_v58 = vmul.f32 %v5034_v43, %v6658_v46 }
  0x6b   : > { %v831_v20 = vmul.f32 %v5035_v35, %v6658_v46  ;;  %v832_v19 = vmul.f32 %v5036_v15, %v6658_v46  ;;  %v833_v59 = vmul.f32 %v5037_v21, %v6658_v46  ;;  %v834_v22 = vmul.f32 %v5038_v9, %v6658_v46  ;;  %v5052_v15 = vld [vmem:[%s6605_s21 + $0x7a] sm:$0xf]  ;;  %v5053_v21 = vld [vmem:[%s6605_s21 + $0x92] sm:$0xf] }
  0x6c   : > { %v835_v28 = vmul.f32 %v5039_v10, %v6658_v46  ;;  %v836_v29 = vmul.f32 %v5040_v36, %v6658_v46  ;;  %v837_v63 = vmul.f32 %v5041_v38, %v6658_v46  ;;  %v838_v16 = vmul.f32 %v5042_v40, %v6658_v46  ;;  %v5054_v9 = vld [vmem:[%s6605_s21 + $0x9a] sm:$0xf]  ;;  %v5056_v36 = vld [vmem:[%s6605_s21 + $0xaa] sm:$0xf]  ;;  %v5059_v40 = vld [vmem:[%s6605_s21 + $0xd2] sm:$0xf] }
  0x6d   : > { %v839_v54 = vmul.f32 %v5043_v47, %v6658_v46  ;;  %v840_v33 = vmul.f32 %v5044_v0, %v6658_v46  ;;  %v841_v55 = vadd.f32 %v825_v17, %v789_v56  ;;  %v842_v37 = vadd.f32 %v826_v51, %v790_v27  ;;  %v5049_v46 = vld [vmem:[%s6605_s21 + $0x62] sm:$0xf]  ;;  %v5050_v56 = vld [vmem:[%s6605_s21 + $0x6a] sm:$0xf]  ;;  %v5051_v27 = vld [vmem:[%s6605_s21 + $0x72] sm:$0xf] }
  0x6e   : > { %v843_v2 = vadd.f32 %v827_v57, %v791_v41  ;;  %v844_v1 = vadd.f32 %v828_v12, %v792_v48  ;;  %v845_v18 = vadd.f32 %v829_v30, %v793_v8  ;;  %v846_v23 = vadd.f32 %v830_v58, %v794_v24  ;;  %v5058_v17 = vld [vmem:[%s6605_s21 + $0xca] sm:$0xf]  ;;  %v5060_v47 = vld [vmem:[%s6605_s21 + $0xda] sm:$0xf] }
  0x6f   : > { %v847_v62 = vadd.f32 %v831_v20, %v795_v32  ;;  %v848_v39 = vadd.f32 %v832_v19, %v796_v49  ;;  %v849_v43 = vadd.f32 %v833_v59, %v797_v3  ;;  %v850_v41 = vadd.f32 %v834_v22, %v798_v31  ;;  %v5055_v49 = vld [vmem:[%s6605_s21 + $0xa2] sm:$0xf]  ;;  %v5061_v22 = vld [vmem:[%s6605_s21 + $0x38] sm:$0xf] }
  0x70   : > { %v851_v48 = vadd.f32 %v835_v28, %v799_v42  ;;  %v852_v8 = vadd.f32 %v836_v29, %v800_v34  ;;  %v853_v35 = vadd.f32 %v837_v63, %v801_v50  ;;  %v854_v24 = vadd.f32 %v838_v16, %v802_v25  ;;  %v5057_v3 = vld [vmem:[%s6605_s21 + $0xc2] sm:$0xf] }
  0x71   : > { %v855_v32 = vadd.f32 %v839_v54, %v803_v52  ;;  %v856_v10 = vadd.f32 %v840_v33, %v804_v7  ;;  %v877_v38 = vmul.f32 %v5045_v45, %v6665_v53  ;;  %v878_v31 = vmul.f32 %v5046_v14, %v6665_v53  ;;  %v5062_v54 = vld [vmem:[%s6605_s21 + $0x40] sm:$0xf]  ;;  %v5063_v33 = vld [vmem:[%s6605_s21 + $0x48] sm:$0xf]  ;;  %v5064_v45 = vld [vmem:[%s6605_s21 + $0x50] sm:$0xf] }
  0x72   : > { %v879_v42 = vmul.f32 %v5047_v61, %v6665_v53  ;;  %v880_v34 = vmul.f32 %v5048_v44, %v6665_v53  ;;  %v881_v50 = vmul.f32 %v5049_v46, %v6665_v53  ;;  %v882_v25 = vmul.f32 %v5050_v56, %v6665_v53 }
  0x73   : > { %v883_v52 = vmul.f32 %v5051_v27, %v6665_v53  ;;  %v884_v7 = vmul.f32 %v5052_v15, %v6665_v53  ;;  %v885_v0 = vmul.f32 %v5053_v21, %v6665_v53  ;;  %v886_v51 = vmul.f32 %v5054_v9, %v6665_v53  ;;  %v5068_v27 = vld [vmem:[%s6605_s21 + $0x80] sm:$0xf]  ;;  %v5069_v15 = vld [vmem:[%s6605_s21 + $0x98] sm:$0xf] }
  0x74   : > { %v887_v57 = vmul.f32 %v5055_v49, %v6665_v53  ;;  %v888_v12 = vmul.f32 %v5056_v36, %v6665_v53  ;;  %v889_v30 = vmul.f32 %v5057_v3, %v6665_v53  ;;  %v890_v58 = vmul.f32 %v5058_v17, %v6665_v53  ;;  %v5070_v21 = vld [vmem:[%s6605_s21 + $0xa0] sm:$0xf]  ;;  %v5072_v49 = vld [vmem:[%s6605_s21 + $0xb0] sm:$0xf] }
  0x75   : > { %v891_v20 = vmul.f32 %v5059_v40, %v6665_v53  ;;  %v892_v19 = vmul.f32 %v5060_v47, %v6665_v53  ;;  %v893_v59 = vadd.f32 %v877_v38, %v841_v55  ;;  %v894_v28 = vadd.f32 %v878_v31, %v842_v37  ;;  %v5065_v53 = vld [vmem:[%s6605_s21 + $0x68] sm:$0xf]  ;;  %v5066_v55 = vld [vmem:[%s6605_s21 + $0x70] sm:$0xf]  ;;  %v5067_v37 = vld [vmem:[%s6605_s21 + $0x78] sm:$0xf] }
  0x76   : > { %v895_v29 = vadd.f32 %v879_v42, %v843_v2  ;;  %v896_v63 = vadd.f32 %v880_v34, %v844_v1  ;;  %v897_v16 = vadd.f32 %v881_v50, %v845_v18  ;;  %v898_v14 = vadd.f32 %v882_v25, %v846_v23  ;;  %v5074_v3 = vld [vmem:[%s6605_s21 + $0xd0] sm:$0xf]  ;;  %v5075_v38 = vld [vmem:[%s6605_s21 + $0xd8] sm:$0xf]  ;;  %v5076_v17 = vld [vmem:[%s6605_s21 + $0xe0] sm:$0xf] }
  0x77   : > { %v899_v61 = vadd.f32 %v883_v52, %v847_v62  ;;  %v900_v44 = vadd.f32 %v884_v7, %v848_v39  ;;  %v901_v46 = vadd.f32 %v885_v0, %v849_v43  ;;  %v902_v2 = vadd.f32 %v886_v51, %v850_v41  ;;  %v5071_v39 = vld [vmem:[%s6605_s21 + $0xa8] sm:$0xf]  ;;  %v5077_v0 = vld [vmem:[%s6605_s21 + $0x39] sm:$0xf] }
  0x78   : > { %v903_v1 = vadd.f32 %v887_v57, %v851_v48  ;;  %v904_v18 = vadd.f32 %v888_v12, %v852_v8  ;;  %v905_v56 = vadd.f32 %v889_v30, %v853_v35  ;;  %v906_v23 = vadd.f32 %v890_v58, %v854_v24  ;;  %v5073_v43 = vld [vmem:[%s6605_s21 + $0xc8] sm:$0xf]  ;;  %v5078_v58 = vld [vmem:[%s6605_s21 + $0x41] sm:$0xf] }
  0x79   : > { %v907_v62 = vadd.f32 %v891_v20, %v855_v32  ;;  %v908_v9 = vadd.f32 %v892_v19, %v856_v10  ;;  %v930_v36 = vmul.f32 %v5061_v22, %v6672_v60  ;;  %v931_v41 = vmul.f32 %v5062_v54, %v6672_v60  ;;  %v5079_v20 = vld [vmem:[%s6605_s21 + $0x49] sm:$0xf]  ;;  %v5080_v19 = vld [vmem:[%s6605_s21 + $0x51] sm:$0xf] }
  0x7a   : > { %v932_v48 = vmul.f32 %v5063_v33, %v6672_v60  ;;  %v933_v8 = vmul.f32 %v5064_v45, %v6672_v60  ;;  %v934_v35 = vmul.f32 %v5065_v53, %v6672_v60  ;;  %v935_v24 = vmul.f32 %v5066_v55, %v6672_v60  ;;  %v5084_v55 = vld [vmem:[%s6605_s21 + $0x81] sm:$0xf] }
  0x7b   : > { %v936_v32 = vmul.f32 %v5067_v37, %v6672_v60  ;;  %v937_v10 = vmul.f32 %v5068_v27, %v6672_v60  ;;  %v938_v40 = vmul.f32 %v5069_v15, %v6672_v60  ;;  %v939_v47 = vmul.f32 %v5070_v21, %v6672_v60  ;;  %v5085_v37 = vld [vmem:[%s6605_s21 + $0x99] sm:$0xf]  ;;  %v5086_v27 = vld [vmem:[%s6605_s21 + $0xa1] sm:$0xf]  ;;  %v5088_v21 = vld [vmem:[%s6605_s21 + $0xb1] sm:$0xf] }
  0x7c   : > { %v940_v31 = vmul.f32 %v5071_v39, %v6672_v60  ;;  %v941_v42 = vmul.f32 %v5072_v49, %v6672_v60  ;;  %v942_v34 = vmul.f32 %v5073_v43, %v6672_v60  ;;  %v943_v50 = vmul.f32 %v5074_v3, %v6672_v60  ;;  %v5090_v49 = vld [vmem:[%s6605_s21 + $0xd1] sm:$0xf]  ;;  %v5091_v43 = vld [vmem:[%s6605_s21 + $0xd9] sm:$0xf] }
  0x7d   : > { %v944_v25 = vmul.f32 %v5075_v38, %v6672_v60  ;;  %v945_v52 = vmul.f32 %v5076_v17, %v6672_v60  ;;  %v946_v7 = vadd.f32 %v930_v36, %v893_v59  ;;  %v947_v51 = vadd.f32 %v931_v41, %v894_v28  ;;  %v5081_v60 = vld [vmem:[%s6605_s21 + $0x69] sm:$0xf]  ;;  %v5082_v59 = vld [vmem:[%s6605_s21 + $0x71] sm:$0xf]  ;;  %v5083_v28 = vld [vmem:[%s6605_s21 + $0x79] sm:$0xf] }
  0x7e   : > { %v948_v57 = vadd.f32 %v932_v48, %v895_v29  ;;  %v949_v12 = vadd.f32 %v933_v8, %v896_v63  ;;  %v950_v30 = vadd.f32 %v934_v35, %v897_v16  ;;  %v951_v22 = vadd.f32 %v935_v24, %v898_v14  ;;  %v5092_v36 = vld [vmem:[%s6605_s21 + $0xe1] sm:$0xf] }
  0x7f   : > { %v952_v54 = vadd.f32 %v936_v32, %v899_v61  ;;  %v953_v33 = vadd.f32 %v937_v10, %v900_v44  ;;  %v954_v45 = vadd.f32 %v938_v40, %v901_v46  ;;  %v955_v29 = vadd.f32 %v939_v47, %v902_v2  ;;  %v5087_v44 = vld [vmem:[%s6605_s21 + $0xa9] sm:$0xf]  ;;  %v5093_v10 = vld [vmem:[%s6605_s21 + $0x3a] sm:$0xf] }
  0x80   : > { %v956_v63 = vadd.f32 %v940_v31, %v903_v1  ;;  %v957_v16 = vadd.f32 %v941_v42, %v904_v18  ;;  %v958_v53 = vadd.f32 %v942_v34, %v905_v56  ;;  %v959_v14 = vadd.f32 %v943_v50, %v906_v23  ;;  %v5089_v46 = vld [vmem:[%s6605_s21 + $0xc9] sm:$0xf]  ;;  %v5094_v34 = vld [vmem:[%s6605_s21 + $0x42] sm:$0xf] }
  0x81   : > { %v960_v61 = vadd.f32 %v944_v25, %v907_v62  ;;  %v961_v15 = vadd.f32 %v945_v52, %v908_v9  ;;  %v982_v39 = vmul.f32 %v5077_v0, %v6681_v13  ;;  %v983_v2 = vmul.f32 %v5078_v58, %v6681_v13  ;;  %v5095_v50 = vld [vmem:[%s6605_s21 + $0x4a] sm:$0xf]  ;;  %v5096_v25 = vld [vmem:[%s6605_s21 + $0x52] sm:$0xf] }
  0x82   : > { %v984_v1 = vmul.f32 %v5079_v20, %v6681_v13  ;;  %v985_v18 = vmul.f32 %v5080_v19, %v6681_v13  ;;  %v986_v56 = vmul.f32 %v5081_v60, %v6681_v13  ;;  %v987_v23 = vmul.f32 %v5082_v59, %v6681_v13  ;;  %v5100_v60 = vld [vmem:[%s6605_s21 + $0x82] sm:$0xf]  ;;  %v5101_v59 = vld [vmem:[%s6605_s21 + $0x9a] sm:$0xf] }
  0x83   : > { %v988_v62 = vmul.f32 %v5083_v28, %v6681_v13  ;;  %v989_v9 = vmul.f32 %v5084_v55, %v6681_v13  ;;  %v990_v3 = vmul.f32 %v5085_v37, %v6681_v13  ;;  %v991_v38 = vmul.f32 %v5086_v27, %v6681_v13  ;;  %v5102_v28 = vld [vmem:[%s6605_s21 + $0xa2] sm:$0xf]  ;;  %v5104_v37 = vld [vmem:[%s6605_s21 + $0xb2] sm:$0xf] }
  0x84   : > { %v992_v17 = vmul.f32 %v5087_v44, %v6681_v13  ;;  %v993_v41 = vmul.f32 %v5088_v21, %v6681_v13  ;;  %v994_v48 = vmul.f32 %v5089_v46, %v6681_v13  ;;  %v995_v8 = vmul.f32 %v5090_v49, %v6681_v13  ;;  %v5106_v44 = vld [vmem:[%s6605_s21 + $0xd2] sm:$0xf]  ;;  %v5107_v21 = vld [vmem:[%s6605_s21 + $0xda] sm:$0xf]  ;;  %v5108_v46 = vld [vmem:[%s6605_s21 + $0xe2] sm:$0xf] }
  0x85   : > { %v996_v35 = vmul.f32 %v5091_v43, %v6681_v13  ;;  %v997_v24 = vmul.f32 %v5092_v36, %v6681_v13  ;;  %v998_v32 = vadd.f32 %v982_v39, %v946_v7  ;;  %v999_v40 = vadd.f32 %v983_v2, %v947_v51  ;;  %v5097_v13 = vld [vmem:[%s6605_s21 + $0x6a] sm:$0xf]  ;;  %v5098_v7 = vld [vmem:[%s6605_s21 + $0x72] sm:$0xf]  ;;  %v5099_v51 = vld [vmem:[%s6605_s21 + $0x7a] sm:$0xf] }
  0x86   : > { %v1000_v47 = vadd.f32 %v984_v1, %v948_v57  ;;  %v1001_v31 = vadd.f32 %v985_v18, %v949_v12  ;;  %v1002_v42 = vadd.f32 %v986_v56, %v950_v30  ;;  %v1003_v52 = vadd.f32 %v987_v23, %v951_v22 }
  0x87   : > { %v1004_v0 = vadd.f32 %v988_v62, %v952_v54  ;;  %v1005_v58 = vadd.f32 %v989_v9, %v953_v33  ;;  %v1006_v20 = vadd.f32 %v990_v3, %v954_v45  ;;  %v1007_v57 = vadd.f32 %v991_v38, %v955_v29  ;;  %v5103_v33 = vld [vmem:[%s6605_s21 + $0xaa] sm:$0xf]  ;;  %v7130_v62 = vld [vmem:[%s8825_s1 + $0x10] sm:$0xff] }
  0x88   : > { %v1008_v12 = vadd.f32 %v992_v17, %v956_v63  ;;  %v1009_v30 = vadd.f32 %v993_v41, %v957_v16  ;;  %v1010_v19 = vadd.f32 %v994_v48, %v958_v53  ;;  %v1011_v22 = vadd.f32 %v995_v8, %v959_v14  ;;  %v5105_v45 = vld [vmem:[%s6605_s21 + $0xca] sm:$0xf]  ;;  %v5109_v41 = vld [vmem:[%s6605_s21 + $0x40] sm:$0xf] }
  0x89   : > { %v1012_v54 = vadd.f32 %v996_v35, %v960_v61  ;;  %v1013_v55 = vadd.f32 %v997_v24, %v961_v15  ;;  %v1034_v27 = vmul.f32 %v5093_v10, %v6691_v26  ;;  %v1035_v29 = vmul.f32 %v5094_v34, %v6691_v26  ;;  %v5112_v10 = vld [vmem:[%s6605_s21 + $0x58] sm:$0xf] }
  0x8a   : > { %v1036_v63 = vmul.f32 %v5095_v50, %v6691_v26  ;;  %v1037_v16 = vmul.f32 %v5096_v25, %v6691_v26  ;;  %v1038_v53 = vmul.f32 %v5097_v13, %v6691_v26  ;;  %v1039_v14 = vmul.f32 %v5098_v7, %v6691_v26  ;;  %v5113_v50 = vld [vmem:[%s6605_s21 + $0x70] sm:$0xf]  ;;  %v6419_v25 = vld [vmem:[%s8825_s1 + $0x8] sm:$0xff] }
  0x8b   : > { %v1040_v61 = vmul.f32 %v5099_v51, %v6691_v26  ;;  %v1041_v15 = vmul.f32 %v5100_v60, %v6691_v26  ;;  %v1042_v39 = vmul.f32 %v5101_v59, %v6691_v26  ;;  %v1043_v49 = vmul.f32 %v5102_v28, %v6691_v26  ;;  %v5116_v7 = vld [vmem:[%s6605_s21 + $0x88] sm:$0xf]  ;;  %v5117_v51 = vld [vmem:[%s6605_s21 + $0xa0] sm:$0xf]  ;;  %v5121_v60 = vld [vmem:[%s6605_s21 + $0xd0] sm:$0xf] }
  0x8c   : > { %v1044_v43 = vmul.f32 %v5103_v33, %v6691_v26  ;;  %v1045_v36 = vmul.f32 %v5104_v37, %v6691_v26  ;;  %v1046_v2 = vmul.f32 %v5105_v45, %v6691_v26  ;;  %v1047_v1 = vmul.f32 %v5106_v44, %v6691_v26  ;;  %v5123_v33 = vld [vmem:[%s6605_s21 + $0xe0] sm:$0xf]  ;;  %v5124_v37 = vld [vmem:[%s6605_s21 + $0xe8] sm:$0xf] }
  0x8d   : > { %v1048_v18 = vmul.f32 %v5107_v21, %v6691_v26  ;;  %v1049_v56 = vmul.f32 %v5108_v46, %v6691_v26  ;;  %v1050_v23 = vadd.f32 %v1034_v27, %v998_v32  ;;  %v1051_v9 = vadd.f32 %v1035_v29, %v999_v40  ;;  %v5110_v26 = vld [vmem:[%s6605_s21 + $0x48] sm:$0xf]  ;;  %v5111_v32 = vld [vmem:[%s6605_s21 + $0x50] sm:$0xf] }
  0x8e   : > { %v1052_v3 = vadd.f32 %v1036_v63, %v1000_v47  ;;  %v1053_v38 = vadd.f32 %v1037_v16, %v1001_v31  ;;  %v1054_v17 = vadd.f32 %v1038_v53, %v1002_v42  ;;  %v1055_v48 = vadd.f32 %v1039_v14, %v1003_v52  ;;  %v5114_v31 = vld [vmem:[%s6605_s21 + $0x78] sm:$0xf]  ;;  %v5115_v42 = vld [vmem:[%s6605_s21 + $0x80] sm:$0xf] }
  0x8f   : > { %v1056_v8 = vadd.f32 %v1040_v61, %v1004_v0  ;;  %v1057_v35 = vadd.f32 %v1041_v15, %v1005_v58  ;;  %v1058_v24 = vadd.f32 %v1042_v39, %v1006_v20  ;;  %v1059_v34 = vadd.f32 %v1043_v49, %v1007_v57  ;;  %v5118_v57 = vld [vmem:[%s6605_s21 + $0xa8] sm:$0xf] }
  0x90   : > { %v1060_v40 = vadd.f32 %v1044_v43, %v1008_v12  ;;  %v1061_v47 = vadd.f32 %v1045_v36, %v1009_v30  ;;  %v1086_v52 = vrot.slane %v6419_v25, %v6600_v11  ;;  %v1062_v0 = vadd.f32 %v1046_v2, %v1010_v19  ;;  %v5119_v12 = vld [vmem:[%s6605_s21 + $0xb0] sm:$0xf]  ;;  %v5120_v30 = vld [vmem:[%s6605_s21 + $0xb8] sm:$0xf]  ;;  %v5125_v2 = vld [vmem:[%s6605_s21 + $0x41] sm:$0xf] }
  0x91   : > { %v1063_v58 = vadd.f32 %v1047_v1, %v1011_v22  ;;  %v1064_v20 = vadd.f32 %v1048_v18, %v1012_v54  ;;  %v1065_v13 = vadd.f32 %v1049_v56, %v1013_v55  ;;  %v7151_v59 = vrot.slane %v7130_v62, %v6586_v4  ;;  %v8873_v22 = vld [vmem:[#allocation5_spill] sm:$0xff]  ;;  %v5122_v55 = vld [vmem:[%s6605_s21 + $0xd8] sm:$0xf] }
  0x92   : > { %v7155_v28 = vrot.slane %v7130_v62, %v6588_v5  ;;  %v7159_v19 = vrot.slane %v7130_v62, %v6590_v6  ;;  %v7163_v54 = vrot.slane %v7130_v62, %v8873_v22  ;;  %v1087_v45 = vmul.f32 %v5109_v41, %v1086_v52  ;;  %v5136_v22 = vld [vmem:[%s6605_s21 + $0xb9] sm:$0xf] }
  0x93   : > { %v1088_v27 = vmul.f32 %v5110_v26, %v1086_v52  ;;  %v1089_v44 = vmul.f32 %v5111_v32, %v1086_v52  ;;  %v1090_v21 = vmul.f32 %v5112_v10, %v1086_v52  ;;  %v1091_v46 = vmul.f32 %v5113_v50, %v1086_v52  ;;  %v5126_v26 = vld [vmem:[%s6605_s21 + $0x49] sm:$0xf]  ;;  %v5127_v32 = vld [vmem:[%s6605_s21 + $0x51] sm:$0xf]  ;;  %v5128_v10 = vld [vmem:[%s6605_s21 + $0x59] sm:$0xf] }
  0x94   : > { %v1092_v29 = vmul.f32 %v5114_v31, %v1086_v52  ;;  %v1093_v63 = vmul.f32 %v5115_v42, %v1086_v52  ;;  %v1094_v16 = vmul.f32 %v5116_v7, %v1086_v52  ;;  %v1095_v53 = vmul.f32 %v5117_v51, %v1086_v52  ;;  %v5129_v7 = vld [vmem:[%s6605_s21 + $0x71] sm:$0xf] }
  0x95   : > { %v1096_v14 = vmul.f32 %v5118_v57, %v1086_v52  ;;  %v1097_v61 = vmul.f32 %v5119_v12, %v1086_v52  ;;  %v1098_v15 = vmul.f32 %v5120_v30, %v1086_v52  ;;  %v1099_v39 = vmul.f32 %v5121_v60, %v1086_v52  ;;  %v5132_v57 = vld [vmem:[%s6605_s21 + $0x89] sm:$0xf]  ;;  %v5133_v12 = vld [vmem:[%s6605_s21 + $0xa1] sm:$0xf] }
  0x96   : > { %v1100_v49 = vmul.f32 %v5122_v55, %v1086_v52  ;;  %v1101_v43 = vmul.f32 %v5123_v33, %v1086_v52  ;;  %v1102_v36 = vmul.f32 %v5124_v37, %v1086_v52  ;;  %v1103_v1 = vadd.f32 %v1087_v45, %v1050_v23  ;;  %v5130_v52 = vld [vmem:[%s6605_s21 + $0x79] sm:$0xf]  ;;  %v5131_v23 = vld [vmem:[%s6605_s21 + $0x81] sm:$0xf]  ;;  %v5134_v30 = vld [vmem:[%s6605_s21 + $0xa9] sm:$0xf] }
  0x97   : > { %v1104_v18 = vadd.f32 %v1088_v27, %v1051_v9  ;;  %v1105_v56 = vadd.f32 %v1089_v44, %v1052_v3  ;;  %v1106_v41 = vadd.f32 %v1090_v21, %v1053_v38  ;;  %v1107_v50 = vadd.f32 %v1091_v46, %v1054_v17  ;;  %v5137_v55 = vld [vmem:[%s6605_s21 + $0xd1] sm:$0xf]  ;;  %v5138_v33 = vld [vmem:[%s6605_s21 + $0xd9] sm:$0xf]  ;;  %v5139_v37 = vld [vmem:[%s6605_s21 + $0xe1] sm:$0xf] }
  0x98   : > { %v1108_v31 = vadd.f32 %v1092_v29, %v1055_v48  ;;  %v1109_v42 = vadd.f32 %v1093_v63, %v1056_v8  ;;  %v1110_v25 = vadd.f32 %v1094_v16, %v1057_v35  ;;  %v1111_v9 = vadd.f32 %v1095_v53, %v1058_v24  ;;  %v5135_v35 = vld [vmem:[%s6605_s21 + $0xb1] sm:$0xf]  ;;  %v5140_v45 = vld [vmem:[%s6605_s21 + $0xe9] sm:$0xf] }
  0x99   : > { %v1112_v3 = vadd.f32 %v1096_v14, %v1059_v34  ;;  %v1113_v38 = vadd.f32 %v1097_v61, %v1060_v40  ;;  %v1114_v51 = vadd.f32 %v1098_v15, %v1061_v47  ;;  %v1115_v17 = vadd.f32 %v1099_v39, %v1062_v0  ;;  %v5141_v14 = vld [vmem:[%s6605_s21 + $0x42] sm:$0xf] }
  0x9a   : > { %v1116_v48 = vadd.f32 %v1100_v49, %v1063_v58  ;;  %v1117_v8 = vadd.f32 %v1101_v43, %v1064_v20  ;;  %v1118_v60 = vadd.f32 %v1102_v36, %v1065_v13  ;;  %v1139_v27 = vmul.f32 %v5125_v2, %v7151_v59  ;;  %v5142_v43 = vld [vmem:[%s6605_s21 + $0x4a] sm:$0xf]  ;;  %v5143_v36 = vld [vmem:[%s6605_s21 + $0x52] sm:$0xf]  ;;  %v5144_v2 = vld [vmem:[%s6605_s21 + $0x5a] sm:$0xf] }
  0x9b   : > { %v1140_v24 = vmul.f32 %v5126_v26, %v7151_v59  ;;  %v1141_v34 = vmul.f32 %v5127_v32, %v7151_v59  ;;  %v1142_v40 = vmul.f32 %v5128_v10, %v7151_v59  ;;  %v1143_v47 = vmul.f32 %v5129_v7, %v7151_v59 }
  0x9c   : > { %v1144_v0 = vmul.f32 %v5130_v52, %v7151_v59  ;;  %v1145_v58 = vmul.f32 %v5131_v23, %v7151_v59  ;;  %v1146_v20 = vmul.f32 %v5132_v57, %v7151_v59  ;;  %v1147_v13 = vmul.f32 %v5133_v12, %v7151_v59  ;;  %v5145_v52 = vld [vmem:[%s6605_s21 + $0x72] sm:$0xf]  ;;  %v5148_v57 = vld [vmem:[%s6605_s21 + $0x8a] sm:$0xf]  ;;  %v5149_v12 = vld [vmem:[%s6605_s21 + $0xa2] sm:$0xf] }
  0x9d   : > { %v1148_v44 = vmul.f32 %v5134_v30, %v7151_v59  ;;  %v1149_v21 = vmul.f32 %v5135_v35, %v7151_v59  ;;  %v1150_v46 = vmul.f32 %v5136_v22, %v7151_v59  ;;  %v1151_v29 = vmul.f32 %v5137_v55, %v7151_v59  ;;  %v5150_v30 = vld [vmem:[%s6605_s21 + $0xaa] sm:$0xf]  ;;  %v5152_v22 = vld [vmem:[%s6605_s21 + $0xba] sm:$0xf]  ;;  %v5153_v55 = vld [vmem:[%s6605_s21 + $0xd2] sm:$0xf] }
  0x9e   : > { %v1152_v63 = vmul.f32 %v5138_v33, %v7151_v59  ;;  %v1153_v16 = vmul.f32 %v5139_v37, %v7151_v59  ;;  %v1154_v53 = vmul.f32 %v5140_v45, %v7151_v59  ;;  %v1155_v61 = vadd.f32 %v1139_v27, %v1103_v1  ;;  %v5146_v59 = vld [vmem:[%s6605_s21 + $0x7a] sm:$0xf]  ;;  %v5147_v1 = vld [vmem:[%s6605_s21 + $0x82] sm:$0xf]  ;;  %v5156_v45 = vld [vmem:[%s6605_s21 + $0xea] sm:$0xf] }
  0x9f   : > { %v1156_v15 = vadd.f32 %v1140_v24, %v1104_v18  ;;  %v1157_v39 = vadd.f32 %v1141_v34, %v1105_v56  ;;  %v1158_v49 = vadd.f32 %v1142_v40, %v1106_v41  ;;  %v1159_v26 = vadd.f32 %v1143_v47, %v1107_v50  ;;  %v5154_v33 = vld [vmem:[%s6605_s21 + $0xda] sm:$0xf]  ;;  %v5155_v37 = vld [vmem:[%s6605_s21 + $0xe2] sm:$0xf] }
  0xa0   : > { %v1160_v32 = vadd.f32 %v1144_v0, %v1108_v31  ;;  %v1161_v10 = vadd.f32 %v1145_v58, %v1109_v42  ;;  %v1162_v7 = vadd.f32 %v1146_v20, %v1110_v25  ;;  %v1163_v18 = vadd.f32 %v1147_v13, %v1111_v9  ;;  %v5151_v25 = vld [vmem:[%s6605_s21 + $0xb2] sm:$0xf]  ;;  %v5157_v13 = vld [vmem:[%s6605_s21 + $0x60] sm:$0xf] }
  0xa1   : > { %v1164_v56 = vadd.f32 %v1148_v44, %v1112_v3  ;;  %v1165_v41 = vadd.f32 %v1149_v21, %v1113_v38  ;;  %v1166_v23 = vadd.f32 %v1150_v46, %v1114_v51  ;;  %v1167_v50 = vadd.f32 %v1151_v29, %v1115_v17  ;;  %v5158_v44 = vld [vmem:[%s6605_s21 + $0x68] sm:$0xf]  ;;  %v5159_v21 = vld [vmem:[%s6605_s21 + $0x70] sm:$0xf]  ;;  %v5160_v46 = vld [vmem:[%s6605_s21 + $0x78] sm:$0xf] }
  0xa2   : > { %v1168_v31 = vadd.f32 %v1152_v63, %v1116_v48  ;;  %v1169_v42 = vadd.f32 %v1153_v16, %v1117_v8  ;;  %v1170_v35 = vadd.f32 %v1154_v53, %v1118_v60  ;;  %v1191_v27 = vmul.f32 %v5141_v14, %v7155_v28  ;;  %v5161_v14 = vld [vmem:[%s6605_s21 + $0x90] sm:$0xf] }
  0xa3   : > { %v1192_v9 = vmul.f32 %v5142_v43, %v7155_v28  ;;  %v1193_v3 = vmul.f32 %v5143_v36, %v7155_v28  ;;  %v1194_v38 = vmul.f32 %v5144_v2, %v7155_v28  ;;  %v1195_v51 = vmul.f32 %v5145_v52, %v7155_v28  ;;  %v5162_v43 = vld [vmem:[%s6605_s21 + $0x98] sm:$0xf]  ;;  %v5163_v36 = vld [vmem:[%s6605_s21 + $0xa0] sm:$0xf]  ;;  %v5164_v2 = vld [vmem:[%s6605_s21 + $0xa8] sm:$0xf] }
  0xa4   : > { %v1196_v17 = vmul.f32 %v5146_v59, %v7155_v28  ;;  %v1197_v48 = vmul.f32 %v5147_v1, %v7155_v28  ;;  %v1198_v8 = vmul.f32 %v5148_v57, %v7155_v28  ;;  %v1199_v60 = vmul.f32 %v5149_v12, %v7155_v28  ;;  %v5165_v57 = vld [vmem:[%s6605_s21 + $0xc0] sm:$0xf]  ;;  %v5166_v12 = vld [vmem:[%s6605_s21 + $0xc8] sm:$0xf] }
  0xa5   : > { %v1200_v24 = vmul.f32 %v5150_v30, %v7155_v28  ;;  %v1201_v34 = vmul.f32 %v5151_v25, %v7155_v28  ;;  %v1202_v40 = vmul.f32 %v5152_v22, %v7155_v28  ;;  %v1203_v47 = vmul.f32 %v5153_v55, %v7155_v28  ;;  %v5167_v30 = vld [vmem:[%s6605_s21 + $0xd0] sm:$0xf]  ;;  %v5168_v25 = vld [vmem:[%s6605_s21 + $0xd8] sm:$0xf] }
  0xa6   : > { %v1204_v0 = vmul.f32 %v5154_v33, %v7155_v28  ;;  %v1205_v58 = vmul.f32 %v5155_v37, %v7155_v28  ;;  %v1206_v20 = vmul.f32 %v5156_v45, %v7155_v28  ;;  %v1207_v29 = vadd.f32 %v1191_v27, %v1155_v61  ;;  %v5169_v22 = vld [vmem:[%s6605_s21 + $0xf0] sm:$0xf]  ;;  %v5170_v55 = vld [vmem:[%s6605_s21 + $0xf8] sm:$0xf]  ;;  %v5171_v33 = vld [vmem:[%s6605_s21 + $0x100] sm:$0xf] }
  0xa7   : > { %v1208_v63 = vadd.f32 %v1192_v9, %v1156_v15  ;;  %v1209_v16 = vadd.f32 %v1193_v3, %v1157_v39  ;;  %v1210_v53 = vadd.f32 %v1194_v38, %v1158_v49  ;;  %v1211_v28 = vadd.f32 %v1195_v51, %v1159_v26  ;;  %v5172_v26 = vld [vmem:[%s6605_s21 + $0x108] sm:$0xf] }
  0xa8   : > { %v1212_v52 = vadd.f32 %v1196_v17, %v1160_v32  ;;  %v1213_v59 = vadd.f32 %v1197_v48, %v1161_v10  ;;  %v1214_v1 = vadd.f32 %v1198_v8, %v1162_v7  ;;  %v1215_v61 = vadd.f32 %v1199_v60, %v1163_v18  ;;  %v5173_v8 = vld [vmem:[%s6605_s21 + $0x61] sm:$0xf] }
  0xa9   : > { %v1216_v15 = vadd.f32 %v1200_v24, %v1164_v56  ;;  %v1217_v39 = vadd.f32 %v1201_v34, %v1165_v41  ;;  %v1218_v49 = vadd.f32 %v1202_v40, %v1166_v23  ;;  %v1219_v37 = vadd.f32 %v1203_v47, %v1167_v50  ;;  %v5174_v47 = vld [vmem:[%s6605_s21 + $0x69] sm:$0xf] }
  0xaa   : > { %v1220_v45 = vadd.f32 %v1204_v0, %v1168_v31  ;;  %v1221_v27 = vadd.f32 %v1205_v58, %v1169_v42  ;;  %v1222_v9 = vadd.f32 %v1206_v20, %v1170_v35  ;;  %v1244_v32 = vmul.f32 %v5157_v13, %v7159_v19  ;;  %v5175_v0 = vld [vmem:[%s6605_s21 + $0x71] sm:$0xf]  ;;  %v5176_v58 = vld [vmem:[%s6605_s21 + $0x79] sm:$0xf] }
  0xab   : > { %v1245_v10 = vmul.f32 %v5158_v44, %v7159_v19  ;;  %v1246_v7 = vmul.f32 %v5159_v21, %v7159_v19  ;;  %v1247_v18 = vmul.f32 %v5160_v46, %v7159_v19  ;;  %v1248_v56 = vmul.f32 %v5161_v14, %v7159_v19  ;;  %v5177_v46 = vld [vmem:[%s6605_s21 + $0x91] sm:$0xf] }
  0xac   : > { %v1249_v41 = vmul.f32 %v5162_v43, %v7159_v19  ;;  %v1250_v23 = vmul.f32 %v5163_v36, %v7159_v19  ;;  %v1251_v50 = vmul.f32 %v5164_v2, %v7159_v19  ;;  %v1252_v31 = vmul.f32 %v5165_v57, %v7159_v19  ;;  %v5180_v43 = vld [vmem:[%s6605_s21 + $0xa9] sm:$0xf]  ;;  %v5181_v36 = vld [vmem:[%s6605_s21 + $0xc1] sm:$0xf] }
  0xad   : > { %v1253_v42 = vmul.f32 %v5166_v12, %v7159_v19  ;;  %v1254_v35 = vmul.f32 %v5167_v30, %v7159_v19  ;;  %v1255_v3 = vmul.f32 %v5168_v25, %v7159_v19  ;;  %v1256_v38 = vmul.f32 %v5169_v22, %v7159_v19  ;;  %v5182_v2 = vld [vmem:[%s6605_s21 + $0xc9] sm:$0xf]  ;;  %v5184_v12 = vld [vmem:[%s6605_s21 + $0xd9] sm:$0xf]  ;;  %v5185_v30 = vld [vmem:[%s6605_s21 + $0xf1] sm:$0xf] }
  0xae   : > { %v1257_v51 = vmul.f32 %v5170_v55, %v7159_v19  ;;  %v1258_v17 = vmul.f32 %v5171_v33, %v7159_v19  ;;  %v1259_v48 = vmul.f32 %v5172_v26, %v7159_v19  ;;  %v1260_v60 = vadd.f32 %v1244_v32, %v1207_v29  ;;  %v5178_v19 = vld [vmem:[%s6605_s21 + $0x99] sm:$0xf]  ;;  %v5179_v29 = vld [vmem:[%s6605_s21 + $0xa1] sm:$0xf]  ;;  %v5188_v55 = vld [vmem:[%s6605_s21 + $0x109] sm:$0xf] }
  0xaf   : > { %v1261_v24 = vadd.f32 %v1245_v10, %v1208_v63  ;;  %v1262_v34 = vadd.f32 %v1246_v7, %v1209_v16  ;;  %v1263_v40 = vadd.f32 %v1247_v18, %v1210_v53  ;;  %v1264_v20 = vadd.f32 %v1248_v56, %v1211_v28  ;;  %v5186_v25 = vld [vmem:[%s6605_s21 + $0xf9] sm:$0xf]  ;;  %v5187_v22 = vld [vmem:[%s6605_s21 + $0x101] sm:$0xf] }
  0xb0   : > { %v1265_v13 = vadd.f32 %v1249_v41, %v1212_v52  ;;  %v1266_v44 = vadd.f32 %v1250_v23, %v1213_v59  ;;  %v1267_v21 = vadd.f32 %v1251_v50, %v1214_v1  ;;  %v1268_v63 = vadd.f32 %v1252_v31, %v1215_v61  ;;  %v5183_v1 = vld [vmem:[%s6605_s21 + $0xd1] sm:$0xf] }
  0xb1   : > { %v1269_v16 = vadd.f32 %v1253_v42, %v1216_v15  ;;  %v1270_v53 = vadd.f32 %v1254_v35, %v1217_v39  ;;  %v1271_v14 = vadd.f32 %v1255_v3, %v1218_v49  ;;  %v1272_v28 = vadd.f32 %v1256_v38, %v1219_v37  ;;  %v281_v35 = vld [vmem:[%s8825_s1 + $0x18] sm:$0x7] }
  0xb2   : > { %v1273_v52 = vadd.f32 %v1257_v51, %v1220_v45  ;;  %v1274_v59 = vadd.f32 %v1258_v17, %v1221_v27  ;;  %v1275_v57 = vadd.f32 %v1259_v48, %v1222_v9  ;;  %v1296_v33 = vmul.f32 %v5173_v8, %v7163_v54  ;;  %v5189_v48 = vld [vmem:[%s6605_s21 + $0x62] sm:$0xf]  ;;  %v5190_v8 = vld [vmem:[%s6605_s21 + $0x6a] sm:$0xf] }
  0xb3   : > { %v1297_v61 = vmul.f32 %v5174_v47, %v7163_v54  ;;  %v1298_v15 = vmul.f32 %v5175_v0, %v7163_v54  ;;  %v1299_v39 = vmul.f32 %v5176_v58, %v7163_v54  ;;  %v1300_v49 = vmul.f32 %v5177_v46, %v7163_v54  ;;  %v5192_v47 = vld [vmem:[%s6605_s21 + $0x7a] sm:$0xf]  ;;  %v7306_v0 = vld [vmem:[%s8826_s2] ss:$0 sm:$0xff]  ;;  %v5195_v46 = vld [vmem:[%s6605_s21 + $0xa2] sm:$0xf] }
  0xb4   : > { %v1301_v37 = vmul.f32 %v5178_v19, %v7163_v54  ;;  %v1302_v45 = vmul.f32 %v5179_v29, %v7163_v54  ;;  %v1303_v27 = vmul.f32 %v5180_v43, %v7163_v54  ;;  %v1304_v9 = vmul.f32 %v5181_v36, %v7163_v54  ;;  %v8874_v19 = vld [vmem:[#allocation6_spill] sm:$0xff]  ;;  %v8875_v43 = vld [vmem:[#allocation7_spill] sm:$0xff] }
  0xb5   : > { %v1305_v26 = vmul.f32 %v5182_v2, %v7163_v54  ;;  %v1306_v32 = vmul.f32 %v5183_v1, %v7163_v54  ;;  %v1307_v10 = vmul.f32 %v5184_v12, %v7163_v54  ;;  %v1308_v7 = vmul.f32 %v5185_v30, %v7163_v54  ;;  %v8876_v2 = vld [vmem:[#allocation8_spill] sm:$0xff]  ;;  %v5201_v12 = vld [vmem:[%s6605_s21 + $0xf2] sm:$0xf] }
  0xb6   : > { %v1309_v18 = vmul.f32 %v5186_v25, %v7163_v54  ;;  %v1310_v56 = vmul.f32 %v5187_v22, %v7163_v54  ;;  %v1311_v41 = vmul.f32 %v5188_v55, %v7163_v54  ;;  %v1312_v23 = vadd.f32 %v1296_v33, %v1260_v60  ;;  %v5200_v1 = vld [vmem:[%s6605_s21 + $0xda] sm:$0xf]  ;;  %v5203_v33 = vld [vmem:[%s6605_s21 + $0x102] sm:$0xf] }
  0xb7   : > { %v1313_v50 = vadd.f32 %v1297_v61, %v1261_v24  ;;  %v1314_v31 = vadd.f32 %v1298_v15, %v1262_v34  ;;  %v1315_v42 = vadd.f32 %v1299_v39, %v1263_v40  ;;  %v1316_v3 = vadd.f32 %v1300_v49, %v1264_v20  ;;  %v5191_v40 = vld [vmem:[%s6605_s21 + $0x72] sm:$0xf]  ;;  %v5202_v55 = vld [vmem:[%s6605_s21 + $0xfa] sm:$0xf] }
  0xb8   : > { %v1317_v38 = vadd.f32 %v1301_v37, %v1265_v13  ;;  %v1318_v51 = vadd.f32 %v1302_v45, %v1266_v44  ;;  %v1319_v17 = vadd.f32 %v1303_v27, %v1267_v21  ;;  %v1320_v54 = vadd.f32 %v1304_v9, %v1268_v63  ;;  %v5193_v44 = vld [vmem:[%s6605_s21 + $0x92] sm:$0xf]  ;;  %v5194_v21 = vld [vmem:[%s6605_s21 + $0x9a] sm:$0xf] }
  0xb9   : > { %v1321_v60 = vadd.f32 %v1305_v26, %v1269_v16  ;;  %v1322_v24 = vadd.f32 %v1306_v32, %v1270_v53  ;;  %v1323_v34 = vadd.f32 %v1307_v10, %v1271_v14  ;;  %v1324_v58 = vadd.f32 %v1308_v7, %v1272_v28  ;;  %v5196_v16 = vld [vmem:[%s6605_s21 + $0xaa] sm:$0xf]  ;;  %v5197_v53 = vld [vmem:[%s6605_s21 + $0xc2] sm:$0xf] }
  0xba   : > { %v1325_v20 = vadd.f32 %v1309_v18, %v1273_v52  ;;  %v1326_v13 = vadd.f32 %v1310_v56, %v1274_v59  ;;  %v1347_v29 = vrot.slane %v7130_v62, %v8874_v19  ;;  %v1327_v63 = vadd.f32 %v1311_v41, %v1275_v57  ;;  %v5198_v14 = vld [vmem:[%s6605_s21 + $0xca] sm:$0xf]  ;;  %v5199_v59 = vld [vmem:[%s6605_s21 + $0xd2] sm:$0xf] }
  0xbb   : > { %v7318_v36 = vrot.slane %v7130_v62, %v8875_v43  ;;  %v7322_v28 = vrot.slane %v7130_v62, %v8876_v2  ;;  %v7326_v52 = vrot.slane %v7130_v62, %v6600_v11  ;;  %v7332_v57 = vrot.slane %v281_v35, %v6586_v4  ;;  %v5204_v11 = vld [vmem:[%s6605_s21 + $0x10a] sm:$0xf]  ;;  %v5214_v2 = vld [vmem:[%s6605_s21 + $0xd0] sm:$0xf] }
  0xbc   : > { %v7335_v30 = vrot.slane %v281_v35, %v6588_v5  ;;  %v7338_v25 = vrot.slane %v281_v35, %v6590_v6  ;;  %v7342_v22 = vcombine.high %v7306_v0, %v7306_v0  ;;  %v1348_v62 = vmul.f32 %v5189_v48, %v1347_v29  ;;  %v5205_v18 = vld [vmem:[%s6605_s21 + $0x68] sm:$0xf] }
  0xbd   : > { %v1349_v61 = vmul.f32 %v5190_v8, %v1347_v29  ;;  %v1350_v15 = vmul.f32 %v5191_v40, %v1347_v29  ;;  %v1351_v39 = vmul.f32 %v5192_v47, %v1347_v29  ;;  %v1352_v4 = vmul.f32 %v5193_v44, %v1347_v29  ;;  %v5206_v8 = vld [vmem:[%s6605_s21 + $0x70] sm:$0xf]  ;;  %v5207_v40 = vld [vmem:[%s6605_s21 + $0x78] sm:$0xf]  ;;  %v5208_v47 = vld [vmem:[%s6605_s21 + $0x80] sm:$0xf] }
  0xbe   : > { %v1353_v49 = vmul.f32 %v5194_v21, %v1347_v29  ;;  %v1354_v5 = vmul.f32 %v5195_v46, %v1347_v29  ;;  %v1355_v37 = vmul.f32 %v5196_v16, %v1347_v29  ;;  %v1356_v6 = vmul.f32 %v5197_v53, %v1347_v29  ;;  %v5209_v16 = vld [vmem:[%s6605_s21 + $0x98] sm:$0xf]  ;;  %v5213_v43 = vld [vmem:[%s6605_s21 + $0xc8] sm:$0xf] }
  0xbf   : > { %v1357_v45 = vmul.f32 %v5198_v14, %v1347_v29  ;;  %v1358_v27 = vmul.f32 %v5199_v59, %v1347_v29  ;;  %v1359_v9 = vmul.f32 %v5200_v1, %v1347_v29  ;;  %v1360_v26 = vmul.f32 %v5201_v12, %v1347_v29  ;;  %v5212_v14 = vld [vmem:[%s6605_s21 + $0xb0] sm:$0xf]  ;;  %v5216_v1 = vld [vmem:[%s6605_s21 + $0xe0] sm:$0xf]  ;;  %v5217_v12 = vld [vmem:[%s6605_s21 + $0xf8] sm:$0xf] }
  0xc0   : > { %v1361_v32 = vmul.f32 %v5202_v55, %v1347_v29  ;;  %v1362_v10 = vmul.f32 %v5203_v33, %v1347_v29  ;;  %v1363_v7 = vmul.f32 %v5204_v11, %v1347_v29  ;;  %v1364_v56 = vadd.f32 %v1348_v62, %v1312_v23  ;;  %v5210_v29 = vld [vmem:[%s6605_s21 + $0xa0] sm:$0xf]  ;;  %v5211_v23 = vld [vmem:[%s6605_s21 + $0xa8] sm:$0xf]  ;;  %v5220_v11 = vld [vmem:[%s6605_s21 + $0x110] sm:$0xf] }
  0xc1   : > { %v1365_v41 = vadd.f32 %v1349_v61, %v1313_v50  ;;  %v1366_v35 = vadd.f32 %v1350_v15, %v1314_v31  ;;  %v1367_v48 = vadd.f32 %v1351_v39, %v1315_v42  ;;  %v1368_v44 = vadd.f32 %v1352_v4, %v1316_v3  ;;  %v5218_v55 = vld [vmem:[%s6605_s21 + $0x100] sm:$0xf]  ;;  %v5219_v33 = vld [vmem:[%s6605_s21 + $0x108] sm:$0xf] }
  0xc2   : > { %v1369_v21 = vadd.f32 %v1353_v49, %v1317_v38  ;;  %v1370_v46 = vadd.f32 %v1354_v5, %v1318_v51  ;;  %v1371_v19 = vadd.f32 %v1355_v37, %v1319_v17  ;;  %v1372_v50 = vadd.f32 %v1356_v6, %v1320_v54  ;;  %v5215_v17 = vld [vmem:[%s6605_s21 + $0xd8] sm:$0xf]  ;;  %v5221_v6 = vld [vmem:[%s6605_s21 + $0x69] sm:$0xf] }
  0xc3   : > { %v1373_v31 = vadd.f32 %v1357_v45, %v1321_v60  ;;  %v1374_v42 = vadd.f32 %v1358_v27, %v1322_v24  ;;  %v1375_v53 = vadd.f32 %v1359_v9, %v1323_v34  ;;  %v1376_v3 = vadd.f32 %v1360_v26, %v1324_v58 }
  0xc4   : > { %v1377_v38 = vadd.f32 %v1361_v32, %v1325_v20  ;;  %v1378_v51 = vadd.f32 %v1362_v10, %v1326_v13  ;;  %v1379_v59 = vadd.f32 %v1363_v7, %v1327_v63  ;;  %v1401_v62 = vmul.f32 %v5205_v18, %v7318_v36  ;;  %v5222_v32 = vld [vmem:[%s6605_s21 + $0x71] sm:$0xf]  ;;  %v5223_v10 = vld [vmem:[%s6605_s21 + $0x79] sm:$0xf]  ;;  %v5224_v7 = vld [vmem:[%s6605_s21 + $0x81] sm:$0xf] }
  0xc5   : > { %v1402_v54 = vmul.f32 %v5206_v8, %v7318_v36  ;;  %v1403_v60 = vmul.f32 %v5207_v40, %v7318_v36  ;;  %v1404_v24 = vmul.f32 %v5208_v47, %v7318_v36  ;;  %v1405_v34 = vmul.f32 %v5209_v16, %v7318_v36  ;;  %v5225_v16 = vld [vmem:[%s6605_s21 + $0x99] sm:$0xf] }
  0xc6   : > { %v1406_v58 = vmul.f32 %v5210_v29, %v7318_v36  ;;  %v1407_v20 = vmul.f32 %v5211_v23, %v7318_v36  ;;  %v1408_v13 = vmul.f32 %v5212_v14, %v7318_v36  ;;  %v1409_v63 = vmul.f32 %v5213_v43, %v7318_v36  ;;  %v5228_v23 = vld [vmem:[%s6605_s21 + $0xb1] sm:$0xf]  ;;  %v5229_v14 = vld [vmem:[%s6605_s21 + $0xc9] sm:$0xf] }
  0xc7   : > { %v1410_v61 = vmul.f32 %v5214_v2, %v7318_v36  ;;  %v1411_v15 = vmul.f32 %v5215_v17, %v7318_v36  ;;  %v1412_v39 = vmul.f32 %v5216_v1, %v7318_v36  ;;  %v1413_v4 = vmul.f32 %v5217_v12, %v7318_v36  ;;  %v5230_v43 = vld [vmem:[%s6605_s21 + $0xd1] sm:$0xf]  ;;  %v5232_v17 = vld [vmem:[%s6605_s21 + $0xe1] sm:$0xf]  ;;  %v5233_v1 = vld [vmem:[%s6605_s21 + $0xf9] sm:$0xf] }
  0xc8   : > { %v1414_v49 = vmul.f32 %v5218_v55, %v7318_v36  ;;  %v1415_v5 = vmul.f32 %v5219_v33, %v7318_v36  ;;  %v1416_v37 = vmul.f32 %v5220_v11, %v7318_v36  ;;  %v1417_v45 = vadd.f32 %v1401_v62, %v1364_v56  ;;  %v5226_v36 = vld [vmem:[%s6605_s21 + $0xa1] sm:$0xf]  ;;  %v5227_v56 = vld [vmem:[%s6605_s21 + $0xa9] sm:$0xf]  ;;  %v5236_v33 = vld [vmem:[%s6605_s21 + $0x111] sm:$0xf] }
  0xc9   : > { %v1418_v27 = vadd.f32 %v1402_v54, %v1365_v41  ;;  %v1419_v9 = vadd.f32 %v1403_v60, %v1366_v35  ;;  %v1420_v26 = vadd.f32 %v1404_v24, %v1367_v48  ;;  %v1421_v18 = vadd.f32 %v1405_v34, %v1368_v44  ;;  %v5234_v12 = vld [vmem:[%s6605_s21 + $0x101] sm:$0xf]  ;;  %v5235_v55 = vld [vmem:[%s6605_s21 + $0x109] sm:$0xf] }
  0xca   : > { %v1422_v8 = vadd.f32 %v1406_v58, %v1369_v21  ;;  %v1423_v40 = vadd.f32 %v1407_v20, %v1370_v46  ;;  %v1424_v47 = vadd.f32 %v1408_v13, %v1371_v19  ;;  %v1425_v41 = vadd.f32 %v1409_v63, %v1372_v50  ;;  %v5231_v19 = vld [vmem:[%s6605_s21 + $0xd9] sm:$0xf]  ;;  %v5237_v13 = vld [vmem:[%s6605_s21 + $0x6a] sm:$0xf] }
  0xcb   : > { %v1426_v35 = vadd.f32 %v1410_v61, %v1373_v31  ;;  %v1427_v48 = vadd.f32 %v1411_v15, %v1374_v42  ;;  %v1428_v29 = vadd.f32 %v1412_v39, %v1375_v53  ;;  %v1429_v44 = vadd.f32 %v1413_v4, %v1376_v3  ;;  %v5238_v4 = vld [vmem:[%s6605_s21 + $0x72] sm:$0xf] }
  0xcc   : > { %v1430_v21 = vadd.f32 %v1414_v49, %v1377_v38  ;;  %v1431_v46 = vadd.f32 %v1415_v5, %v1378_v51  ;;  %v1432_v2 = vadd.f32 %v1416_v37, %v1379_v59  ;;  %v1453_v11 = vmul.f32 %v5221_v6, %v7322_v28  ;;  %v5239_v49 = vld [vmem:[%s6605_s21 + $0x7a] sm:$0xf]  ;;  %v5240_v5 = vld [vmem:[%s6605_s21 + $0x82] sm:$0xf] }
  0xcd   : > { %v1454_v50 = vmul.f32 %v5222_v32, %v7322_v28  ;;  %v1455_v31 = vmul.f32 %v5223_v10, %v7322_v28  ;;  %v1456_v42 = vmul.f32 %v5224_v7, %v7322_v28  ;;  %v1457_v53 = vmul.f32 %v5225_v16, %v7322_v28  ;;  %v5241_v7 = vld [vmem:[%s6605_s21 + $0x9a] sm:$0xf] }
  0xce   : > { %v1458_v3 = vmul.f32 %v5226_v36, %v7322_v28  ;;  %v1459_v38 = vmul.f32 %v5227_v56, %v7322_v28  ;;  %v1460_v51 = vmul.f32 %v5228_v23, %v7322_v28  ;;  %v1461_v59 = vmul.f32 %v5229_v14, %v7322_v28  ;;  %v5244_v36 = vld [vmem:[%s6605_s21 + $0xb2] sm:$0xf]  ;;  %v5245_v56 = vld [vmem:[%s6605_s21 + $0xca] sm:$0xf] }
  0xcf   : > { %v1462_v62 = vmul.f32 %v5230_v43, %v7322_v28  ;;  %v1463_v54 = vmul.f32 %v5231_v19, %v7322_v28  ;;  %v1464_v60 = vmul.f32 %v5232_v17, %v7322_v28  ;;  %v1465_v24 = vmul.f32 %v5233_v1, %v7322_v28  ;;  %v5246_v23 = vld [vmem:[%s6605_s21 + $0xd2] sm:$0xf]  ;;  %v5248_v43 = vld [vmem:[%s6605_s21 + $0xe2] sm:$0xf]  ;;  %v5249_v19 = vld [vmem:[%s6605_s21 + $0xfa] sm:$0xf] }
  0xd0   : > { %v1466_v34 = vmul.f32 %v5234_v12, %v7322_v28  ;;  %v1467_v58 = vmul.f32 %v5235_v55, %v7322_v28  ;;  %v1468_v20 = vmul.f32 %v5236_v33, %v7322_v28  ;;  %v1469_v63 = vadd.f32 %v1453_v11, %v1417_v45  ;;  %v5242_v28 = vld [vmem:[%s6605_s21 + $0xa2] sm:$0xf]  ;;  %v5243_v45 = vld [vmem:[%s6605_s21 + $0xaa] sm:$0xf]  ;;  %v5252_v12 = vld [vmem:[%s6605_s21 + $0x112] sm:$0xf] }
  0xd1   : > { %v1470_v61 = vadd.f32 %v1454_v50, %v1418_v27  ;;  %v1471_v15 = vadd.f32 %v1455_v31, %v1419_v9  ;;  %v1472_v39 = vadd.f32 %v1456_v42, %v1420_v26  ;;  %v1473_v37 = vadd.f32 %v1457_v53, %v1421_v18  ;;  %v5250_v17 = vld [vmem:[%s6605_s21 + $0x102] sm:$0xf]  ;;  %v5251_v1 = vld [vmem:[%s6605_s21 + $0x10a] sm:$0xf] }
  0xd2   : > { %v1474_v6 = vadd.f32 %v1458_v3, %v1422_v8  ;;  %v1475_v32 = vadd.f32 %v1459_v38, %v1423_v40  ;;  %v1476_v10 = vadd.f32 %v1460_v51, %v1424_v47  ;;  %v1477_v27 = vadd.f32 %v1461_v59, %v1425_v41  ;;  %v5247_v47 = vld [vmem:[%s6605_s21 + $0xda] sm:$0xf]  ;;  %v5253_v38 = vld [vmem:[%s6605_s21 + $0x70] sm:$0xf] }
  0xd3   : > { %v1478_v9 = vadd.f32 %v1462_v62, %v1426_v35  ;;  %v1479_v26 = vadd.f32 %v1463_v54, %v1427_v48  ;;  %v1480_v16 = vadd.f32 %v1464_v60, %v1428_v29  ;;  %v1481_v18 = vadd.f32 %v1465_v24, %v1429_v44  ;;  %v5254_v60 = vld [vmem:[%s6605_s21 + $0x78] sm:$0xf]  ;;  %v5255_v24 = vld [vmem:[%s6605_s21 + $0x80] sm:$0xf] }
  0xd4   : > { %v1482_v8 = vadd.f32 %v1466_v34, %v1430_v21  ;;  %v1483_v40 = vadd.f32 %v1467_v58, %v1431_v46  ;;  %v1484_v14 = vadd.f32 %v1468_v20, %v1432_v2  ;;  %v1505_v55 = vmul.f32 %v5237_v13, %v7326_v52  ;;  %v5256_v34 = vld [vmem:[%s6605_s21 + $0x88] sm:$0xf] }
  0xd5   : > { %v1506_v41 = vmul.f32 %v5238_v4, %v7326_v52  ;;  %v1507_v35 = vmul.f32 %v5239_v49, %v7326_v52  ;;  %v1508_v48 = vmul.f32 %v5240_v5, %v7326_v52  ;;  %v1509_v29 = vmul.f32 %v5241_v7, %v7326_v52  ;;  %v5257_v49 = vld [vmem:[%s6605_s21 + $0xa0] sm:$0xf]  ;;  %v5260_v7 = vld [vmem:[%s6605_s21 + $0xb8] sm:$0xf] }
  0xd6   : > { %v1510_v44 = vmul.f32 %v5242_v28, %v7326_v52  ;;  %v1511_v21 = vmul.f32 %v5243_v45, %v7326_v52  ;;  %v1512_v46 = vmul.f32 %v5244_v36, %v7326_v52  ;;  %v1513_v2 = vmul.f32 %v5245_v56, %v7326_v52  ;;  %v5261_v28 = vld [vmem:[%s6605_s21 + $0xd0] sm:$0xf]  ;;  %v5262_v45 = vld [vmem:[%s6605_s21 + $0xd8] sm:$0xf]  ;;  %v5264_v56 = vld [vmem:[%s6605_s21 + $0xe8] sm:$0xf] }
  0xd7   : > { %v1514_v33 = vmul.f32 %v5246_v23, %v7326_v52  ;;  %v1515_v11 = vmul.f32 %v5247_v47, %v7326_v52  ;;  %v1516_v50 = vmul.f32 %v5248_v43, %v7326_v52  ;;  %v1517_v31 = vmul.f32 %v5249_v19, %v7326_v52  ;;  %v5265_v23 = vld [vmem:[%s6605_s21 + $0x100] sm:$0xf]  ;;  %v5266_v47 = vld [vmem:[%s6605_s21 + $0x108] sm:$0xf]  ;;  %v5267_v43 = vld [vmem:[%s6605_s21 + $0x110] sm:$0xf] }
  0xd8   : > { %v1518_v42 = vmul.f32 %v5250_v17, %v7326_v52  ;;  %v1519_v53 = vmul.f32 %v5251_v1, %v7326_v52  ;;  %v1520_v3 = vmul.f32 %v5252_v12, %v7326_v52  ;;  %v1521_v51 = vadd.f32 %v1505_v55, %v1469_v63  ;;  %v5258_v52 = vld [vmem:[%s6605_s21 + $0xa8] sm:$0xf]  ;;  %v5259_v63 = vld [vmem:[%s6605_s21 + $0xb0] sm:$0xf]  ;;  %v5268_v19 = vld [vmem:[%s6605_s21 + $0x118] sm:$0xf] }
  0xd9   : > { %v1522_v59 = vadd.f32 %v1506_v41, %v1470_v61  ;;  %v1523_v62 = vadd.f32 %v1507_v35, %v1471_v15  ;;  %v1524_v54 = vadd.f32 %v1508_v48, %v1472_v39  ;;  %v1525_v58 = vadd.f32 %v1509_v29, %v1473_v37 }
  0xda   : > { %v1526_v20 = vadd.f32 %v1510_v44, %v1474_v6  ;;  %v1527_v13 = vadd.f32 %v1511_v21, %v1475_v32  ;;  %v1528_v4 = vadd.f32 %v1512_v46, %v1476_v10  ;;  %v1529_v61 = vadd.f32 %v1513_v2, %v1477_v27  ;;  %v5263_v10 = vld [vmem:[%s6605_s21 + $0xe0] sm:$0xf]  ;;  %v5269_v44 = vld [vmem:[%s6605_s21 + $0x71] sm:$0xf] }
  0xdb   : > { %v1530_v15 = vadd.f32 %v1514_v33, %v1478_v9  ;;  %v1531_v39 = vadd.f32 %v1515_v11, %v1479_v26  ;;  %v1532_v5 = vadd.f32 %v1516_v50, %v1480_v16  ;;  %v1533_v37 = vadd.f32 %v1517_v31, %v1481_v18  ;;  %v5270_v11 = vld [vmem:[%s6605_s21 + $0x79] sm:$0xf]  ;;  %v5271_v50 = vld [vmem:[%s6605_s21 + $0x81] sm:$0xf]  ;;  %v5272_v31 = vld [vmem:[%s6605_s21 + $0x89] sm:$0xf] }
  0xdc   : > { %v1534_v6 = vadd.f32 %v1518_v42, %v1482_v8  ;;  %v1535_v32 = vadd.f32 %v1519_v53, %v1483_v40  ;;  %v1536_v36 = vadd.f32 %v1520_v3, %v1484_v14  ;;  %v1558_v17 = vmul.f32 %v5253_v38, %v7332_v57 }
  0xdd   : > { %v1559_v27 = vmul.f32 %v5254_v60, %v7332_v57  ;;  %v1560_v9 = vmul.f32 %v5255_v24, %v7332_v57  ;;  %v1561_v26 = vmul.f32 %v5256_v34, %v7332_v57  ;;  %v1562_v16 = vmul.f32 %v5257_v49, %v7332_v57  ;;  %v5273_v60 = vld [vmem:[%s6605_s21 + $0xa1] sm:$0xf]  ;;  %v5276_v34 = vld [vmem:[%s6605_s21 + $0xb9] sm:$0xf]  ;;  %v5277_v49 = vld [vmem:[%s6605_s21 + $0xd1] sm:$0xf] }
  0xde   : > { %v1563_v18 = vmul.f32 %v5258_v52, %v7332_v57  ;;  %v1564_v8 = vmul.f32 %v5259_v63, %v7332_v57  ;;  %v1565_v40 = vmul.f32 %v5260_v7, %v7332_v57  ;;  %v1566_v14 = vmul.f32 %v5261_v28, %v7332_v57  ;;  %v5278_v52 = vld [vmem:[%s6605_s21 + $0xd9] sm:$0xf]  ;;  %v5280_v7 = vld [vmem:[%s6605_s21 + $0xe9] sm:$0xf]  ;;  %v5281_v28 = vld [vmem:[%s6605_s21 + $0x101] sm:$0xf] }
  0xdf   : > { %v1567_v1 = vmul.f32 %v5262_v45, %v7332_v57  ;;  %v1568_v12 = vmul.f32 %v5263_v10, %v7332_v57  ;;  %v1569_v55 = vmul.f32 %v5264_v56, %v7332_v57  ;;  %v1570_v41 = vmul.f32 %v5265_v23, %v7332_v57  ;;  %v5282_v45 = vld [vmem:[%s6605_s21 + $0x109] sm:$0xf]  ;;  %v5283_v10 = vld [vmem:[%s6605_s21 + $0x111] sm:$0xf]  ;;  %v5284_v56 = vld [vmem:[%s6605_s21 + $0x119] sm:$0xf] }
  0xe0   : > { %v1571_v35 = vmul.f32 %v5266_v47, %v7332_v57  ;;  %v1572_v48 = vmul.f32 %v5267_v43, %v7332_v57  ;;  %v1573_v29 = vmul.f32 %v5268_v19, %v7332_v57  ;;  %v1574_v21 = vadd.f32 %v1558_v17, %v1521_v51  ;;  %v5274_v57 = vld [vmem:[%s6605_s21 + $0xa9] sm:$0xf]  ;;  %v5275_v51 = vld [vmem:[%s6605_s21 + $0xb1] sm:$0xf] }
  0xe1   : > { %v1575_v46 = vadd.f32 %v1559_v27, %v1522_v59  ;;  %v1576_v2 = vadd.f32 %v1560_v9, %v1523_v62  ;;  %v1577_v33 = vadd.f32 %v1561_v26, %v1524_v54  ;;  %v1578_v42 = vadd.f32 %v1562_v16, %v1525_v58  ;;  %v5285_v16 = vld [vmem:[%s6605_s21 + $0x72] sm:$0xf] }
  0xe2   : > { %v1579_v53 = vadd.f32 %v1563_v18, %v1526_v20  ;;  %v1580_v3 = vadd.f32 %v1564_v8, %v1527_v13  ;;  %v1581_v38 = vadd.f32 %v1565_v40, %v1528_v4  ;;  %v1582_v59 = vadd.f32 %v1566_v14, %v1529_v61  ;;  %v5279_v4 = vld [vmem:[%s6605_s21 + $0xe1] sm:$0xf]  ;;  %v5286_v18 = vld [vmem:[%s6605_s21 + $0x7a] sm:$0xf] }
  0xe3   : > { %v1583_v62 = vadd.f32 %v1567_v1, %v1530_v15  ;;  %v1584_v54 = vadd.f32 %v1568_v12, %v1531_v39  ;;  %v1585_v24 = vadd.f32 %v1569_v55, %v1532_v5  ;;  %v1586_v58 = vadd.f32 %v1570_v41, %v1533_v37  ;;  %v5287_v12 = vld [vmem:[%s6605_s21 + $0x82] sm:$0xf]  ;;  %v5288_v55 = vld [vmem:[%s6605_s21 + $0x8a] sm:$0xf] }
  0xe4   : > { %v1587_v20 = vadd.f32 %v1571_v35, %v1534_v6  ;;  %v1588_v13 = vadd.f32 %v1572_v48, %v1535_v32  ;;  %v1589_v63 = vadd.f32 %v1573_v29, %v1536_v36  ;;  %v1610_v23 = vmul.f32 %v5269_v44, %v7335_v30  ;;  %v5289_v41 = vld [vmem:[%s6605_s21 + $0xa2] sm:$0xf] }
  0xe5   : > { %v1611_v61 = vmul.f32 %v5270_v11, %v7335_v30  ;;  %v1612_v15 = vmul.f32 %v5271_v50, %v7335_v30  ;;  %v1613_v39 = vmul.f32 %v5272_v31, %v7335_v30  ;;  %v1614_v5 = vmul.f32 %v5273_v60, %v7335_v30  ;;  %v5290_v11 = vld [vmem:[%s6605_s21 + $0xaa] sm:$0xf]  ;;  %v5292_v50 = vld [vmem:[%s6605_s21 + $0xba] sm:$0xf] }
  0xe6   : > { %v1615_v37 = vmul.f32 %v5274_v57, %v7335_v30  ;;  %v1616_v6 = vmul.f32 %v5275_v51, %v7335_v30  ;;  %v1617_v32 = vmul.f32 %v5276_v34, %v7335_v30  ;;  %v1618_v36 = vmul.f32 %v5277_v49, %v7335_v30  ;;  %v5295_v57 = vld [vmem:[%s6605_s21 + $0xe2] sm:$0xf]  ;;  %v5296_v51 = vld [vmem:[%s6605_s21 + $0xea] sm:$0xf] }
  0xe7   : > { %v1619_v47 = vmul.f32 %v5278_v52, %v7335_v30  ;;  %v1620_v43 = vmul.f32 %v5279_v4, %v7335_v30  ;;  %v1621_v19 = vmul.f32 %v5280_v7, %v7335_v30  ;;  %v1622_v17 = vmul.f32 %v5281_v28, %v7335_v30  ;;  %v5297_v7 = vld [vmem:[%s6605_s21 + $0x102] sm:$0xf]  ;;  %v5298_v28 = vld [vmem:[%s6605_s21 + $0x10a] sm:$0xf] }
  0xe8   : > { %v1623_v27 = vmul.f32 %v5282_v45, %v7335_v30  ;;  %v1624_v9 = vmul.f32 %v5283_v10, %v7335_v30  ;;  %v1625_v26 = vmul.f32 %v5284_v56, %v7335_v30  ;;  %v1626_v8 = vadd.f32 %v1610_v23, %v1574_v21  ;;  %v5291_v30 = vld [vmem:[%s6605_s21 + $0xb2] sm:$0xf]  ;;  %v5300_v10 = vld [vmem:[%s6605_s21 + $0x11a] sm:$0xf] }
  0xe9   : > { %v1627_v40 = vadd.f32 %v1611_v61, %v1575_v46  ;;  %v1628_v14 = vadd.f32 %v1612_v15, %v1576_v2  ;;  %v1629_v1 = vadd.f32 %v1613_v39, %v1577_v33  ;;  %v1630_v35 = vadd.f32 %v1614_v5, %v1578_v42  ;;  %v5293_v2 = vld [vmem:[%s6605_s21 + $0xd2] sm:$0xf]  ;;  %v5294_v33 = vld [vmem:[%s6605_s21 + $0xda] sm:$0xf] }
  0xea   : > { %v1631_v48 = vadd.f32 %v1615_v37, %v1579_v53  ;;  %v1632_v29 = vadd.f32 %v1616_v6, %v1580_v3  ;;  %v1633_v44 = vadd.f32 %v1617_v32, %v1581_v38  ;;  %v1634_v31 = vadd.f32 %v1618_v36, %v1582_v59  ;;  %v5299_v45 = vld [vmem:[%s6605_s21 + $0x112] sm:$0xf] }
  0xeb   : > { %v1635_v60 = vadd.f32 %v1619_v47, %v1583_v62  ;;  %v1636_v21 = vadd.f32 %v1620_v43, %v1584_v54  ;;  %v1637_v46 = vadd.f32 %v1621_v19, %v1585_v24  ;;  %v1662_v42 = vmul.f32 %v5285_v16, %v7338_v25 }
  0xec   : > { %v1663_v53 = vmul.f32 %v5286_v18, %v7338_v25  ;;  %v1664_v3 = vmul.f32 %v5287_v12, %v7338_v25  ;;  %v1665_v38 = vmul.f32 %v5288_v55, %v7338_v25  ;;  %v1666_v59 = vmul.f32 %v5289_v41, %v7338_v25 }
  0xed   : > { %v1667_v62 = vmul.f32 %v5290_v11, %v7338_v25  ;;  %v1668_v54 = vmul.f32 %v5291_v30, %v7338_v25  ;;  %v1669_v24 = vmul.f32 %v5292_v50, %v7338_v25  ;;  %v1638_v34 = vadd.f32 %v1622_v17, %v1586_v58 }
  0xee   : > { %v1639_v49 = vadd.f32 %v1623_v27, %v1587_v20  ;;  %v1640_v52 = vadd.f32 %v1624_v9, %v1588_v13  ;;  %v1641_v4 = vadd.f32 %v1625_v26, %v1589_v63  ;;  %v1670_v56 = vmul.f32 %v5293_v2, %v7338_v25 }
  0xef   : > { %v1671_v23 = vmul.f32 %v5294_v33, %v7338_v25  ;;  %v1672_v61 = vmul.f32 %v5295_v57, %v7338_v25  ;;  %v1673_v15 = vmul.f32 %v5296_v51, %v7338_v25  ;;  %v1678_v39 = vadd.f32 %v1662_v42, %v1626_v8 }
  0xf0   : > { %v1679_v5 = vadd.f32 %v1663_v53, %v1627_v40  ;;  %v1680_v37 = vadd.f32 %v1664_v3, %v1628_v14  ;;  %v1681_v6 = vadd.f32 %v1665_v38, %v1629_v1  ;;  %v1682_v58 = vadd.f32 %v1666_v59, %v1630_v35 }
  0xf1   : > { %v1683_v20 = vadd.f32 %v1667_v62, %v1631_v48  ;;  %v1684_v13 = vadd.f32 %v1668_v54, %v1632_v29  ;;  %v1685_v63 = vadd.f32 %v1669_v24, %v1633_v44  ;;  %v1674_v32 = vmul.f32 %v5297_v7, %v7338_v25  ;;  %v6153_v48 = vld [vmem:[%s8827_s3] sm:$0xff]  }
  0xf2   : > { %v1675_v36 = vmul.f32 %v5298_v28, %v7338_v25  ;;  %v1676_v47 = vmul.f32 %v5299_v45, %v7338_v25  ;;  %v1677_v43 = vmul.f32 %v5300_v10, %v7338_v25  ;;  %v1686_v19 = vadd.f32 %v1670_v56, %v1634_v31  ;;  %5490 = vmatprep.mubr.msk.bf16.mxu0 %vm1751_vm0, %v6153_v48  ;;  %v1938_v45 = vld [vmem:[%s8828_s4 + $0x28] sm:$0xff]  ;;  %v1939_v10 = vld [vmem:[%s8828_s4 + $0x30] sm:$0xff] }
  0xf3   : > { %v1687_v17 = vadd.f32 %v1671_v23, %v1635_v60  ;;  %v1688_v27 = vadd.f32 %v1672_v61, %v1636_v21  ;;  %v1689_v9 = vadd.f32 %v1673_v15, %v1637_v46  ;;  %v7540_v26 = vadd.f32 %v7306_v0, %v1678_v39  ;;  %v1935_v39 = vld [vmem:[%s8828_s4 + $0x10] sm:$0xff] }
  0xf4   : > { %v7543_v16 = vadd.f32 %v7342_v22, %v1679_v5  ;;  %v7546_v18 = vadd.f32 %v7306_v0, %v1680_v37  ;;  %v7549_v8 = vadd.f32 %v7342_v22, %v1681_v6  ;;  %v7552_v40 = vadd.f32 %v7306_v0, %v1682_v58  ;;  %v1934_v5 = vld [vmem:[%s8828_s4 + $0x8] sm:$0xff]  ;;  %v1940_v58 = vld [vmem:[%s8828_s4 + $0x38] sm:$0xff] }
  0xf5   : > { %v7555_v25 = vadd.f32 %v7342_v22, %v1683_v20  ;;  %v7558_v14 = vadd.f32 %v7306_v0, %v1684_v13  ;;  %v7561_v1 = vadd.f32 %v7342_v22, %v1685_v63  ;;  %v1690_v12 = vadd.f32 %v1674_v32, %v1638_v34 }
  0xf6   : > { %v1691_v55 = vadd.f32 %v1675_v36, %v1639_v49  ;;  %v7564_v41 = vadd.f32 %v7306_v0, %v1686_v19  ;;  %v7567_v35 = vadd.f32 %v7342_v22, %v1687_v17  ;;  %v1692_v29 = vadd.f32 %v1676_v47, %v1640_v52  ;;  %v1937_v49 = vld [vmem:[%s8828_s4 + $0x20] sm:$0xff] }
  0xf7   : > { %v1735_v44 = vcombine.low %v7540_v26, %v7543_v16  ;;  %v1736_v11 = vcombine.low %v7546_v18, %v7549_v8  ;;  %v1737_v30 = vcombine.low %v7552_v40, %v7555_v25  ;;  %v1693_v50 = vadd.f32 %v1677_v43, %v1641_v4 }
  0xf8   : > { %v7579_v31 = vadd.f32 %v7306_v0, %v1688_v27  ;;  %v7582_v60 = vadd.f32 %v7342_v22, %v1689_v9  ;;  %v1738_v21 = vcombine.low %v7558_v14, %v7561_v1  ;;  %v1715_v46 = vadd.f32 %v7306_v0, %v1690_v12 }
  0xf9   : > { %v1716_v2 = vadd.f32 %v7342_v22, %v1691_v55  ;;  %v1739_v33 = vcombine.low %v7564_v41, %v7567_v35  ;;  %v1752_v57 = vsel %vm1751_vm0, %v1735_v44, 0.0  ;;  %v1753_v51 = vsel %vm1751_vm0, %v1736_v11, 0.0 }
  0xfa   : > { %v1755_v42 = vsel %vm1751_vm0, %v1737_v30, 0.0  ;;  %v1754_v53 = vadd.f32 %v1753_v51, %v1752_v57  ;;  %v7595_v3 = vadd.f32 %v7306_v0, %v1692_v29  ;;  %v7598_v38 = vadd.f32 %v7342_v22, %v1693_v50  ;;  %v1933_v0 = vld [vmem:[%s8828_s4] sm:$0xff] }
  0xfb   : > { %v1740_v59 = vcombine.low %v7579_v31, %v7582_v60  ;;  %v1757_v62 = vsel %vm1751_vm0, %v1738_v21, 0.0  ;;  %v1741_v24 = vcombine.low %v1715_v46, %v1716_v2  ;;  %v1759_v34 = vsel %vm1751_vm0, %v1739_v33, 0.0 }
  0xfc   : > { %v1756_v54 = vadd.f32 %v1755_v42, %v1754_v53  ;;  %v6482_v22 = vmov 0   ;;  %v1742_v4 = vcombine.low %v7595_v3, %v7598_v38 }
  0xfd   : > { %5815 = vset.pattern.permute.xlu0 %v6482_v22  ;;  %5816 = vset.pattern.permute.xlu1 %v6482_v22  ;;  %v1761_v7 = vsel %vm1751_vm0, %v1740_v59, 0.0  ;;  %v1763_v56 = vsel %vm1751_vm0, %v1741_v24, 0.0 }
  0xfe   : > { %v1758_v52 = vadd.f32 %v1757_v62, %v1756_v54  ;;  %1967 = vperm.xlu0 %5815, %v1937_v49   ;;  %1947 = vperm.xlu1 %5816, %v1933_v0   ;;  %v1765_v61 = vsel %vm1751_vm0, %v1742_v4, 0.0 }
 0x100   : > { %v1760_v28 = vadd.f32 %v1759_v34, %v1758_v52 }
 0x102   : > { %v1762_v23 = vadd.f32 %v1761_v7, %v1760_v28  ;;  %1972 = vperm.xlu0 %5815, %v1938_v45   ;;  %1977 = vperm.xlu1 %5816, %v1939_v10  }
 0x104   : > { %v1764_v15 = vadd.f32 %v1763_v56, %v1762_v23 }
 0x106   : > { %v1766_v37 = vadd.f32 %v1765_v61, %v1764_v15  ;;  %1957 = vperm.xlu0 %5815, %v1935_v39   ;;  %1952 = vperm.xlu1 %5816, %v1934_v5  }
 0x108   : > { %v1767_v6 = vrot.slane %v1766_v37, 4 }
 0x10a   : > { %v1768_v20 = vadd.f32 %v1767_v6, %v1766_v37  ;;  %1982 = vperm.xlu1 %5816, %v1940_v58  }
 0x10c   : > { %v1769_v13 = vrot.slane %v1768_v20, 2 }
 0x10e   : > { %v1770_v63 = vadd.f32 %v1769_v13, %v1768_v20 }
 0x110   : > { %v1771_v32 = vrot.slane %v1770_v63, 1 }
 0x112   : > { %v1772_v36 = vadd.f32 %v1771_v32, %v1770_v63 }
 0x114   : > { %v1774_v47 = vmul.f32 0.015625, %v1772_v36 }
 0x116   : > { %v1776_v43 = vcombine.high %v1774_v47, %v1774_v47  ;;  %v7631_v19 = vsub.f32 %v7540_v26, %v1774_v47  ;;  %v7634_v17 = vsub.f32 %v7546_v18, %v1774_v47  ;;  %v7637_v27 = vsub.f32 %v7552_v40, %v1774_v47 }
 0x117   : > { %v7640_v9 = vsub.f32 %v7558_v14, %v1774_v47  ;;  %v7643_v12 = vsub.f32 %v7564_v41, %v1774_v47  ;;  %v1788_v14 = vsub.f32 %v7579_v31, %v1774_v47  ;;  %v1790_v29 = vsub.f32 %v1715_v46, %v1774_v47 }
 0x118   : > { %v7646_v55 = vsub.f32 %v7543_v16, %v1776_v43  ;;  %v7649_v48 = vsub.f32 %v7549_v8, %v1776_v43  ;;  %v7652_v26 = vsub.f32 %v7555_v25, %v1776_v43  ;;  %v7655_v18 = vsub.f32 %v7561_v1, %v1776_v43 }
 0x119   : > { %v7658_v40 = vsub.f32 %v7567_v35, %v1776_v43  ;;  %v7662_v41 = vsub.f32 %v7582_v60, %v1776_v43  ;;  %v1791_v16 = vsub.f32 %v1716_v2, %v1776_v43  ;;  %v1794_v8 = vmul.f32 %v7631_v19, %v7631_v19 }
 0x11a   : > { %v1795_v25 = vmul.f32 %v7646_v55, %v7646_v55  ;;  %v1796_v1 = vmul.f32 %v7634_v17, %v7634_v17  ;;  %v1797_v35 = vmul.f32 %v7649_v48, %v7649_v48  ;;  %v1798_v44 = vmul.f32 %v7637_v27, %v7637_v27 }
 0x11b   : > { %v1799_v11 = vmul.f32 %v7652_v26, %v7652_v26  ;;  %v1800_v30 = vmul.f32 %v7640_v9, %v7640_v9  ;;  %v1801_v50 = vmul.f32 %v7655_v18, %v7655_v18  ;;  %v1802_v31 = vmul.f32 %v7643_v12, %v7643_v12 }
 0x11c   : > { %v1803_v60 = vmul.f32 %v7658_v40, %v7658_v40  ;;  %v1792_v21 = vsub.f32 %v7595_v3, %v1774_v47  ;;  %v1793_v46 = vsub.f32 %v7598_v38, %v1776_v43  ;;  %v1804_v2 = vmul.f32 %v1788_v14, %v1788_v14 }
 0x11d   : > { %v1805_v33 = vmul.f32 %v7662_v41, %v7662_v41  ;;  %v1826_v57 = vcombine.low %v1794_v8, %v1795_v25  ;;  %v1827_v51 = vcombine.low %v1796_v1, %v1797_v35  ;;  %v1828_v42 = vcombine.low %v1798_v44, %v1799_v11 }
 0x11e   : > { %v1806_v53 = vmul.f32 %v1790_v29, %v1790_v29  ;;  %v1807_v59 = vmul.f32 %v1791_v16, %v1791_v16  ;;  %v1829_v62 = vcombine.low %v1800_v30, %v1801_v50  ;;  %v1830_v54 = vcombine.low %v1802_v31, %v1803_v60 }
 0x11f   : > { %v1842_v24 = vsel %vm1751_vm0, %v1826_v57, 0.0  ;;  %v1843_v34 = vsel %vm1751_vm0, %v1827_v51, 0.0  ;;  %v1845_v49 = vsel %vm1751_vm0, %v1828_v42, 0.0  ;;  %v1808_v0 = vmul.f32 %v1792_v21, %v1792_v21 }
 0x120   : > { %v1844_v3 = vadd.f32 %v1843_v34, %v1842_v24  ;;  %v1809_v38 = vmul.f32 %v1793_v46, %v1793_v46  ;;  %v1831_v52 = vcombine.low %v1804_v2, %v1805_v33  ;;  %v1847_v22 = vsel %vm1751_vm0, %v1829_v62, 0.0  ;;  %v6154_v62 = vld [vmem:[%s8827_s3 + $0x8] sm:$0xff]   ;;  %v6156_v24 = vld [vmem:[%s8827_s3 + $0x18] sm:$0xff]  }
 0x121   : > { %v1832_v7 = vcombine.low %v1806_v53, %v1807_v59  ;;  %v1849_v28 = vsel %vm1751_vm0, %v1830_v54, 0.0  ;;  %v6155_v54 = vld [vmem:[%s8827_s3 + $0x10] sm:$0xff]  }
 0x122   : > { %v1846_v4 = vadd.f32 %v1845_v49, %v1844_v3  ;;  %v1833_v10 = vcombine.low %v1808_v0, %v1809_v38  ;;  %v1851_v56 = vsel %vm1751_vm0, %v1831_v52, 0.0 }
 0x123   : > { %v1853_v61 = vsel %vm1751_vm0, %v1832_v7, 0.0 }
 0x124   : > { %v1848_v45 = vadd.f32 %v1847_v22, %v1846_v4  ;;  %v1855_v39 = vsel %vm1751_vm0, %v1833_v10, 0.0 }
 0x126   : > { %v1850_v23 = vadd.f32 %v1849_v28, %v1848_v45 }
 0x128   : > { %v1852_v15 = vadd.f32 %v1851_v56, %v1850_v23 }
 0x12a   : > { %v1854_v5 = vadd.f32 %v1853_v61, %v1852_v15 }
 0x12c   : > { %v1856_v37 = vadd.f32 %v1855_v39, %v1854_v5 }
 0x12e   : > { %v1857_v6 = vrot.slane %v1856_v37, 4 }
 0x130   : > { %v1858_v58 = vadd.f32 %v1857_v6, %v1856_v37 }
 0x132   : > { %v1859_v20 = vrot.slane %v1858_v58, 2 }
 0x134   : > { %v1860_v13 = vadd.f32 %v1859_v20, %v1858_v58  ;;  %v6157_v58 = vld [vmem:[%s8827_s3 + $0x20] sm:$0xff]   ;;  %v6158_v20 = vld [vmem:[%s8827_s3 + $0x28] sm:$0xff]  }
 0x136   : > { %v1861_v63 = vrot.slane %v1860_v13, 1 }
 0x138   : > { %v1862_v32 = vadd.f32 %v1861_v63, %v1860_v13 }
 0x13a   : > { %v1863_v36 = vmul.f32 0.015625, %v1862_v32 }
 0x13c   : > { %v1864_v47 = vadd.f32 1e-05, %v1863_v36 }
 0x13e   : > { %6161 = vrsqrt.f32 %v1864_v47  ;;  %v1936_v47 = vld [vmem:[%s8828_s4 + $0x18] sm:$0xff] }
 0x14b   : > { %v6162_v43 = vpop.eup %6161 }
 0x14c   : > { %v1867_v8 = vcombine.high %v6162_v43, %v6162_v43  ;;  %v1881_v25 = vmul.f32 %v6162_v43, %v1790_v29  ;;  %v1883_v1 = vmul.f32 %v6162_v43, %v1792_v21  ;;  %v1877_v35 = vmul.f32 %v6162_v43, %v7643_v12 }
 0x14d   : > { %v1879_v44 = vmul.f32 %v6162_v43, %v1788_v14  ;;  %v1869_v11 = vmul.f32 %v6162_v43, %v7631_v19  ;;  %v1871_v33 = vmul.f32 %v6162_v43, %v7634_v17  ;;  %v1873_v21 = vmul.f32 %v6162_v43, %v7637_v27 }
 0x14e   : > { %v1882_v30 = vmul.f32 %v1867_v8, %v1791_v16  ;;  %v1884_v50 = vmul.f32 %v1867_v8, %v1793_v46  ;;  %v1878_v31 = vmul.f32 %v1867_v8, %v7658_v40  ;;  %v1880_v60 = vmul.f32 %v1867_v8, %v7662_v41 }
 0x14f   : > { %v1870_v2 = vmul.f32 %v1867_v8, %v7646_v55  ;;  %v1875_v12 = vmul.f32 %v6162_v43, %v7640_v9  ;;  %v1872_v19 = vmul.f32 %v1867_v8, %v7649_v48  ;;  %v1874_v40 = vmul.f32 %v1867_v8, %v7652_v26 }
 0x150   : > { %v1919_v57 = vcombine.low %v1881_v25, %v1882_v30  ;;  %v1920_v51 = vcombine.low %v1883_v1, %v1884_v50  ;;  %v1917_v42 = vcombine.low %v1877_v35, %v1878_v31  ;;  %v1918_v29 = vcombine.low %v1879_v44, %v1880_v60 }
 0x151   : > { %v1913_v14 = vcombine.low %v1869_v11, %v1870_v2  ;;  %v1876_v41 = vmul.f32 %v1867_v8, %v7655_v18  ;;  %v1914_v55 = vcombine.low %v1871_v33, %v1872_v19  ;;  %v1915_v27 = vcombine.low %v1873_v21, %v1874_v40 }
 0x152   : > { %v1932_v16 = vpack.c.bf16 %v1920_v51, %v1919_v57  ;;  %v1931_v46 = vpack.c.bf16 %v1918_v29, %v1917_v42 }
 0x153   : > { %v1929_v53 = vpack.c.bf16 %v1914_v55, %v1913_v14  ;;  %v1916_v9 = vcombine.low %v1875_v12, %v1876_v41 }
 0x154   : > { %5734 = vmatprep.subr.msk.bf16.mxu0 %vm1751_vm0, %v1932_v16  ;;  %v2063_v17 = vsel %vm1751_vm0, %v1932_v16, 0  ;;  %v2060_v48 = vsel %vm1751_vm0, %v1931_v46, 0 }
 0x155   : > { %5483 = vmatpush3.bf16.xpose.msra.mxu0 %v2063_v17  ;;  %v1930_v59 = vpack.c.bf16 %v1916_v9, %v1915_v27  ;;  %v2054_v18 = vsel %vm1751_vm0, %v1929_v53, 0 }
 0x156   : > { %5735 = vmatprep.subr.msk.bf16.mxu0 %vm1751_vm0, %v1931_v46 }
 0x157   : > { %v2057_v26 = vsel %vm1751_vm0, %v1930_v59, 0 }
 0x15d   : > { %5485 = vmatpush3.bf16.xpose.msra.mxu0 %v2060_v48 }
 0x15e   : > { %5736 = vmatprep.subr.msk.bf16.mxu0 %vm1751_vm0, %v1930_v59 }
 0x165   : > { %5487 = vmatpush3.bf16.xpose.msra.mxu0 %v2057_v26 }
 0x166   : > { %5737 = vmatprep.subr.msk.bf16.mxu0 %vm1751_vm0, %v1929_v53 }
 0x16d   : > { %5489 = vmatpush3.bf16.xpose.msra.mxu0 %v2054_v18 }
 0x174   : > { %5491 = vmatmul.mubr.msk.bf16.vlgmr.msra.gmra.mxu0 %vm1751_vm0, %v6154_v62 }
 0x175   : > { %5494 = vmatprep.mubr.msk.bf16.mxu0 %vm1751_vm0, %v6155_v54 }
 0x179   : > { %v1968_v38 = vpop.permute.xlu0 %1967  ;;  %v1948_v39 = vpop.permute.xlu1 %1947 }
 0x17c   : > { %5495 = vmatmul.mubr.msk.bf16.gmra.mxu0 %vm1751_vm0, %v6156_v24 }
 0x17d   : > { %v1973_v45 = vpop.permute.xlu0 %1972  ;;  %5498 = vmatprep.mubr.msk.bf16.mxu0 %vm1751_vm0, %v6157_v58  ;;  %v1978_v13 = vpop.permute.xlu1 %1977 }
 0x181   : > { %v1953_v43 = vpop.permute.xlu1 %1952  ;;  %v1958_v50 = vpop.permute.xlu0 %1957 }
 0x184   : > { %5499 = vmatmul.mubr.msk.bf16.gmra.mxu0 %vm1751_vm0, %v6158_v20 }
 0x185   : > { %v1983_v8 = vpop.permute.xlu1 %1982 }
 0x234   : > { %v5492_v34 = vpop.f32.mrf.mxu0 }
 0x235   : > { %v2108_v31 = vadd.f32 %v5492_v34, %v1958_v50 }
 0x236   : > { %v2099_v49 = vpop.f32.mrf.mxu0 }
 0x237   : > { %v2100_v5 = vadd.f32 %v2099_v49, %v1948_v39  ;;  %v2152_v60 = vcombine.high %v2108_v31, %v2108_v31 }
 0x238   : > { %v7727_v3 = vpop.f32.mrf.mxu0 }
 0x239   : > { %v2150_v37 = vcombine.high %v2100_v5, %v2100_v5  ;;  %v6069_v33 = vpack.i.bf16 %v2152_v60, %v2108_v31 }
 0x23a   : > { %v2102_v0 = vpop.f32.mrf.mxu0 }
 0x23b   : > { %v5901_v6 = vpack.i.bf16 %v2150_v37, %v2100_v5  ;;  %v2103_v35 = vadd.f32 %v2102_v0, %v1953_v43 }
 0x23c   : > { %v5496_v52 = vpop.f32.mrf.mxu0 }
 0x23d   : > { %v2124_v63 = vadd.f32 %v5496_v52, %v1978_v13  ;;  %v2151_v11 = vcombine.high %v2103_v35, %v2103_v35 }
 0x23e   : > { %v2115_v22 = vpop.f32.mrf.mxu0 }
 0x23f   : > { %v2116_v4 = vadd.f32 %v2115_v22, %v1968_v38  ;;  %v2164_v32 = vcombine.high %v2124_v63, %v2124_v63  ;;  %v5985_v30 = vpack.i.bf16 %v2151_v11, %v2103_v35 }
 0x240   : > { %v5497_v7 = vpop.f32.mrf.mxu0 }
 0x241   : > { %v2162_v28 = vcombine.high %v2116_v4, %v2116_v4  ;;  %v5943_v36 = vpack.i.bf16 %v2164_v32, %v2124_v63  ;;  %v2127_v25 = vadd.f32 %v5497_v7, %v1983_v8 }
 0x242   : > { %v2118_v10 = vpop.f32.mrf.mxu0 }
 0x243   : > { %v5817_v56 = vpack.i.bf16 %v2162_v28, %v2116_v4  ;;  %v2119_v23 = vadd.f32 %v2118_v10, %v1973_v45  ;;  %v2165_v1 = vcombine.high %v2127_v25, %v2127_v25 }
 0x245   : > { %v2163_v61 = vcombine.high %v2119_v23, %v2119_v23  ;;  %5818 = vxpose.xlu0.b32.start.end [1/1] (short) (narrow) %v5817_v56, 64  ;;  %v6027_v44 = vpack.i.bf16 %v2165_v1, %v2127_v25 }
 0x247   : > { %v5859_v15 = vpack.i.bf16 %v2163_v61, %v2119_v23 }
 0x249   : > { %5860 = vxpose.xlu1.b32.start.end [1/1] (short) (narrow) %v5859_v15, 64 }
 0x266   : > { %5902 = vxpose.xlu1.b32.start.end [1/1] (short) (narrow) %v5901_v6, 64 }
 0x283   : > { %5944 = vxpose.xlu1.b32.start.end [1/1] (short) (narrow) %v5943_v36, 64 }
 0x28a   : > { %1962 = vperm.xlu0 %5815, %v1936_v47  }
 0x2a0   : > { %6028 = vxpose.xlu1.b32.start.end [1/1] (short) (narrow) %v6027_v44, 64 }
 0x2a8   : > { %5986 = vxpose.xlu0.b32.start.end [1/1] (short) (narrow) %v5985_v30, 64 }
 0x2c1   : > { %v7740_v2 = vpop.trf.xlu0 }
 0x2c2   : > { %v5823_v13 = vunpack.i.h.bf16 %v7740_v2  ;;  %v5820_v63 = vunpack.i.l.bf16 %v7740_v2 }
 0x2c5   : > { %v7742_v57 = vpop.trf.xlu0  ;;  %6070 = vxpose.xlu0.b32.start.end [1/1] (short) (narrow) %v6069_v33, 64  ;;  %v7744_v51 = vpop.trf.xlu1 }
 0x2c6   : > { %v5828_v32 = vunpack.i.h.bf16 %v7742_v57  ;;  %v5825_v36 = vunpack.i.l.bf16 %v7742_v57 }
 0x2c8   : > { %v2726_v43 = vpack.c.bf16 %v5825_v36, %v5820_v63  ;;  %v2730_v8 = vpack.c.bf16 %v5828_v32, %v5823_v13 }
 0x2c9   : > { %v5829_v42 = vpop.trf.xlu0  ;;  %v7746_v29 = vpop.trf.xlu1 }
 0x2ca   : > { %v5833_v22 = vunpack.i.h.bf16 %v5829_v42  ;;  %v5830_v4 = vunpack.i.l.bf16 %v5829_v42  ;;  %v2772_v42 = vsel %vm2758_vm1, %v2726_v43, 0  ;;  %v5870_v32 = vunpack.i.h.bf16 %v7746_v29 }
 0x2cb   : > { %v5867_v36 = vunpack.i.l.bf16 %v7746_v29 }
 0x2cd   : > { %v5834_v21 = vpop.trf.xlu0  ;;  %v7748_v12 = vpop.trf.xlu1 }
 0x2ce   : > { %v5838_v7 = vunpack.i.h.bf16 %v5834_v21  ;;  %v5835_v28 = vunpack.i.l.bf16 %v5834_v21  ;;  %v2861_v21 = vsel %vm2758_vm1, %v2730_v8, 0 }
 0x2d0   : > { %v2727_v15 = vpack.c.bf16 %v5835_v28, %v5830_v4  ;;  %v2731_v39 = vpack.c.bf16 %v5838_v7, %v5833_v22  ;;  %v5872_v28 = vunpack.i.l.bf16 %v7748_v12 }
 0x2d1   : > { %v5839_v19 = vpop.trf.xlu0  ;;  %v7750_v14 = vpop.trf.xlu1 }
 0x2d2   : > { %v5843_v55 = vunpack.i.h.bf16 %v5839_v19  ;;  %v5840_v17 = vunpack.i.l.bf16 %v5839_v19  ;;  %v2775_v1 = vsel %vm2758_vm1, %v2727_v15, 0  ;;  %v2864_v35 = vsel %vm2758_vm1, %v2731_v39, 0 }
 0x2d5   : > { %v5844_v16 = vpop.trf.xlu0  ;;  %v7752_v46 = vpop.trf.xlu1 }
 0x2d6   : > { %v5848_v53 = vunpack.i.h.bf16 %v5844_v16  ;;  %v5845_v27 = vunpack.i.l.bf16 %v5844_v16 }
 0x2d8   : > { %v2728_v34 = vpack.c.bf16 %v5845_v27, %v5840_v17  ;;  %v2732_v49 = vpack.c.bf16 %v5848_v53, %v5843_v55  ;;  %v5885_v55 = vunpack.i.h.bf16 %v7752_v46  ;;  %v5882_v17 = vunpack.i.l.bf16 %v7752_v46 }
 0x2d9   : > { %v5849_v40 = vpop.trf.xlu0  ;;  %v7754_v41 = vpop.trf.xlu1 }
 0x2da   : > { %v5853_v9 = vunpack.i.h.bf16 %v5849_v40  ;;  %v5850_v48 = vunpack.i.l.bf16 %v5849_v40  ;;  %v2778_v10 = vsel %vm2758_vm1, %v2728_v34, 0  ;;  %v2867_v56 = vsel %vm2758_vm1, %v2732_v49, 0 }
 0x2db   : > { %v5890_v53 = vunpack.i.h.bf16 %v7754_v41  ;;  %v5887_v27 = vunpack.i.l.bf16 %v7754_v41 }
 0x2dd   : > { %v5854_v59 = vpop.trf.xlu0  ;;  %v5891_v26 = vpop.trf.xlu1  ;;  %v2736_v46 = vpack.c.bf16 %v5887_v27, %v5882_v17 }
 0x2de   : > { %v5858_v18 = vunpack.i.h.bf16 %v5854_v59  ;;  %v5855_v62 = vunpack.i.l.bf16 %v5854_v59  ;;  %v5895_v44 = vunpack.i.h.bf16 %v5891_v26  ;;  %v5892_v11 = vunpack.i.l.bf16 %v5891_v26 }
 0x2e0   : > { %v2729_v54 = vpack.c.bf16 %v5855_v62, %v5850_v48  ;;  %v2733_v24 = vpack.c.bf16 %v5858_v18, %v5853_v9 }
 0x2e1   : > { %v5896_v0 = vpop.trf.xlu1 }
 0x2e2   : > { %5738 = vmatprep.subr.msk.bf16.mxu1 %vm2758_vm1, %v2729_v54  ;;  %5742 = vmatprep.subr.msk.bf16.mxu0 %vm2758_vm1, %v2733_v24  ;;  %v2781_v38 = vsel %vm2758_vm1, %v2729_v54, 0  ;;  %v2870_v52 = vsel %vm2758_vm1, %v2733_v24, 0  ;;  %v5900_v30 = vunpack.i.h.bf16 %v5896_v0  ;;  %v5897_v50 = vunpack.i.l.bf16 %v5896_v0 }
 0x2e3   : > { %5503 = vmatpush3.bf16.xpose.msra.mxu1 %v2781_v38  ;;  %5519 = vmatpush3.bf16.xpose.msra.mxu0 %v2870_v52 }
 0x2e4   : > { %5739 = vmatprep.subr.msk.bf16.mxu1 %vm2758_vm1, %v2728_v34  ;;  %5743 = vmatprep.subr.msk.bf16.mxu0 %vm2758_vm1, %v2732_v49  ;;  %v2737_v60 = vpack.c.bf16 %v5897_v50, %v5892_v11  ;;  %v2741_v2 = vpack.c.bf16 %v5900_v30, %v5895_v44  ;;  %v2740_v49 = vpack.c.bf16 %v5890_v53, %v5885_v55 }
 0x2e5   : > { %v5903_v45 = vpop.trf.xlu1 }
 0x2e6   : > { %v5907_v23 = vunpack.i.h.bf16 %v5903_v45  ;;  %v5904_v61 = vunpack.i.l.bf16 %v5903_v45  ;;  %v2959_v24 = vsel %vm2758_vm1, %v2737_v60, 0  ;;  %v3048_v34 = vsel %vm2758_vm1, %v2741_v2, 0 }
 0x2e7   : > { %v5877_v45 = vunpack.i.l.bf16 %v7750_v14  ;;  %v3045_v63 = vsel %vm2758_vm1, %v2740_v49, 0 }
 0x2e9   : > { %v5908_v5 = vpop.trf.xlu1 }
 0x2ea   : > { %v5912_v37 = vunpack.i.h.bf16 %v5908_v5  ;;  %v5909_v6 = vunpack.i.l.bf16 %v5908_v5  ;;  %v5880_v5 = vunpack.i.h.bf16 %v7750_v14  ;;  %v5862_v14 = vunpack.i.l.bf16 %v7744_v51 }
 0x2eb   : > { %5505 = vmatpush3.bf16.xpose.msra.mxu1 %v2778_v10  ;;  %5521 = vmatpush3.bf16.xpose.msra.mxu0 %v2867_v56 }
 0x2ec   : > { %5740 = vmatprep.subr.msk.bf16.mxu1 %vm2758_vm1, %v2727_v15  ;;  %5744 = vmatprep.subr.msk.bf16.mxu0 %vm2758_vm1, %v2731_v39  ;;  %v2438_v58 = vpack.c.bf16 %v5909_v6, %v5904_v61  ;;  %v2442_v20 = vpack.c.bf16 %v5912_v37, %v5907_v23  ;;  %v5875_v39 = vunpack.i.h.bf16 %v7748_v12  ;;  %v2956_v6 = vsel %vm2758_vm1, %v2736_v46, 0 }
 0x2ed   : > { %v5913_v47 = vpop.trf.xlu1  ;;  %v5865_v12 = vunpack.i.h.bf16 %v7744_v51 }
 0x2ee   : > { %5510 = vmatprep.mubr.msk.bf16.mxu1 %vm2758_vm1, %v2438_v58  ;;  %5526 = vmatprep.mubr.msk.bf16.mxu0 %vm2758_vm1, %v2442_v20  ;;  %v5917_v33 = vunpack.i.h.bf16 %v5913_v47  ;;  %v5914_v57 = vunpack.i.l.bf16 %v5913_v47  ;;  %v2735_v58 = vpack.c.bf16 %v5877_v45, %v5872_v28 }
 0x2f1   : > { %v5918_v25 = vpop.trf.xlu1 }
 0x2f2   : > { %v5922_v16 = vunpack.i.h.bf16 %v5918_v25  ;;  %v5919_v40 = vunpack.i.l.bf16 %v5918_v25 }
 0x2f3   : > { %5507 = vmatpush3.bf16.xpose.msra.mxu1 %v2775_v1  ;;  %5523 = vmatpush3.bf16.xpose.msra.mxu0 %v2864_v35  ;;  %v2953_v1 = vsel %vm2758_vm1, %v2735_v58, 0 }
 0x2f4   : > { %5741 = vmatprep.subr.msk.bf16.mxu1 %vm2758_vm1, %v2726_v43  ;;  %5745 = vmatprep.subr.msk.bf16.mxu0 %vm2758_vm1, %v2730_v8  ;;  %v2443_v62 = vpack.c.bf16 %v5922_v16, %v5917_v33  ;;  %v2439_v54 = vpack.c.bf16 %v5919_v40, %v5914_v57  ;;  %v2734_v43 = vpack.c.bf16 %v5867_v36, %v5862_v14 }
 0x2f5   : > { %v5923_v31 = vpop.trf.xlu1  ;;  %v2738_v8 = vpack.c.bf16 %v5870_v32, %v5865_v12 }
 0x2f6   : > { %v5927_v9 = vunpack.i.h.bf16 %v5923_v31  ;;  %v5924_v48 = vunpack.i.l.bf16 %v5923_v31  ;;  %v2950_v44 = vsel %vm2758_vm1, %v2734_v43, 0 }
 0x2f7   : > { %v3039_v11 = vsel %vm2758_vm1, %v2738_v8, 0 }
 0x2f9   : > { %v5928_v19 = vpop.trf.xlu1 }
 0x2fa   : > { %v5932_v59 = vunpack.i.h.bf16 %v5928_v19  ;;  %v5929_v26 = vunpack.i.l.bf16 %v5928_v19 }
 0x2fb   : > { %5509 = vmatpush3.bf16.xpose.msra.mxu1 %v2772_v42  ;;  %5525 = vmatpush3.bf16.xpose.msra.mxu0 %v2861_v21 }
 0x2fc   : > { %5746 = vmatprep.subr.msk.bf16.mxu1 %vm2758_vm1, %v2737_v60  ;;  %5750 = vmatprep.subr.msk.bf16.mxu0 %vm2758_vm1, %v2741_v2  ;;  %v2440_v52 = vpack.c.bf16 %v5929_v26, %v5924_v48  ;;  %v2444_v22 = vpack.c.bf16 %v5932_v59, %v5927_v9 }
 0x2fd   : > { %v5933_v18 = vpop.trf.xlu1 }
 0x2fe   : > { %v5937_v0 = vunpack.i.h.bf16 %v5933_v18  ;;  %v5934_v38 = vunpack.i.l.bf16 %v5933_v18 }
 0x301   : > { %v5938_v41 = vpop.trf.xlu1 }
 0x302   : > { %5511 = vmatmul.mubr.msk.bf16.vlgmr.msra.gmra.mxu1 %vm2758_vm1, %v2439_v54  ;;  %5527 = vmatmul.mubr.msk.bf16.vlgmr.msra.gmra.mxu0 %vm2758_vm1, %v2443_v62  ;;  %v5942_v4 = vunpack.i.h.bf16 %v5938_v41  ;;  %v5939_v7 = vunpack.i.l.bf16 %v5938_v41 }
 0x303   : > { %5535 = vmatpush3.bf16.xpose.msra.mxu1 %v2959_v24  ;;  %5551 = vmatpush3.bf16.xpose.msra.mxu0 %v3048_v34 }
 0x304   : > { %5747 = vmatprep.subr.msk.bf16.mxu1 %vm2758_vm1, %v2736_v46  ;;  %5751 = vmatprep.subr.msk.bf16.mxu0 %vm2758_vm1, %v2740_v49  ;;  %v2441_v56 = vpack.c.bf16 %v5939_v7, %v5934_v38  ;;  %v2445_v15 = vpack.c.bf16 %v5942_v4, %v5937_v0 }
 0x305   : > { %v1963_v10 = vpop.permute.xlu0 %1962  ;;  %5514 = vmatprep.mubr.msk.bf16.mxu1 %vm2758_vm1, %v2440_v52  ;;  %5530 = vmatprep.mubr.msk.bf16.mxu0 %vm2758_vm1, %v2444_v22  ;;  %v7794_v23 = vpop.trf.xlu1 }
 0x306   : > { %v2111_v61 = vadd.f32 %v7727_v3, %v1963_v10  ;;  %v2739_v3 = vpack.c.bf16 %v5880_v5, %v5875_v39 }
 0x308   : > { %v2153_v37 = vcombine.high %v2111_v61, %v2111_v61  ;;  %v3042_v35 = vsel %vm2758_vm1, %v2739_v3, 0 }
 0x309   : > { %v7800_v20 = vpop.trf.xlu1 }
 0x30a   : > { %v6111_v13 = vpack.i.bf16 %v2153_v37, %v2111_v61  ;;  %5515 = vmatmul.mubr.msk.bf16.gmra.mxu1 %vm2758_vm1, %v2441_v56  ;;  %5531 = vmatmul.mubr.msk.bf16.gmra.mxu0 %vm2758_vm1, %v2445_v15 }
 0x30b   : > { %5537 = vmatpush3.bf16.xpose.msra.mxu1 %v2956_v6  ;;  %5553 = vmatpush3.bf16.xpose.msra.mxu0 %v3045_v63 }
 0x30c   : > { %6112 = vxpose.xlu1.b32.start.end [1/1] (short) (narrow) %v6111_v13, 64  ;;  %5748 = vmatprep.subr.msk.bf16.mxu1 %vm2758_vm1, %v2735_v58 }
 0x30d   : > { %5752 = vmatprep.subr.msk.bf16.mxu0 %vm2758_vm1, %v2739_v3  ;;  %v7811_v47 = vpop.trf.xlu1 }
 0x30e   : > { %v5959_v39 = vunpack.i.h.bf16 %v7811_v47  ;;  %v5956_v5 = vunpack.i.l.bf16 %v7811_v47 }
 0x311   : > { %v7813_v25 = vpop.trf.xlu1 }
 0x312   : > { %v5964_v37 = vunpack.i.h.bf16 %v7813_v25  ;;  %v5961_v6 = vunpack.i.l.bf16 %v7813_v25 }
 0x313   : > { %5539 = vmatpush3.bf16.xpose.msra.mxu1 %v2953_v1  ;;  %5555 = vmatpush3.bf16.xpose.msra.mxu0 %v3042_v35 }
 0x314   : > { %5749 = vmatprep.subr.msk.bf16.mxu1 %vm2758_vm1, %v2734_v43  ;;  %5753 = vmatprep.subr.msk.bf16.mxu0 %vm2758_vm1, %v2738_v8  ;;  %v2743_v8 = vpack.c.bf16 %v5961_v6, %v5956_v5  ;;  %v2747_v1 = vpack.c.bf16 %v5964_v37, %v5959_v39 }
 0x315   : > { %v5965_v51 = vpop.trf.xlu1 }
 0x316   : > { %v5969_v26 = vunpack.i.h.bf16 %v5965_v51  ;;  %v5966_v18 = vunpack.i.l.bf16 %v5965_v51  ;;  %v5946_v51 = vunpack.i.l.bf16 %v7794_v23 }
 0x319   : > { %v5970_v29 = vpop.trf.xlu1 }
 0x31a   : > { %v5974_v54 = vunpack.i.h.bf16 %v5970_v29  ;;  %v5971_v24 = vunpack.i.l.bf16 %v5970_v29  ;;  %v5951_v29 = vunpack.i.l.bf16 %v7800_v20 }
 0x31b   : > { %5541 = vmatpush3.bf16.xpose.msra.mxu1 %v2950_v44  ;;  %5557 = vmatpush3.bf16.xpose.msra.mxu0 %v3039_v11 }
 0x31c   : > { %v2744_v52 = vpack.c.bf16 %v5971_v24, %v5966_v18  ;;  %v2748_v22 = vpack.c.bf16 %v5974_v54, %v5969_v26 }
 0x31d   : > { %v5975_v30 = vpop.trf.xlu1 }
 0x31e   : > { %v5979_v50 = vunpack.i.h.bf16 %v5975_v30  ;;  %v5976_v31 = vunpack.i.l.bf16 %v5975_v30  ;;  %v3134_v12 = vsel %vm2758_vm1, %v2744_v52, 0  ;;  %v3223_v14 = vsel %vm2758_vm1, %v2748_v22, 0 }
 0x321   : > { %v5980_v60 = vpop.trf.xlu1 }
 0x322   : > { %v5984_v2 = vunpack.i.h.bf16 %v5980_v60  ;;  %v5981_v33 = vunpack.i.l.bf16 %v5980_v60  ;;  %v5954_v60 = vunpack.i.h.bf16 %v7800_v20 }
 0x324   : > { %v5987_v57 = vpop.trf.xlu0  ;;  %v2745_v42 = vpack.c.bf16 %v5981_v33, %v5976_v31  ;;  %v2749_v21 = vpack.c.bf16 %v5984_v2, %v5979_v50  ;;  %v5949_v31 = vunpack.i.h.bf16 %v7794_v23 }
 0x325   : > { %v7821_v19 = vpop.trf.xlu1  ;;  %v5991_v16 = vunpack.i.h.bf16 %v5987_v57  ;;  %v5988_v40 = vunpack.i.l.bf16 %v5987_v57 }
 0x326   : > { %5754 = vmatprep.subr.msk.bf16.mxu1 %vm2758_vm1, %v2745_v42  ;;  %5758 = vmatprep.subr.msk.bf16.mxu0 %vm2758_vm1, %v2749_v21  ;;  %v3137_v28 = vsel %vm2758_vm1, %v2745_v42, 0  ;;  %v3226_v45 = vsel %vm2758_vm1, %v2749_v21, 0  ;;  %v1941_v42 = vld [vmem:[%s8828_s4 + $0x40] sm:$0xff]  ;;  %v2742_v21 = vpack.c.bf16 %v5951_v29, %v5946_v51  ;;  %v2746_v23 = vpack.c.bf16 %v5954_v60, %v5949_v31 }
 0x328   : > { %v5992_v55 = vpop.trf.xlu0 }
 0x329   : > { %v5996_v17 = vunpack.i.h.bf16 %v5992_v55  ;;  %v5993_v53 = vunpack.i.l.bf16 %v5992_v55  ;;  %v7825_v27 = vpop.trf.xlu1 }
 0x32a   : > { %v6038_v31 = vunpack.i.h.bf16 %v7825_v27  ;;  %v6035_v60 = vunpack.i.l.bf16 %v7825_v27 }
 0x32b   : > { %v2446_v9 = vpack.c.bf16 %v5993_v53, %v5988_v40  ;;  %v2450_v48 = vpack.c.bf16 %v5996_v17, %v5991_v16  ;;  %v3131_v16 = vsel %vm2758_vm1, %v2743_v8, 0  ;;  %v3220_v40 = vsel %vm2758_vm1, %v2747_v1, 0 }
 0x32c   : > { %v5997_v59 = vpop.trf.xlu0 }
 0x32d   : > { %5542 = vmatprep.mubr.msk.bf16.mxu1 %vm2758_vm1, %v2446_v9  ;;  %5558 = vmatprep.mubr.msk.bf16.mxu0 %vm2758_vm1, %v2450_v48  ;;  %v7829_v62 = vpop.trf.xlu1  ;;  %v6001_v34 = vunpack.i.h.bf16 %v5997_v59  ;;  %v5998_v46 = vunpack.i.l.bf16 %v5997_v59 }
 0x330   : > { %v6002_v49 = vpop.trf.xlu0 }
 0x331   : > { %v6006_v0 = vunpack.i.h.bf16 %v6002_v49  ;;  %v6003_v38 = vunpack.i.l.bf16 %v6002_v49  ;;  %v7831_v41 = vpop.trf.xlu1 }
 0x333   : > { %v2447_v4 = vpack.c.bf16 %v6003_v38, %v5998_v46  ;;  %v2451_v7 = vpack.c.bf16 %v6006_v0, %v6001_v34  ;;  %v3128_v0 = vsel %vm2758_vm1, %v2742_v21, 0  ;;  %v3217_v38 = vsel %vm2758_vm1, %v2746_v23, 0 }
 0x334   : > { %v6007_v10 = vpop.trf.xlu0 }
 0x335   : > { %5543 = vmatmul.mubr.msk.bf16.vlgmr.msra.gmra.mxu1 %vm2758_vm1, %v2447_v4  ;;  %5559 = vmatmul.mubr.msk.bf16.vlgmr.msra.gmra.mxu0 %vm2758_vm1, %v2451_v7  ;;  %v7837_v56 = vpop.trf.xlu1  ;;  %v6011_v61 = vunpack.i.h.bf16 %v6007_v10  ;;  %v6008_v15 = vunpack.i.l.bf16 %v6007_v10 }
 0x336   : > { %5567 = vmatpush3.bf16.xpose.msra.mxu1 %v3137_v28  ;;  %5583 = vmatpush3.bf16.xpose.msra.mxu0 %v3226_v45 }
 0x337   : > { %5755 = vmatprep.subr.msk.bf16.mxu1 %vm2758_vm1, %v2744_v52  ;;  %5759 = vmatprep.subr.msk.bf16.mxu0 %vm2758_vm1, %v2748_v22  ;;  %v6053_v52 = vunpack.i.h.bf16 %v7837_v56  ;;  %v6050_v22 = vunpack.i.l.bf16 %v7837_v56 }
 0x338   : > { %v6012_v58 = vpop.trf.xlu0 }
 0x339   : > { %v6016_v13 = vunpack.i.h.bf16 %v6012_v58  ;;  %v6013_v63 = vunpack.i.l.bf16 %v6012_v58  ;;  %v7845_v3 = vpop.trf.xlu1 }
 0x33a   : > { %v6058_v4 = vunpack.i.h.bf16 %v7845_v3  ;;  %v6055_v7 = vunpack.i.l.bf16 %v7845_v3  ;;  %v6040_v3 = vunpack.i.l.bf16 %v7829_v62 }
 0x33b   : > { %v2448_v32 = vpack.c.bf16 %v6013_v63, %v6008_v15  ;;  %v2452_v36 = vpack.c.bf16 %v6016_v13, %v6011_v61  ;;  %v6043_v63 = vunpack.i.h.bf16 %v7829_v62 }
 0x33c   : > { %v6017_v43 = vpop.trf.xlu0  ;;  %v2752_v39 = vpack.c.bf16 %v6055_v7, %v6050_v22  ;;  %v2756_v5 = vpack.c.bf16 %v6058_v4, %v6053_v52 }
 0x33d   : > { %5546 = vmatprep.mubr.msk.bf16.mxu1 %vm2758_vm1, %v2448_v32  ;;  %5562 = vmatprep.mubr.msk.bf16.mxu0 %vm2758_vm1, %v2452_v36  ;;  %v6059_v47 = vpop.trf.xlu1  ;;  %v6021_v25 = vunpack.i.h.bf16 %v6017_v43  ;;  %v6018_v35 = vunpack.i.l.bf16 %v6017_v43 }
 0x33e   : > { %5569 = vmatpush3.bf16.xpose.msra.mxu1 %v3134_v12  ;;  %5585 = vmatpush3.bf16.xpose.msra.mxu0 %v3223_v14  ;;  %v6063_v20 = vunpack.i.h.bf16 %v6059_v47  ;;  %v6060_v55 = vunpack.i.l.bf16 %v6059_v47  ;;  %v6048_v12 = vunpack.i.h.bf16 %v7831_v41  ;;  %v6045_v14 = vunpack.i.l.bf16 %v7831_v41 }
 0x33f   : > { %5756 = vmatprep.subr.msk.bf16.mxu1 %vm2758_vm1, %v2743_v8  ;;  %5760 = vmatprep.subr.msk.bf16.mxu0 %vm2758_vm1, %v2747_v1  ;;  %v3401_v62 = vsel %vm2758_vm1, %v2756_v5, 0 }
 0x340   : > { %v6022_v44 = vpop.trf.xlu0  ;;  %v2751_v47 = vpack.c.bf16 %v6045_v14, %v6040_v3  ;;  %v7912_v3 = vpop.f32.mrf.mxu0 }
 0x341   : > { %v6026_v11 = vunpack.i.h.bf16 %v6022_v44  ;;  %v6023_v30 = vunpack.i.l.bf16 %v6022_v44  ;;  %v6064_v50 = vpop.trf.xlu1  ;;  %8877 = vst [vmem:[#allocation5_spill] sm:$0xff] %v7912_v3 }
 0x342   : > { %v6068_v9 = vunpack.i.h.bf16 %v6064_v50  ;;  %v6065_v48 = vunpack.i.l.bf16 %v6064_v50  ;;  %v6030_v50 = vunpack.i.l.bf16 %v7821_v19 }
 0x343   : > { %v2449_v2 = vpack.c.bf16 %v6023_v30, %v6018_v35  ;;  %v2453_v33 = vpack.c.bf16 %v6026_v11, %v6021_v25  ;;  %v2755_v25 = vpack.c.bf16 %v6048_v12, %v6043_v63  ;;  %v3312_v35 = vsel %vm2758_vm1, %v2752_v39, 0  ;;  %v7914_v12 = vpop.f32.mrf.mxu0 }
 0x344   : > { %v6071_v57 = vpop.trf.xlu0  ;;  %v2753_v34 = vpack.c.bf16 %v6065_v48, %v6060_v55  ;;  %v2757_v46 = vpack.c.bf16 %v6068_v9, %v6063_v20  ;;  %v6033_v30 = vunpack.i.h.bf16 %v7821_v19  ;;  %8878 = vst [vmem:[#allocation6_spill] sm:$0xff] %v7914_v12 }
 0x345   : > { %5547 = vmatmul.mubr.msk.bf16.gmra.mxu1 %vm2758_vm1, %v2449_v2  ;;  %5563 = vmatmul.mubr.msk.bf16.gmra.mxu0 %vm2758_vm1, %v2453_v33  ;;  %v6075_v17 = vunpack.i.h.bf16 %v6071_v57  ;;  %v6072_v53 = vunpack.i.l.bf16 %v6071_v57  ;;  %v7916_v14 = vpop.f32.mrf.mxu0 }
 0x346   : > { %5571 = vmatpush3.bf16.xpose.msra.mxu1 %v3131_v16  ;;  %5587 = vmatpush3.bf16.xpose.msra.mxu0 %v3220_v40  ;;  %v3315_v56 = vsel %vm2758_vm1, %v2753_v34, 0  ;;  %v3404_v58 = vsel %vm2758_vm1, %v2757_v46, 0  ;;  %v3398_v16 = vsel %vm2758_vm1, %v2755_v25, 0  ;;  %v2754_v20 = vpack.c.bf16 %v6038_v31, %v6033_v30  ;;  %8879 = vst [vmem:[#allocation7_spill] sm:$0xff] %v7916_v14 }
 0x347   : > { %1987 = vperm.xlu1 %5816, %v1941_v42   ;;  %5757 = vmatprep.subr.msk.bf16.mxu1 %vm2758_vm1, %v2742_v21  ;;  %v3309_v21 = vsel %vm2758_vm1, %v2751_v47, 0 }
 0x348   : > { %5761 = vmatprep.subr.msk.bf16.mxu0 %vm2758_vm1, %v2746_v23  ;;  %v6076_v59 = vpop.trf.xlu0  ;;  %v2750_v23 = vpack.c.bf16 %v6035_v60, %v6030_v50  ;;  %v3395_v27 = vsel %vm2758_vm1, %v2754_v20, 0 }
 0x349   : > { %v6080_v26 = vunpack.i.h.bf16 %v6076_v59  ;;  %v6077_v18 = vunpack.i.l.bf16 %v6076_v59 }
 0x34a   : > { %v3306_v19 = vsel %vm2758_vm1, %v2750_v23, 0 }
 0x34b   : > { %v2454_v54 = vpack.c.bf16 %v6077_v18, %v6072_v53  ;;  %v2458_v24 = vpack.c.bf16 %v6080_v26, %v6075_v17 }
 0x34c   : > { %v6081_v49 = vpop.trf.xlu0 }
 0x34d   : > { %5574 = vmatprep.mubr.msk.bf16.mxu1 %vm2758_vm1, %v2454_v54  ;;  %5590 = vmatprep.mubr.msk.bf16.mxu0 %vm2758_vm1, %v2458_v24  ;;  %v6085_v28 = vunpack.i.h.bf16 %v6081_v49  ;;  %v6082_v45 = vunpack.i.l.bf16 %v6081_v49 }
 0x34e   : > { %5573 = vmatpush3.bf16.xpose.msra.mxu1 %v3128_v0  ;;  %5589 = vmatpush3.bf16.xpose.msra.mxu0 %v3217_v38 }
 0x34f   : > { %5762 = vmatprep.subr.msk.bf16.mxu1 %vm2758_vm1, %v2753_v34  ;;  %5766 = vmatprep.subr.msk.bf16.mxu0 %vm2758_vm1, %v2757_v46 }
 0x350   : > { %v6086_v10 = vpop.trf.xlu0 }
 0x351   : > { %v6090_v61 = vunpack.i.h.bf16 %v6086_v10  ;;  %v6087_v15 = vunpack.i.l.bf16 %v6086_v10 }
 0x353   : > { %v2455_v37 = vpack.c.bf16 %v6087_v15, %v6082_v45  ;;  %v2459_v6 = vpack.c.bf16 %v6090_v61, %v6085_v28 }
 0x354   : > { %v6091_v13 = vpop.trf.xlu0 }
 0x355   : > { %5575 = vmatmul.mubr.msk.bf16.vlgmr.msra.gmra.mxu1 %vm2758_vm1, %v2455_v37  ;;  %5591 = vmatmul.mubr.msk.bf16.vlgmr.msra.gmra.mxu0 %vm2758_vm1, %v2459_v6  ;;  %v6095_v32 = vunpack.i.h.bf16 %v6091_v13  ;;  %v6092_v36 = vunpack.i.l.bf16 %v6091_v13 }
 0x356   : > { %5599 = vmatpush3.bf16.xpose.msra.mxu1 %v3315_v56  ;;  %5615 = vmatpush3.bf16.xpose.msra.mxu0 %v3404_v58 }
 0x357   : > { %5763 = vmatprep.subr.msk.bf16.mxu1 %vm2758_vm1, %v2752_v39  ;;  %5767 = vmatprep.subr.msk.bf16.mxu0 %vm2758_vm1, %v2756_v5 }
 0x358   : > { %v6096_v43 = vpop.trf.xlu0 }
 0x359   : > { %v6100_v8 = vunpack.i.h.bf16 %v6096_v43  ;;  %v6097_v1 = vunpack.i.l.bf16 %v6096_v43 }
 0x35b   : > { %v2456_v51 = vpack.c.bf16 %v6097_v1, %v6092_v36  ;;  %v2460_v29 = vpack.c.bf16 %v6100_v8, %v6095_v32  ;;  %v7918_v32 = vpop.f32.mrf.mxu0 }
 0x35c   : > { %v6101_v41 = vpop.trf.xlu0  ;;  %8880 = vst [vmem:[#allocation8_spill] sm:$0xff] %v7918_v32 }
 0x35d   : > { %5578 = vmatprep.mubr.msk.bf16.mxu1 %vm2758_vm1, %v2456_v51  ;;  %5594 = vmatprep.mubr.msk.bf16.mxu0 %vm2758_vm1, %v2460_v29  ;;  %v6105_v44 = vunpack.i.h.bf16 %v6101_v41  ;;  %v6102_v11 = vunpack.i.l.bf16 %v6101_v41 }
 0x35e   : > { %5601 = vmatpush3.bf16.xpose.msra.mxu1 %v3312_v35  ;;  %5617 = vmatpush3.bf16.xpose.msra.mxu0 %v3401_v62 }
 0x35f   : > { %5764 = vmatprep.subr.msk.bf16.mxu1 %vm2758_vm1, %v2751_v47  ;;  %5768 = vmatprep.subr.msk.bf16.mxu0 %vm2758_vm1, %v2755_v25 }
 0x360   : > { %v6106_v2 = vpop.trf.xlu0 }
 0x361   : > { %v6110_v33 = vunpack.i.h.bf16 %v6106_v2  ;;  %v6107_v57 = vunpack.i.l.bf16 %v6106_v2 }
 0x363   : > { %v2457_v42 = vpack.c.bf16 %v6107_v57, %v6102_v11  ;;  %v2461_v40 = vpack.c.bf16 %v6110_v33, %v6105_v44 }
 0x365   : > { %5579 = vmatmul.mubr.msk.bf16.gmra.mxu1 %vm2758_vm1, %v2457_v42  ;;  %5595 = vmatmul.mubr.msk.bf16.gmra.mxu0 %vm2758_vm1, %v2461_v40 }
 0x366   : > { %5603 = vmatpush3.bf16.xpose.msra.mxu1 %v3309_v21  ;;  %5619 = vmatpush3.bf16.xpose.msra.mxu0 %v3398_v16 }
 0x367   : > { %5765 = vmatprep.subr.msk.bf16.mxu1 %vm2758_vm1, %v2750_v23  ;;  %5769 = vmatprep.subr.msk.bf16.mxu0 %vm2758_vm1, %v2754_v20 }
 0x36e   : > { %5605 = vmatpush3.bf16.xpose.msra.mxu1 %v3306_v19  ;;  %5621 = vmatpush3.bf16.xpose.msra.mxu0 %v3395_v27 }
 0x388   : > { %v6113_v55 = vpop.trf.xlu1 }
 0x389   : > { %v6117_v17 = vunpack.i.h.bf16 %v6113_v55  ;;  %v6114_v53 = vunpack.i.l.bf16 %v6113_v55 }
 0x38c   : > { %v6118_v9 = vpop.trf.xlu1 }
 0x38d   : > { %v6122_v48 = vunpack.i.h.bf16 %v6118_v9  ;;  %v6119_v59 = vunpack.i.l.bf16 %v6118_v9 }
 0x38f   : > { %v2462_v26 = vpack.c.bf16 %v6119_v59, %v6114_v53  ;;  %v2466_v18 = vpack.c.bf16 %v6122_v48, %v6117_v17 }
 0x390   : > { %v6123_v54 = vpop.trf.xlu1 }
 0x391   : > { %5606 = vmatprep.mubr.msk.bf16.mxu1 %vm2758_vm1, %v2462_v26  ;;  %5622 = vmatprep.mubr.msk.bf16.mxu0 %vm2758_vm1, %v2466_v18  ;;  %v6127_v24 = vunpack.i.h.bf16 %v6123_v54  ;;  %v6124_v34 = vunpack.i.l.bf16 %v6123_v54 }
 0x394   : > { %v6128_v46 = vpop.trf.xlu1 }
 0x395   : > { %v6132_v49 = vunpack.i.h.bf16 %v6128_v46  ;;  %v6129_v0 = vunpack.i.l.bf16 %v6128_v46 }
 0x397   : > { %v2463_v38 = vpack.c.bf16 %v6129_v0, %v6124_v34  ;;  %v2467_v52 = vpack.c.bf16 %v6132_v49, %v6127_v24 }
 0x398   : > { %v6133_v22 = vpop.trf.xlu1 }
 0x399   : > { %5607 = vmatmul.mubr.msk.bf16.vlgmr.msra.gmra.mxu1 %vm2758_vm1, %v2463_v38  ;;  %5623 = vmatmul.mubr.msk.bf16.vlgmr.msra.gmra.mxu0 %vm2758_vm1, %v2467_v52  ;;  %v6137_v4 = vunpack.i.h.bf16 %v6133_v22  ;;  %v6134_v7 = vunpack.i.l.bf16 %v6133_v22 }
 0x39c   : > { %v6138_v28 = vpop.trf.xlu1 }
 0x39d   : > { %v6142_v45 = vunpack.i.h.bf16 %v6138_v28  ;;  %v6139_v10 = vunpack.i.l.bf16 %v6138_v28 }
 0x39f   : > { %v2464_v61 = vpack.c.bf16 %v6139_v10, %v6134_v7  ;;  %v2468_v15 = vpack.c.bf16 %v6142_v45, %v6137_v4 }
 0x3a0   : > { %v6143_v39 = vpop.trf.xlu1 }
 0x3a1   : > { %5610 = vmatprep.mubr.msk.bf16.mxu1 %vm2758_vm1, %v2464_v61  ;;  %5626 = vmatprep.mubr.msk.bf16.mxu0 %vm2758_vm1, %v2468_v15  ;;  %v6147_v5 = vunpack.i.h.bf16 %v6143_v39  ;;  %v6144_v37 = vunpack.i.l.bf16 %v6143_v39 }
 0x3a4   : > { %v6148_v6 = vpop.trf.xlu1 }
 0x3a5   : > { %v6152_v56 = vunpack.i.h.bf16 %v6148_v6  ;;  %v6149_v58 = vunpack.i.l.bf16 %v6148_v6 }
 0x3a7   : > { %v2465_v13 = vpack.c.bf16 %v6149_v58, %v6144_v37  ;;  %v2469_v63 = vpack.c.bf16 %v6152_v56, %v6147_v5 }
 0x3a9   : > { %5611 = vmatmul.mubr.msk.bf16.gmra.mxu1 %vm2758_vm1, %v2465_v13  ;;  %5627 = vmatmul.mubr.msk.bf16.gmra.mxu0 %vm2758_vm1, %v2469_v63 }
 0x3c2   : > { %v5512_v36 = vpop.f32.mrf.mxu1  ;;  %v5528_v8 = vpop.f32.mrf.mxu0 }
 0x3c3   : > { %v7920_v43 = vmul.f32 0.5, %v5512_v36  ;;  %v7922_v47 = vmul.f32 0.5, %v5528_v8 }
 0x3c4   : > { %v2817_v1 = vpop.f32.mrf.mxu1  ;;  %v2906_v35 = vpop.f32.mrf.mxu0 }
 0x3c5   : > { %v3542_v25 = vsel %vm3535_vm2, %v7920_v43, -inf  ;;  %v7926_v51 = vmul.f32 0.5, %v2817_v1  ;;  %v3566_v44 = vsel %vm3535_vm2, %v7922_v47, -inf  ;;  %v7936_v60 = vmul.f32 0.5, %v2906_v35 }
 0x3c6   : > { %3543 = vmax.xlane.f32.xlu1 %v3542_v25  ;;  %v5513_v62 = vpop.f32.mrf.mxu1  ;;  %v5529_v41 = vpop.f32.mrf.mxu0 }
 0x3c7   : > { %v7928_v29 = vmul.f32 0.5, %v5513_v62  ;;  %v7932_v11 = vmul.f32 0.5, %v5529_v41  ;;  %v3536_v2 = vsel %vm3535_vm2, %v7926_v51, -inf  ;;  %v3560_v40 = vsel %vm3535_vm2, %v7936_v60, -inf }
 0x3c8   : > { %v2820_v30 = vpop.f32.mrf.mxu1  ;;  %v2909_v31 = vpop.f32.mrf.mxu0 }
 0x3c9   : > { %v3545_v50 = vsel %vm3535_vm2, %v7928_v29, -inf  ;;  %v3569_v33 = vsel %vm3535_vm2, %v7932_v11, -inf  ;;  %v7942_v57 = vmul.f32 0.5, %v2820_v30  ;;  %v7958_v59 = vmul.f32 0.5, %v2909_v31 }
 0x3ca   : > { %3567 = vmax.xlane.f32.xlu1 %v3566_v44  ;;  %3546 = vmax.xlane.f32.xlu0 %v3545_v50  ;;  %v5532_v42 = vpop.f32.mrf.mxu0  ;;  %v5516_v21 = vpop.f32.mrf.mxu1 }
 0x3cb   : > { %v7944_v16 = vmul.f32 0.5, %v5532_v42  ;;  %v3539_v23 = vsel %vm3535_vm2, %v7942_v57, -inf  ;;  %v7950_v20 = vmul.f32 0.5, %v5516_v21  ;;  %v3563_v34 = vsel %vm3535_vm2, %v7958_v59, -inf }
 0x3cc   : > { %v2833_v19 = vpop.f32.mrf.mxu1  ;;  %v2922_v27 = vpop.f32.mrf.mxu0 }
 0x3cd   : > { %v3578_v55 = vsel %vm3535_vm2, %v7944_v16, -inf  ;;  %v3554_v17 = vsel %vm3535_vm2, %v7950_v20, -inf  ;;  %v7956_v53 = vmul.f32 0.5, %v2833_v19  ;;  %v7968_v46 = vmul.f32 0.5, %v2922_v27 }
 0x3ce   : > { %3537 = vmax.xlane.f32.xlu1 %v3536_v2  ;;  %3570 = vmax.xlane.f32.xlu0 %v3569_v33  ;;  %v5533_v9 = vpop.f32.mrf.mxu0  ;;  %v5517_v48 = vpop.f32.mrf.mxu1 }
 0x3cf   : > { %v7960_v26 = vmul.f32 0.5, %v5533_v9  ;;  %v3548_v18 = vsel %vm3535_vm2, %v7956_v53, -inf  ;;  %v7964_v54 = vmul.f32 0.5, %v5517_v48  ;;  %v3572_v4 = vsel %vm3535_vm2, %v7968_v46, -inf }
 0x3d0   : > { %v2836_v24 = vpop.f32.mrf.mxu1  ;;  %v2925_v52 = vpop.f32.mrf.mxu0 }
 0x3d1   : > { %v3581_v49 = vsel %vm3535_vm2, %v7960_v26, -inf  ;;  %v3557_v0 = vsel %vm3535_vm2, %v7964_v54, -inf  ;;  %v7974_v38 = vmul.f32 0.5, %v2836_v24  ;;  %v7976_v22 = vmul.f32 0.5, %v2925_v52 }
 0x3d2   : > { %3561 = vmax.xlane.f32.xlu1 %v3560_v40  ;;  %3540 = vmax.xlane.f32.xlu0 %v3539_v23 }
 0x3d3   : > { %v3551_v7 = vsel %vm3535_vm2, %v7974_v38, -inf  ;;  %v3575_v28 = vsel %vm3535_vm2, %v7976_v22, -inf }
 0x3d6   : > { %3579 = vmax.xlane.f32.xlu1 %v3578_v55  ;;  %3555 = vmax.xlane.f32.xlu0 %v3554_v17 }
 0x3da   : > { %3564 = vmax.xlane.f32.xlu0 %v3563_v34  ;;  %3549 = vmax.xlane.f32.xlu1 %v3548_v18 }
 0x3de   : > { %3582 = vmax.xlane.f32.xlu0 %v3581_v49  ;;  %3558 = vmax.xlane.f32.xlu1 %v3557_v0 }
 0x3e2   : > { %3573 = vmax.xlane.f32.xlu1 %v3572_v4  ;;  %3552 = vmax.xlane.f32.xlu0 %v3551_v7 }
 0x3e6   : > { %3576 = vmax.xlane.f32.xlu0 %v3575_v28 }
 0x3f5   : > { %v5544_v45 = vpop.f32.mrf.mxu1  ;;  %v5560_v10 = vpop.f32.mrf.mxu0 }
 0x3f6   : > { %v7984_v61 = vmul.f32 0.5, %v5544_v45  ;;  %v7986_v5 = vmul.f32 0.5, %v5560_v10 }
 0x3f7   : > { %v2995_v15 = vpop.f32.mrf.mxu1  ;;  %v3084_v39 = vpop.f32.mrf.mxu0 }
 0x3f8   : > { %v3590_v37 = vsel %vm3535_vm2, %v7984_v61, -inf  ;;  %v7992_v13 = vmul.f32 0.5, %v2995_v15  ;;  %v3614_v36 = vsel %vm3535_vm2, %v7986_v5, -inf  ;;  %v8000_v25 = vmul.f32 0.5, %v3084_v39 }
 0x3f9   : > { %v5561_v6 = vpop.f32.mrf.mxu0  ;;  %3591 = vmax.xlane.f32.xlu1 %v3590_v37  ;;  %v5545_v56 = vpop.f32.mrf.mxu1 }
 0x3fa   : > { %v7990_v58 = vmul.f32 0.5, %v5545_v56  ;;  %v7994_v63 = vmul.f32 0.5, %v5561_v6  ;;  %v3584_v62 = vsel %vm3535_vm2, %v7992_v13, -inf  ;;  %v3608_v50 = vsel %vm3535_vm2, %v8000_v25, -inf }
 0x3fb   : > { %v2998_v1 = vpop.f32.mrf.mxu1  ;;  %v3087_v44 = vpop.f32.mrf.mxu0 }
 0x3fc   : > { %v3593_v8 = vsel %vm3535_vm2, %v7990_v58, -inf  ;;  %v8002_v35 = vmul.f32 0.5, %v2998_v1  ;;  %v3617_v41 = vsel %vm3535_vm2, %v7994_v63, -inf  ;;  %v8008_v30 = vmul.f32 0.5, %v3087_v44 }
 0x3fd   : > { %3615 = vmax.xlane.f32.xlu1 %v3614_v36  ;;  %3594 = vmax.xlane.f32.xlu0 %v3593_v8 }
 0x3fe   : > { %v3587_v31 = vsel %vm3535_vm2, %v8002_v35, -inf  ;;  %v3611_v19 = vsel %vm3535_vm2, %v8008_v30, -inf }
 0x401   : > { %3585 = vmax.xlane.f32.xlu1 %v3584_v62  ;;  %3618 = vmax.xlane.f32.xlu0 %v3617_v41 }
 0x405   : > { %3609 = vmax.xlane.f32.xlu1 %v3608_v50  ;;  %3588 = vmax.xlane.f32.xlu0 %v3587_v31  ;;  %v5548_v2 = vpop.f32.mrf.mxu1  ;;  %v5564_v33 = vpop.f32.mrf.mxu0 }
 0x406   : > { %v8014_v42 = vmul.f32 0.5, %v5548_v2  ;;  %v8016_v21 = vmul.f32 0.5, %v5564_v33 }
 0x407   : > { %v3011_v40 = vpop.f32.mrf.mxu1  ;;  %v3100_v23 = vpop.f32.mrf.mxu0 }
 0x408   : > { %v3602_v27 = vsel %vm3535_vm2, %v8014_v42, -inf  ;;  %v8022_v9 = vmul.f32 0.5, %v3011_v40  ;;  %v3626_v24 = vsel %vm3535_vm2, %v8016_v21, -inf  ;;  %v8032_v0 = vmul.f32 0.5, %v3100_v23 }
 0x409   : > { %3612 = vmax.xlane.f32.xlu0 %v3611_v19  ;;  %3603 = vmax.xlane.f32.xlu1 %v3602_v27  ;;  %v5549_v55 = vpop.f32.mrf.mxu1  ;;  %v5565_v17 = vpop.f32.mrf.mxu0 }
 0x40a   : > { %v8024_v48 = vmul.f32 0.5, %v5549_v55  ;;  %v8026_v18 = vmul.f32 0.5, %v5565_v17  ;;  %v3596_v4 = vsel %vm3535_vm2, %v8022_v9, -inf  ;;  %v3620_v45 = vsel %vm3535_vm2, %v8032_v0, -inf }
 0x40b   : > { %v3014_v34 = vpop.f32.mrf.mxu1  ;;  %v3103_v28 = vpop.f32.mrf.mxu0 }
 0x40c   : > { %v3605_v49 = vsel %vm3535_vm2, %v8024_v48, -inf  ;;  %v8034_v52 = vmul.f32 0.5, %v3014_v34  ;;  %v3629_v7 = vsel %vm3535_vm2, %v8026_v18, -inf  ;;  %v8044_v15 = vmul.f32 0.5, %v3103_v28 }
 0x40d   : > { %3627 = vmax.xlane.f32.xlu1 %v3626_v24  ;;  %3606 = vmax.xlane.f32.xlu0 %v3605_v49 }
 0x40e   : > { %v3599_v10 = vsel %vm3535_vm2, %v8034_v52, -inf  ;;  %v3623_v1 = vsel %vm3535_vm2, %v8044_v15, -inf }
 0x411   : > { %3597 = vmax.xlane.f32.xlu1 %v3596_v4  ;;  %3630 = vmax.xlane.f32.xlu0 %v3629_v7 }
 0x415   : > { %3621 = vmax.xlane.f32.xlu1 %v3620_v45  ;;  %3600 = vmax.xlane.f32.xlu0 %v3599_v10  ;;  %v5576_v39 = vpop.f32.mrf.mxu1  ;;  %v5592_v37 = vpop.f32.mrf.mxu0 }
 0x416   : > { %v8046_v6 = vmul.f32 0.5, %v5576_v39  ;;  %v8048_v56 = vmul.f32 0.5, %v5592_v37 }
 0x417   : > { %v3173_v36 = vpop.f32.mrf.mxu1  ;;  %v3262_v8 = vpop.f32.mrf.mxu0 }
 0x418   : > { %v3638_v62 = vsel %vm3535_vm2, %v8046_v6, -inf  ;;  %v8054_v50 = vmul.f32 0.5, %v3173_v36  ;;  %v3662_v33 = vsel %vm3535_vm2, %v8048_v56, -inf  ;;  %v8064_v19 = vmul.f32 0.5, %v3262_v8 }
 0x419   : > { %3624 = vmax.xlane.f32.xlu0 %v3623_v1  ;;  %3639 = vmax.xlane.f32.xlu1 %v3638_v62  ;;  %v5577_v41 = vpop.f32.mrf.mxu1  ;;  %v5593_v44 = vpop.f32.mrf.mxu0 }
 0x41a   : > { %v8056_v31 = vmul.f32 0.5, %v5577_v41  ;;  %v8058_v2 = vmul.f32 0.5, %v5593_v44  ;;  %v3632_v27 = vsel %vm3535_vm2, %v8054_v50, -inf  ;;  %v3656_v49 = vsel %vm3535_vm2, %v8064_v19, -inf }
 0x41b   : > { %v3176_v40 = vpop.f32.mrf.mxu1  ;;  %v3265_v24 = vpop.f32.mrf.mxu0 }
 0x41c   : > { %v3641_v23 = vsel %vm3535_vm2, %v8056_v31, -inf  ;;  %v3665_v55 = vsel %vm3535_vm2, %v8058_v2, -inf  ;;  %v8070_v17 = vmul.f32 0.5, %v3176_v40  ;;  %v8072_v34 = vmul.f32 0.5, %v3265_v24 }
 0x41d   : > { %3663 = vmax.xlane.f32.xlu1 %v3662_v33  ;;  %3642 = vmax.xlane.f32.xlu0 %v3641_v23 }
 0x41e   : > { %v3635_v4 = vsel %vm3535_vm2, %v8070_v17, -inf  ;;  %v3659_v39 = vsel %vm3535_vm2, %v8072_v34, -inf }
 0x421   : > { %3633 = vmax.xlane.f32.xlu1 %v3632_v27  ;;  %3666 = vmax.xlane.f32.xlu0 %v3665_v55 }
 0x425   : > { %3657 = vmax.xlane.f32.xlu1 %v3656_v49  ;;  %3636 = vmax.xlane.f32.xlu0 %v3635_v4  ;;  %v5580_v7 = vpop.f32.mrf.mxu1  ;;  %v5596_v28 = vpop.f32.mrf.mxu0 }
 0x426   : > { %v8078_v45 = vmul.f32 0.5, %v5580_v7  ;;  %v8080_v10 = vmul.f32 0.5, %v5596_v28 }
 0x427   : > { %v3189_v37 = vpop.f32.mrf.mxu1  ;;  %v3278_v36 = vpop.f32.mrf.mxu0 }
 0x428   : > { %v3650_v8 = vsel %vm3535_vm2, %v8078_v45, -inf  ;;  %v8086_v41 = vmul.f32 0.5, %v3189_v37  ;;  %v3674_v40 = vsel %vm3535_vm2, %v8080_v10, -inf  ;;  %v8096_v55 = vmul.f32 0.5, %v3278_v36 }
 0x429   : > { %3660 = vmax.xlane.f32.xlu0 %v3659_v39  ;;  %3651 = vmax.xlane.f32.xlu1 %v3650_v8  ;;  %v5581_v1 = vpop.f32.mrf.mxu1  ;;  %v5597_v62 = vpop.f32.mrf.mxu0 }
 0x42a   : > { %v8088_v44 = vmul.f32 0.5, %v5581_v1  ;;  %v8090_v33 = vmul.f32 0.5, %v5597_v62  ;;  %8882 = vst [vmem:[#allocation10_spill] sm:$0xff] %v8096_v55  ;;  %v3644_v24 = vsel %vm3535_vm2, %v8086_v41, -inf  ;;  %v3668_v39 = vsel %vm3535_vm2, %v8096_v55, -inf  ;;  %v8112_v8 = vpop.permute.xlu1 %1987 }
 0x42b   : > { %v3192_v23 = vpop.f32.mrf.mxu1  ;;  %v3281_v7 = vpop.f32.mrf.mxu0  ;;  %8885 = vst [vmem:[#allocation13_spill] sm:$0xff] %v8112_v8 }
 0x42c   : > { %8881 = vst [vmem:[#allocation9_spill] sm:$0xff] %v8090_v33  ;;  %v3653_v27 = vsel %vm3535_vm2, %v8088_v44, -inf  ;;  %v3677_v49 = vsel %vm3535_vm2, %v8090_v33, -inf  ;;  %v8102_v4 = vmul.f32 0.5, %v3192_v23  ;;  %v8104_v28 = vmul.f32 0.5, %v3281_v7 }
 0x42d   : > { %3675 = vmax.xlane.f32.xlu1 %v3674_v40  ;;  %3654 = vmax.xlane.f32.xlu0 %v3653_v27 }
 0x42e   : > { %8883 = vst [vmem:[#allocation11_spill] sm:$0xff] %v8102_v4  ;;  %8884 = vst [vmem:[#allocation12_spill] sm:$0xff] %v8104_v28  ;;  %v3647_v37 = vsel %vm3535_vm2, %v8102_v4, -inf  ;;  %v3671_v36 = vsel %vm3535_vm2, %v8104_v28, -inf }
 0x431   : > { %3645 = vmax.xlane.f32.xlu1 %v3644_v24  ;;  %3678 = vmax.xlane.f32.xlu0 %v3677_v49 }
 0x435   : > { %3669 = vmax.xlane.f32.xlu1 %v3668_v39  ;;  %3648 = vmax.xlane.f32.xlu0 %v3647_v37 }
 0x439   : > { %3672 = vmax.xlane.f32.xlu0 %v3671_v36 }
 0x44f   : > { %v3544_v1 = vpop.xlane.xlu1 %3543 }
 0x453   : > { %v3568_v62 = vpop.xlane.xlu1 %3567  ;;  %v3547_v40 = vpop.xlane.xlu0 %3546 }
 0x457   : > { %v3538_v7 = vpop.xlane.xlu1 %3537  ;;  %v3571_v37 = vpop.xlane.xlu0 %3570 }
 0x459   : > { %v5608_v23 = vpop.f32.mrf.mxu1  ;;  %v5624_v27 = vpop.f32.mrf.mxu0 }
 0x45a   : > { %v8114_v24 = vmul.f32 0.5, %v5608_v23  ;;  %v8116_v14 = vmul.f32 0.5, %v5624_v27 }
 0x45b   : > { %v3440_v49 = vpop.f32.mrf.mxu0  ;;  %v3351_v3 = vpop.f32.mrf.mxu1 }
 0x45c   : > { %8886 = vst [vmem:[#allocation14_spill] sm:$0xff] %v8114_v24  ;;  %8887 = vst [vmem:[#allocation15_spill] sm:$0xff] %v8116_v14  ;;  %v3686_v39 = vsel %vm3535_vm2, %v8114_v24, -inf  ;;  %v8122_v8 = vmul.f32 0.5, %v3351_v3  ;;  %v3710_v23 = vsel %vm3535_vm2, %v8116_v14, -inf  ;;  %v3562_v4 = vpop.xlane.xlu1 %3561  ;;  %v8131_v24 = vmul.f32 0.5, %v3440_v49 }
 0x45d   : > { %3687 = vmax.xlane.f32.xlu1 %v3686_v39  ;;  %v5625_v36 = vpop.f32.mrf.mxu0  ;;  %v5609_v32 = vpop.f32.mrf.mxu1  ;;  %v3730_v39 = vsub.f32 %v7920_v43, %v3544_v1  ;;  %v3738_v14 = vsub.f32 %v7922_v47, %v3568_v62  ;;  %v3731_v1 = vsub.f32 %v7928_v29, %v3547_v40  ;;  %v3728_v47 = vsub.f32 %v7926_v51, %v3538_v7 }
 0x45e   : > { %v8120_v12 = vmul.f32 0.5, %v5609_v32  ;;  %8889 = vst [vmem:[#allocation17_spill] sm:$0xff] %v8122_v8  ;;  %v8126_v28 = vmul.f32 0.5, %v5625_v36  ;;  %8891 = vst [vmem:[#allocation19_spill] sm:$0xff] %v8131_v24  ;;  %v3541_v32 = vpop.xlane.xlu0 %3540  ;;  %v3680_v3 = vsel %vm3535_vm2, %v8122_v8, -inf  ;;  %v3704_v43 = vsel %vm3535_vm2, %v8131_v24, -inf }
 0x45f   : > { %v3354_v33 = vpop.f32.mrf.mxu1  ;;  %v3792_v51 = vmul.f32 1.442695, %v3728_v47 }
 0x460   : > { %8888 = vst [vmem:[#allocation16_spill] sm:$0xff] %v8120_v12  ;;  %8890 = vst [vmem:[#allocation18_spill] sm:$0xff] %v8126_v28  ;;  %v3689_v27 = vsel %vm3535_vm2, %v8120_v12, -inf  ;;  %v8135_v55 = vmul.f32 0.5, %v3354_v33  ;;  %v3713_v36 = vsel %vm3535_vm2, %v8126_v28, -inf }
 0x461   : > { %3711 = vmax.xlane.f32.xlu1 %v3710_v23  ;;  %3690 = vmax.xlane.f32.xlu0 %v3689_v27  ;;  %v3443_v23 = vpop.f32.mrf.mxu0  ;;  %v3796_v12 = vmul.f32 1.442695, %v3730_v39  ;;  %v8140_v27 = vpop.xlane.xlu1 %3579 }
 0x462   : > { %8892 = vst [vmem:[#allocation20_spill] sm:$0xff] %v8135_v55  ;;  %v8145_v49 = vmul.f32 0.5, %v3443_v23  ;;  %v3556_v28 = vpop.xlane.xlu0 %3555  ;;  %v3798_v23 = vmul.f32 1.442695, %v3731_v1 }
 0x463   : > { %6163 = vpow2.f32 %v3796_v12  ;;  %v3736_v12 = vsub.f32 %v7936_v60, %v3562_v4 }
 0x465   : > { %3681 = vmax.xlane.f32.xlu1 %v3680_v3  ;;  %3714 = vmax.xlane.f32.xlu0 %v3713_v36  ;;  %v3683_v3 = vsel %vm3535_vm2, %v8135_v55, -inf  ;;  %v3812_v36 = vmul.f32 1.442695, %v3738_v14  ;;  %v3707_v55 = vsel %vm3535_vm2, %v8145_v49, -inf  ;;  %v3550_v14 = vpop.xlane.xlu1 %3549  ;;  %v3808_v4 = vmul.f32 1.442695, %v3736_v12 }
 0x467   : > { %6165 = vpow2.f32 %v3812_v36 }
 0x468   : > { %6167 = vpow2.f32 %v3798_v23 }
 0x469   : > { %v5628_v33 = vpop.f32.mrf.mxu0  ;;  %3705 = vmax.xlane.f32.xlu1 %v3704_v43  ;;  %v5612_v8 = vpop.f32.mrf.mxu1  ;;  %3684 = vmax.xlane.f32.xlu0 %v3683_v3  ;;  %v3739_v43 = vsub.f32 %v7932_v11, %v3571_v37  ;;  %6169 = vpow2.f32 %v3792_v51 }
 0x46a   : > { %v8149_v39 = vmul.f32 0.5, %v5612_v8  ;;  %v8152_v24 = vmul.f32 0.5, %v5628_v33  ;;  %v3729_v33 = vsub.f32 %v7942_v57, %v3541_v32  ;;  %v3734_v57 = vsub.f32 %v7950_v20, %v3556_v28  ;;  %v3559_v23 = vpop.xlane.xlu1 %3558 }
 0x46b   : > { %v3456_v62 = vpop.f32.mrf.mxu0  ;;  %v3367_v29 = vpop.f32.mrf.mxu1  ;;  %v3814_v37 = vmul.f32 1.442695, %v3739_v43  ;;  %v3742_v20 = vsub.f32 %v7944_v16, %v8140_v27  ;;  %v3735_v12 = vsub.f32 %v7964_v54, %v3559_v23  ;;  %v3732_v16 = vsub.f32 %v7956_v53, %v3550_v14 }
 0x46c   : > { %8893 = vst [vmem:[#allocation21_spill] sm:$0xff] %v8149_v39  ;;  %v3698_v40 = vsel %vm3535_vm2, %v8149_v39, -inf  ;;  %v3565_v39 = vpop.xlane.xlu0 %3564  ;;  %v8163_v1 = vmul.f32 0.5, %v3367_v29  ;;  %v3722_v11 = vsel %vm3535_vm2, %v8152_v24, -inf  ;;  %v3794_v47 = vmul.f32 1.442695, %v3729_v33 }
 0x46d   : > { %3699 = vmax.xlane.f32.xlu1 %v3698_v40  ;;  %v5629_v8 = vpop.f32.mrf.mxu0  ;;  %3708 = vmax.xlane.f32.xlu0 %v3707_v55  ;;  %v5613_v3 = vpop.f32.mrf.mxu1  ;;  %v8172_v32 = vmul.f32 0.5, %v3456_v62  ;;  %6171 = vpow2.f32 %v3814_v37  ;;  %v3737_v29 = vsub.f32 %v7958_v59, %v3565_v39  ;;  %v3804_v28 = vmul.f32 1.442695, %v3734_v57 }
 0x46e   : > { %v8160_v7 = vmul.f32 0.5, %v5613_v3  ;;  %v8167_v40 = vmul.f32 0.5, %v5629_v8  ;;  %v3692_v36 = vsel %vm3535_vm2, %v8163_v1, -inf  ;;  %6173 = vpow2.f32 %v3808_v4 }
 0x46f   : > { %v3370_v55 = vpop.f32.mrf.mxu1  ;;  %v3459_v51 = vpop.f32.mrf.mxu0  ;;  %6175 = vpow2.f32 %v3794_v47  ;;  %v3716_v62 = vsel %vm3535_vm2, %v8172_v32, -inf  ;;  %v3810_v39 = vmul.f32 1.442695, %v3737_v29  ;;  %v3820_v37 = vmul.f32 1.442695, %v3742_v20 }
 0x470   : > { %v3701_v60 = vsel %vm3535_vm2, %v8160_v7, -inf  ;;  %v8177_v43 = vmul.f32 0.5, %v3370_v55  ;;  %v3725_v8 = vsel %vm3535_vm2, %v8167_v40, -inf  ;;  %v3583_v3 = vpop.xlane.xlu0 %3582  ;;  %v8185_v59 = vpop.eup %6163  ;;  %v8188_v33 = vmul.f32 0.5, %v3459_v51 }
 0x471   : > { %3723 = vmax.xlane.f32.xlu1 %v3722_v11  ;;  %3702 = vmax.xlane.f32.xlu0 %v3701_v60  ;;  %6177 = vpow2.f32 %v3804_v28  ;;  %v3926_v60 = vsel %vm3535_vm2, %v8185_v59, 0.0  ;;  %v3743_v54 = vsub.f32 %v7960_v26, %v3583_v3  ;;  %v3806_v4 = vmul.f32 1.442695, %v3735_v12  ;;  %v3574_v47 = vpop.xlane.xlu1 %3573 }
 0x472   : > { %v3695_v11 = vsel %vm3535_vm2, %v8177_v43, -inf  ;;  %6179 = vpow2.f32 %v3810_v39  ;;  %v3719_v57 = vsel %vm3535_vm2, %v8188_v33, -inf  ;;  %v3800_v53 = vmul.f32 1.442695, %v3732_v16 }
 0x473   : > { %6181 = vpow2.f32 %v3820_v37  ;;  %v3740_v14 = vsub.f32 %v7968_v46, %v3574_v47 }
 0x474   : > { %v3553_v27 = vpop.xlane.xlu0 %3552  ;;  %v8195_v55 = vpop.eup %6165  ;;  %6183 = vpow2.f32 %v3806_v4 }
 0x475   : > { %3693 = vmax.xlane.f32.xlu1 %v3692_v36  ;;  %3726 = vmax.xlane.f32.xlu0 %v3725_v8  ;;  %v8200_v36 = vpop.eup %6167  ;;  %v3950_v23 = vsel %vm3535_vm2, %v8195_v55, 0.0  ;;  %v3822_v8 = vmul.f32 1.442695, %v3743_v54  ;;  %v3733_v26 = vsub.f32 %v7974_v38, %v3553_v27  ;;  %6185 = vpow2.f32 %v3800_v53 }
 0x476   : > { %v8202_v29 = vpop.eup %6169  ;;  %v3929_v3 = vsel %vm3535_vm2, %v8200_v36, 0.0  ;;  %v3816_v46 = vmul.f32 1.442695, %v3740_v14 }
 0x477   : > { %v3920_v12 = vsel %vm3535_vm2, %v8202_v29, 0.0  ;;  %6187 = vpow2.f32 %v3822_v8  ;;  %v3802_v38 = vmul.f32 1.442695, %v3733_v26 }
 0x478   : > { %v3577_v20 = vpop.xlane.xlu0 %3576  ;;  %6189 = vpow2.f32 %v3816_v46 }
 0x479   : > { %3717 = vmax.xlane.f32.xlu1 %v3716_v62  ;;  %3696 = vmax.xlane.f32.xlu0 %v3695_v11  ;;  %v3741_v37 = vsub.f32 %v7976_v22, %v3577_v20  ;;  %6191 = vpow2.f32 %v3802_v38 }
 0x47a   : > { %v8210_v51 = vpop.eup %6171 }
 0x47b   : > { %v8212_v62 = vpop.eup %6173  ;;  %v3953_v16 = vsel %vm3535_vm2, %v8210_v51, 0.0 }
 0x47c   : > { %v8217_v11 = vpop.eup %6175  ;;  %v3944_v4 = vsel %vm3535_vm2, %v8212_v62, 0.0 }
 0x47d   : > { %3927 = vadd.xlane.f32.xlu1 %v3926_v60  ;;  %3720 = vmax.xlane.f32.xlu0 %v3719_v57  ;;  %v3818_v57 = vmul.f32 1.442695, %v3741_v37  ;;  %v3923_v22 = vsel %vm3535_vm2, %v8217_v11, 0.0 }
 0x47e   : > { %v8225_v47 = vpop.eup %6177 }
 0x47f   : > { %v8229_v53 = vpop.eup %6179  ;;  %v3938_v26 = vsel %vm3535_vm2, %v8225_v47, 0.0 }
 0x480   : > { %v3947_v46 = vsel %vm3535_vm2, %v8229_v53, 0.0 }
 0x481   : > { %3951 = vadd.xlane.f32.xlu1 %v3950_v23  ;;  %3930 = vadd.xlane.f32.xlu0 %v3929_v3  ;;  %v8234_v3 = vpop.eup %6181 }
 0x482   : > { %v3592_v28 = vpop.xlane.xlu1 %3591  ;;  %v3962_v38 = vsel %vm3535_vm2, %v8234_v3, 0.0 }
 0x483   : > { %v3746_v39 = vsub.f32 %v7984_v61, %v3592_v28 }
 0x485   : > { %3921 = vadd.xlane.f32.xlu1 %v3920_v12  ;;  %3954 = vadd.xlane.f32.xlu0 %v3953_v16  ;;  %v3828_v54 = vmul.f32 1.442695, %v3746_v39  ;;  %v8239_v39 = vpop.eup %6183 }
 0x486   : > { %v3616_v27 = vpop.xlane.xlu1 %3615  ;;  %v3595_v60 = vpop.xlane.xlu0 %3594 }
 0x487   : > { %v3754_v61 = vsub.f32 %v7986_v5, %v3616_v27  ;;  %6193 = vpow2.f32 %v3828_v54  ;;  %v3747_v20 = vsub.f32 %v7990_v58, %v3595_v60  ;;  %v8243_v37 = vpop.eup %6185  ;;  %v3941_v27 = vsel %vm3535_vm2, %v8239_v39, 0.0 }
 0x488   : > { %6195 = vpow2.f32 %v3818_v57  ;;  %v8248_v60 = vpop.eup %6187 }
 0x489   : > { %3945 = vadd.xlane.f32.xlu1 %v3944_v4  ;;  %3924 = vadd.xlane.f32.xlu0 %v3923_v22  ;;  %v3844_v5 = vmul.f32 1.442695, %v3754_v61  ;;  %v3830_v16 = vmul.f32 1.442695, %v3747_v20  ;;  %v3932_v22 = vsel %vm3535_vm2, %v8243_v37, 0.0 }
 0x48a   : > { %v3586_v14 = vpop.xlane.xlu1 %3585  ;;  %v3619_v23 = vpop.xlane.xlu0 %3618 }
 0x48b   : > { %v3744_v8 = vsub.f32 %v7992_v13, %v3586_v14  ;;  %6197 = vpow2.f32 %v3844_v5  ;;  %v3755_v57 = vsub.f32 %v7994_v63, %v3619_v23  ;;  %v8254_v14 = vpop.eup %6189  ;;  %v3965_v5 = vsel %vm3535_vm2, %v8248_v60, 0.0 }
 0x48c   : > { %v3956_v23 = vsel %vm3535_vm2, %v8254_v14, 0.0 }
 0x48d   : > { %v3824_v28 = vmul.f32 1.442695, %v3744_v8  ;;  %3939 = vadd.xlane.f32.xlu1 %v3938_v26  ;;  %3948 = vadd.xlane.f32.xlu0 %v3947_v46  ;;  %v8258_v26 = vpop.eup %6191 }
 0x48e   : > { %v3610_v12 = vpop.xlane.xlu1 %3609  ;;  %v3589_v13 = vpop.xlane.xlu0 %3588 }
 0x48f   : > { %6199 = vpow2.f32 %v3824_v28  ;;  %v3752_v58 = vsub.f32 %v8000_v25, %v3610_v12  ;;  %v3846_v28 = vmul.f32 1.442695, %v3755_v57  ;;  %v3745_v12 = vsub.f32 %v8002_v35, %v3589_v13 }
 0x490   : > { %6201 = vpow2.f32 %v3830_v16  ;;  %v3935_v16 = vsel %vm3535_vm2, %v8258_v26, 0.0 }
 0x491   : > { %3963 = vadd.xlane.f32.xlu1 %v3962_v38  ;;  %3942 = vadd.xlane.f32.xlu0 %v3941_v27  ;;  %v3840_v25 = vmul.f32 1.442695, %v3752_v58  ;;  %v3826_v57 = vmul.f32 1.442695, %v3745_v12 }
 0x492   : > { %v3613_v54 = vpop.xlane.xlu0 %3612  ;;  %v3604_v61 = vpop.xlane.xlu1 %3603 }
 0x493   : > { %v3750_v4 = vsub.f32 %v8014_v42, %v3604_v61  ;;  %v3753_v35 = vsub.f32 %v8008_v30, %v3613_v54 }
 0x494   : > { %v8263_v46 = vpop.eup %6193 }
 0x495   : > { %v3836_v8 = vmul.f32 1.442695, %v3750_v4  ;;  %3933 = vadd.xlane.f32.xlu1 %v3932_v22  ;;  %3966 = vadd.xlane.f32.xlu0 %v3965_v5  ;;  %v8268_v58 = vpop.eup %6195  ;;  %v3974_v61 = vsel %vm3535_vm2, %v8263_v46, 0.0  ;;  %v3842_v30 = vmul.f32 1.442695, %v3753_v35 }
 0x496   : > { %v3628_v20 = vpop.xlane.xlu1 %3627  ;;  %v3607_v63 = vpop.xlane.xlu0 %3606  ;;  %v3959_v22 = vsel %vm3535_vm2, %v8268_v58, 0.0 }
 0x497   : > { %v3758_v42 = vsub.f32 %v8016_v21, %v3628_v20  ;;  %6203 = vpow2.f32 %v3836_v8  ;;  %v3751_v20 = vsub.f32 %v8024_v48, %v3607_v63 }
 0x498   : > { %6205 = vpow2.f32 %v3840_v25  ;;  %v8273_v4 = vpop.eup %6197 }
 0x499   : > { %v3852_v38 = vmul.f32 1.442695, %v3758_v42  ;;  %3957 = vadd.xlane.f32.xlu1 %v3956_v23  ;;  %3936 = vadd.xlane.f32.xlu0 %v3935_v16  ;;  %v3998_v42 = vsel %vm3535_vm2, %v8273_v4, 0.0 }
 0x49a   : > { %v3598_v21 = vpop.xlane.xlu1 %3597  ;;  %v3631_v8 = vpop.xlane.xlu0 %3630 }
 0x49b   : > { %6207 = vpow2.f32 %v3852_v38  ;;  %v3748_v27 = vsub.f32 %v8022_v9, %v3598_v21  ;;  %v3838_v38 = vmul.f32 1.442695, %v3751_v20 }
 0x49c   : > { %6209 = vpow2.f32 %v3846_v28  ;;  %v8278_v25 = vpop.eup %6199 }
 0x49d   : > { %v3832_v13 = vmul.f32 1.442695, %v3748_v27  ;;  %3975 = vadd.xlane.f32.xlu1 %v3974_v61  ;;  %3960 = vadd.xlane.f32.xlu0 %v3959_v22  ;;  %v3968_v28 = vsel %vm3535_vm2, %v8278_v25, 0.0  ;;  %v8286_v23 = vpop.eup %6201 }
 0x49e   : > { %v3622_v5 = vpop.xlane.xlu1 %3621  ;;  %v3601_v16 = vpop.xlane.xlu0 %3600  ;;  %v3977_v63 = vsel %vm3535_vm2, %v8286_v23, 0.0 }
 0x49f   : > { %6211 = vpow2.f32 %v3832_v13  ;;  %v3756_v9 = vsub.f32 %v8032_v0, %v3622_v5  ;;  %v3759_v0 = vsub.f32 %v8026_v18, %v3631_v8  ;;  %v3749_v22 = vsub.f32 %v8034_v52, %v3601_v16 }
 0x4a0   : > { %6213 = vpow2.f32 %v3826_v57 }
 0x4a1   : > { %v3848_v54 = vmul.f32 1.442695, %v3756_v9  ;;  %3999 = vadd.xlane.f32.xlu1 %v3998_v42  ;;  %3969 = vadd.xlane.f32.xlu0 %v3968_v28  ;;  %v3854_v18 = vmul.f32 1.442695, %v3759_v0 }
 0x4a2   : > { %v3640_v12 = vpop.xlane.xlu1 %3639  ;;  %v3625_v20 = vpop.xlane.xlu0 %3624 }
 0x4a3   : > { %6215 = vpow2.f32 %v3848_v54  ;;  %v3834_v54 = vmul.f32 1.442695, %v3749_v22  ;;  %v3757_v52 = vsub.f32 %v8044_v15, %v3625_v20 }
 0x4a4   : > { %v8289_v48 = vpop.eup %6203  ;;  %6217 = vpow2.f32 %v3842_v30 }
 0x4a5   : > { %v8293_v21 = vpop.eup %6205  ;;  %3978 = vadd.xlane.f32.xlu0 %v3977_v63  ;;  %v3986_v61 = vsel %vm3535_vm2, %v8289_v48, 0.0  ;;  %6219 = vpow2.f32 %v3838_v38  ;;  %v8848_v38 = vmov 0.0   ;;  %v3762_v63 = vsub.f32 %v8046_v6, %v3640_v12 }
 0x4a6   : > { %v3664_v27 = vpop.xlane.xlu1 %3663  ;;  %3987 = vadd.xlane.f32.xlu1 %v3986_v61  ;;  %v3992_v5 = vsel %vm3535_vm2, %v8293_v21, 0.0  ;;  %5630 = vmatprep.subr.bf16.mxu1 %v8848_v38  ;;  %v3643_v61 = vpop.xlane.xlu0 %3642  ;;  %v3850_v15 = vmul.f32 1.442695, %v3757_v52 }
 0x4a7   : > { %v3770_v57 = vsub.f32 %v8048_v56, %v3664_v27  ;;  %5642 = vmatprep.subr.bf16.mxu0 %v8848_v38  ;;  %v3763_v12 = vsub.f32 %v8056_v31, %v3643_v61  ;;  %5638 = vmatprep.mubr.msk.bf16.mxu1 %vm6484_vm3, %v8848_v38 }
 0x4a8   : > { %v8298_v35 = vpop.eup %6207  ;;  %5650 = vmatprep.mubr.msk.bf16.mxu0 %vm6484_vm3, %v8848_v38 }
 0x4a9   : > { %v8300_v13 = vpop.eup %6209  ;;  %v3876_v8 = vmul.f32 1.442695, %v3770_v57  ;;  %v4010_v9 = vsel %vm3535_vm2, %v8298_v35, 0.0  ;;  %3993 = vadd.xlane.f32.xlu0 %v3992_v5  ;;  %v3860_v5 = vmul.f32 1.442695, %v3762_v63 }
 0x4aa   : > { %v3634_v42 = vpop.xlane.xlu1 %3633  ;;  %4011 = vadd.xlane.f32.xlu1 %v4010_v9  ;;  %v4001_v30 = vsel %vm3535_vm2, %v8300_v13, 0.0 }
 0x4ab   : > { %6221 = vpow2.f32 %v3876_v8  ;;  %v3760_v61 = vsub.f32 %v8054_v50, %v3634_v42 }
 0x4ac   : > { %v8307_v56 = vpop.eup %6211  ;;  %6223 = vpow2.f32 %v3854_v18 }
 0x4ad   : > { %v3980_v28 = vsel %vm3535_vm2, %v8307_v56, 0.0  ;;  %v8316_v0 = vpop.eup %6213  ;;  %4002 = vadd.xlane.f32.xlu0 %v4001_v30  ;;  %6225 = vpow2.f32 %v3834_v54  ;;  %v3667_v54 = vpop.xlane.xlu0 %3666 }
 0x4ae   : > { %v3658_v16 = vpop.xlane.xlu1 %3657  ;;  %3981 = vadd.xlane.f32.xlu1 %v3980_v28  ;;  %v3971_v57 = vsel %vm3535_vm2, %v8316_v0, 0.0  ;;  %6227 = vpow2.f32 %v3850_v15  ;;  %v3862_v28 = vmul.f32 1.442695, %v3763_v12  ;;  %v3771_v63 = vsub.f32 %v8058_v2, %v3667_v54 }
 0x4af   : > { %6229 = vpow2.f32 %v3860_v5  ;;  %v3856_v5 = vmul.f32 1.442695, %v3760_v61  ;;  %v3768_v42 = vsub.f32 %v8064_v19, %v3658_v16 }
 0x4b0   : > { %v8319_v27 = vpop.eup %6215 }
 0x4b1   : > { %v4004_v18 = vsel %vm3535_vm2, %v8319_v27, 0.0  ;;  %v8325_v22 = vpop.eup %6217  ;;  %3972 = vadd.xlane.f32.xlu0 %v3971_v57  ;;  %v3878_v57 = vmul.f32 1.442695, %v3771_v63  ;;  %v3637_v2 = vpop.xlane.xlu0 %3636 }
 0x4b2   : > { %v3652_v8 = vpop.xlane.xlu1 %3651  ;;  %4005 = vadd.xlane.f32.xlu1 %v4004_v18  ;;  %v8328_v6 = vpop.eup %6219  ;;  %v3995_v30 = vsel %vm3535_vm2, %v8325_v22, 0.0 }
 0x4b3   : > { %v3766_v9 = vsub.f32 %v8078_v45, %v3652_v8  ;;  %v3989_v45 = vsel %vm3535_vm2, %v8328_v6, 0.0 }
 0x4b5   : > { %v3868_v20 = vmul.f32 1.442695, %v3766_v9  ;;  %3996 = vadd.xlane.f32.xlu0 %v3995_v30  ;;  %v3761_v9 = vsub.f32 %v8070_v17, %v3637_v2  ;;  %v3661_v63 = vpop.xlane.xlu0 %3660 }
 0x4b6   : > { %v3769_v61 = vsub.f32 %v8072_v34, %v3661_v63 }
 0x4b7   : > { %6231 = vpow2.f32 %v3868_v20  ;;  %v3858_v54 = vmul.f32 1.442695, %v3761_v9 }
 0x4b8   : > { %v8333_v52 = vpop.eup %6221  ;;  %6233 = vpow2.f32 %v3862_v28  ;;  %v3874_v19 = vmul.f32 1.442695, %v3769_v61 }
 0x4b9   : > { %8894 = vst [vmem:[#allocation22_spill] sm:$0xff] %v8333_v52  ;;  %v4046_v15 = vsel %vm3535_vm2, %v8333_v52, 0.0  ;;  %v8340_v31 = vpop.eup %6223  ;;  %3990 = vadd.xlane.f32.xlu0 %v3989_v45  ;;  %6235 = vpow2.f32 %v3878_v57  ;;  %v3676_v45 = vpop.xlane.xlu1 %3675 }
 0x4ba   : > { %4047 = vadd.xlane.f32.xlu1 %v4046_v15  ;;  %v4013_v18 = vsel %vm3535_vm2, %v8340_v31, 0.0  ;;  %v8345_v8 = vpop.eup %6225  ;;  %6237 = vpow2.f32 %v3856_v5  ;;  %v3872_v15 = vmul.f32 1.442695, %v3768_v42  ;;  %v3774_v16 = vsub.f32 %v8080_v10, %v3676_v45  ;;  %v3655_v9 = vpop.xlane.xlu0 %3654 }
 0x4bb   : > { %v3983_v12 = vsel %vm3535_vm2, %v8345_v8, 0.0  ;;  %v8350_v20 = vpop.eup %6227  ;;  %6239 = vpow2.f32 %v3858_v54 }
 0x4bc   : > { %v8352_v30 = vpop.eup %6229  ;;  %v4007_v28 = vsel %vm3535_vm2, %v8350_v20, 0.0  ;;  %6241 = vpow2.f32 %v3872_v15  ;;  %v1942_v15 = vld [vmem:[%s8828_s4 + $0x48] sm:$0xff] }
 0x4bd   : > { %4014 = vadd.xlane.f32.xlu0 %v4013_v18  ;;  %8895 = vst [vmem:[#allocation23_spill] sm:$0xff] %v8352_v30  ;;  %v4022_v57 = vsel %vm3535_vm2, %v8352_v30, 0.0  ;;  %v3646_v5 = vpop.xlane.xlu1 %3645  ;;  %6243 = vpow2.f32 %v3874_v19  ;;  %v8900_v19 = vld [vmem:[#allocation10_spill] sm:$0xff] }
 0x4be   : > { %v3764_v42 = vsub.f32 %v8086_v41, %v3646_v5 }
 0x4c0   : > { %v3864_v63 = vmul.f32 1.442695, %v3764_v42 }
 0x4c1   : > { %3984 = vadd.xlane.f32.xlu0 %v3983_v12  ;;  %v3884_v12 = vmul.f32 1.442695, %v3774_v16  ;;  %v3670_v41 = vpop.xlane.xlu1 %3669 }
 0x4c2   : > { %v3772_v16 = vsub.f32 %v8900_v19, %v3670_v41 }
 0x4c3   : > { %6245 = vpow2.f32 %v3884_v12 }
 0x4c4   : > { %v8354_v50 = vpop.eup %6231  ;;  %6247 = vpow2.f32 %v3864_v63  ;;  %v3880_v42 = vmul.f32 1.442695, %v3772_v16  ;;  %v8904_v63 = vld [vmem:[#allocation11_spill] sm:$0xff] }
 0x4c5   : > { %4008 = vadd.xlane.f32.xlu0 %v4007_v28  ;;  %v4034_v17 = vsel %vm3535_vm2, %v8354_v50, 0.0  ;;  %v8364_v18 = vpop.eup %6233  ;;  %v3767_v28 = vsub.f32 %v8088_v44, %v3655_v9  ;;  %v8902_v9 = vld [vmem:[#allocation9_spill] sm:$0xff] }
 0x4c6   : > { %4035 = vadd.xlane.f32.xlu1 %v4034_v17  ;;  %8896 = vst [vmem:[#allocation24_spill] sm:$0xff] %v8364_v18  ;;  %v4025_v2 = vsel %vm3535_vm2, %v8364_v18, 0.0  ;;  %v8373_v34 = vpop.eup %6235  ;;  %v3679_v17 = vpop.xlane.xlu0 %3678 }
 0x4c7   : > { %8897 = vst [vmem:[#allocation25_spill] sm:$0xff] %v8373_v34  ;;  %v4049_v10 = vsel %vm3535_vm2, %v8373_v34, 0.0  ;;  %v8378_v54 = vpop.eup %6237  ;;  %v3775_v12 = vsub.f32 %v8902_v9, %v3679_v17 }
 0x4c8   : > { %8898 = vst [vmem:[#allocation26_spill] sm:$0xff] %v8378_v54  ;;  %v4016_v45 = vsel %vm3535_vm2, %v8378_v54, 0.0  ;;  %v8386_v61 = vpop.eup %6239  ;;  %v8908_v54 = vld [vmem:[#allocation16_spill] sm:$0xff] }
 0x4c9   : > { %4023 = vadd.xlane.f32.xlu0 %v4022_v57  ;;  %8899 = vst [vmem:[#allocation27_spill] sm:$0xff] %v8386_v61  ;;  %v3870_v57 = vmul.f32 1.442695, %v3767_v28  ;;  %v4019_v44 = vsel %vm3535_vm2, %v8386_v61, 0.0  ;;  %v3886_v28 = vmul.f32 1.442695, %v3775_v12 }
 0x4ca   : > { %v3649_v5 = vpop.xlane.xlu0 %3648  ;;  %v8909_v61 = vld [vmem:[#allocation18_spill] sm:$0xff] }
 0x4cb   : > { %6249 = vpow2.f32 %v3870_v57  ;;  %v8905_v57 = vld [vmem:[#allocation12_spill] sm:$0xff] }
 0x4cc   : > { %6251 = vpow2.f32 %v3880_v42 }
 0x4cd   : > { %4026 = vadd.xlane.f32.xlu0 %v4025_v2  ;;  %v8391_v2 = vpop.eup %6241  ;;  %6253 = vpow2.f32 %v3886_v28  ;;  %v8907_v28 = vld [vmem:[#allocation15_spill] sm:$0xff] }
 0x4ce   : > { %8901 = vst [vmem:[#allocation10_spill] sm:$0xff] %v8391_v2  ;;  %v3673_v41 = vpop.xlane.xlu0 %3672 }
 0x4cf   : > { %v3773_v17 = vsub.f32 %v8905_v57, %v3673_v41 }
 0x4d1   : > { %4050 = vadd.xlane.f32.xlu0 %v4049_v10  ;;  %v4040_v10 = vsel %vm3535_vm2, %v8391_v2, 0.0  ;;  %v3882_v42 = vmul.f32 1.442695, %v3773_v17 }
 0x4d5   : > { %4017 = vadd.xlane.f32.xlu0 %v4016_v45  ;;  %v8396_v45 = vpop.eup %6243 }
 0x4d6   : > { %8903 = vst [vmem:[#allocation9_spill] sm:$0xff] %v8396_v45  ;;  %v4043_v19 = vsel %vm3535_vm2, %v8396_v45, 0.0 }
 0x4d7   : > { %1992 = vperm.xlu1 %5816, %v1942_v15   ;;  %v3765_v15 = vsub.f32 %v8904_v63, %v3649_v5  ;;  %v8906_v5 = vld [vmem:[#allocation14_spill] sm:$0xff] }
 0x4d9   : > { %4020 = vadd.xlane.f32.xlu0 %v4019_v44  ;;  %v8401_v44 = vpop.eup %6245  ;;  %v3866_v16 = vmul.f32 1.442695, %v3765_v15 }
 0x4da   : > { %v4058_v9 = vsel %vm3535_vm2, %v8401_v44, 0.0  ;;  %v8406_v38 = vpop.eup %6247 }
 0x4db   : > { %6255 = vpow2.f32 %v3866_v16  ;;  %v4028_v63 = vsel %vm3535_vm2, %v8406_v38, 0.0  ;;  %v8411_v2 = vpop.eup %6249 }
 0x4dc   : > { %6257 = vpow2.f32 %v3882_v42  ;;  %v4037_v17 = vsel %vm3535_vm2, %v8411_v2, 0.0  ;;  %v8417_v16 = vpop.eup %6251 }
 0x4dd   : > { %4041 = vadd.xlane.f32.xlu0 %v4040_v10  ;;  %v4052_v42 = vsel %vm3535_vm2, %v8417_v16, 0.0 }
 0x4e1   : > { %4044 = vadd.xlane.f32.xlu0 %v4043_v19 }
 0x4e5   : > { %4059 = vadd.xlane.f32.xlu0 %v4058_v9 }
 0x4e6   : > { %v3688_v12 = vpop.xlane.xlu1 %3687 }
 0x4e7   : > { %v3778_v10 = vsub.f32 %v8906_v5, %v3688_v12 }
 0x4e9   : > { %4029 = vadd.xlane.f32.xlu0 %v4028_v63  ;;  %v3892_v57 = vmul.f32 1.442695, %v3778_v10  ;;  %v8422_v10 = vpop.eup %6253 }
 0x4ea   : > { %v3712_v41 = vpop.xlane.xlu1 %3711  ;;  %v3691_v19 = vpop.xlane.xlu0 %3690 }
 0x4eb   : > { %v3786_v15 = vsub.f32 %v8907_v28, %v3712_v41  ;;  %v3779_v9 = vsub.f32 %v8908_v54, %v3691_v19  ;;  %v8910_v28 = vld [vmem:[#allocation17_spill] sm:$0xff] }
 0x4ed   : > { %v3908_v45 = vmul.f32 1.442695, %v3786_v15  ;;  %4038 = vadd.xlane.f32.xlu0 %v4037_v17  ;;  %v3894_v63 = vmul.f32 1.442695, %v3779_v9  ;;  %v8911_v17 = vld [vmem:[#allocation21_spill] sm:$0xff] }
 0x4ee   : > { %v3682_v12 = vpop.xlane.xlu1 %3681  ;;  %v3715_v5 = vpop.xlane.xlu0 %3714 }
 0x4ef   : > { %6259 = vpow2.f32 %v3908_v45  ;;  %v3787_v52 = vsub.f32 %v8909_v61, %v3715_v5  ;;  %v3776_v15 = vsub.f32 %v8910_v28, %v3682_v12  ;;  %v4061_v45 = vsel %vm3535_vm2, %v8422_v10, 0.0 }
 0x4f0   : > { %6261 = vpow2.f32 %v3892_v57  ;;  %v8431_v57 = vpop.eup %6255 }
 0x4f1   : > { %4053 = vadd.xlane.f32.xlu0 %v4052_v42  ;;  %6263 = vpow2.f32 %v3894_v63  ;;  %v3910_v19 = vmul.f32 1.442695, %v3787_v52  ;;  %v8436_v42 = vpop.eup %6257  ;;  %v3888_v34 = vmul.f32 1.442695, %v3776_v15  ;;  %v4031_v12 = vsel %vm3535_vm2, %v8431_v57, 0.0 }
 0x4f2   : > { %v8424_v54 = vpop.xlane.xlu1 %3705  ;;  %v8426_v41 = vpop.xlane.xlu0 %3684  ;;  %8912 = vst [vmem:[#allocation11_spill] sm:$0xff] %v8436_v42 }
 0x4f3   : > { %6265 = vpow2.f32 %v3910_v19 }
 0x4f5   : > { %4062 = vadd.xlane.f32.xlu0 %v4061_v45 }
 0x4f6   : > { %v3700_v61 = vpop.xlane.xlu1 %3699  ;;  %v8433_v9 = vpop.xlane.xlu0 %3708 }
 0x4f7   : > { %v3782_v5 = vsub.f32 %v8911_v17, %v3700_v61  ;;  %v4055_v61 = vsel %vm3535_vm2, %v8436_v42, 0.0 }
 0x4f9   : > { %v3900_v30 = vmul.f32 1.442695, %v3782_v5  ;;  %4032 = vadd.xlane.f32.xlu0 %v4031_v12 }
 0x4fa   : > { %v3724_v52 = vpop.xlane.xlu1 %3723  ;;  %v3703_v28 = vpop.xlane.xlu0 %3702 }
 0x4fb   : > { %6267 = vpow2.f32 %v3900_v30  ;;  %v3790_v63 = vsub.f32 %v8152_v24, %v3724_v52  ;;  %v3783_v24 = vsub.f32 %v8160_v7, %v3703_v28 }
 0x4fc   : > { %v8441_v45 = vpop.eup %6259  ;;  %6269 = vpow2.f32 %v3888_v34 }
 0x4fd   : > { %8913 = vst [vmem:[#allocation12_spill] sm:$0xff] %v8441_v45  ;;  %v3916_v18 = vmul.f32 1.442695, %v3790_v63  ;;  %v4094_v15 = vsel %vm3535_vm2, %v8441_v45, 0.0  ;;  %v8447_v19 = vpop.eup %6261  ;;  %4056 = vadd.xlane.f32.xlu0 %v4055_v61  ;;  %v3902_v42 = vmul.f32 1.442695, %v3783_v24 }
 0x4fe   : > { %8914 = vst [vmem:[#allocation14_spill] sm:$0xff] %v8447_v19  ;;  %4095 = vadd.xlane.f32.xlu1 %v4094_v15  ;;  %v3694_v17 = vpop.xlane.xlu1 %3693  ;;  %v3727_v5 = vpop.xlane.xlu0 %3726  ;;  %v4070_v34 = vsel %vm3535_vm2, %v8447_v19, 0.0 }
 0x4ff   : > { %v3780_v30 = vsub.f32 %v8163_v1, %v3694_v17  ;;  %6271 = vpow2.f32 %v3916_v18  ;;  %v8453_v52 = vpop.eup %6263  ;;  %v3791_v17 = vsub.f32 %v8167_v40, %v3727_v5 }
 0x500   : > { %8915 = vst [vmem:[#allocation15_spill] sm:$0xff] %v8453_v52  ;;  %v4073_v1 = vsel %vm3535_vm2, %v8453_v52, 0.0  ;;  %v8458_v15 = vpop.eup %6265  ;;  %v8922_v52 = vld [vmem:[#allocation19_spill] sm:$0xff] }
 0x501   : > { %v3896_v12 = vmul.f32 1.442695, %v3780_v30  ;;  %4071 = vadd.xlane.f32.xlu0 %v4070_v34  ;;  %8916 = vst [vmem:[#allocation16_spill] sm:$0xff] %v8458_v15  ;;  %v4097_v24 = vsel %vm3535_vm2, %v8458_v15, 0.0 }
 0x502   : > { %v3718_v63 = vpop.xlane.xlu1 %3717  ;;  %v3697_v45 = vpop.xlane.xlu0 %3696 }
 0x503   : > { %6273 = vpow2.f32 %v3896_v12  ;;  %v3788_v61 = vsub.f32 %v8172_v32, %v3718_v63 }
 0x504   : > { %6275 = vpow2.f32 %v3902_v42  ;;  %v3781_v42 = vsub.f32 %v8177_v43, %v3697_v45 }
 0x505   : > { %4074 = vadd.xlane.f32.xlu0 %v4073_v1  ;;  %v3912_v30 = vmul.f32 1.442695, %v3788_v61  ;;  %v3918_v1 = vmul.f32 1.442695, %v3791_v17 }
 0x506   : > { %v8460_v7 = vpop.xlane.xlu1 %3927  ;;  %v3721_v18 = vpop.xlane.xlu0 %3720 }
 0x507   : > { %6277 = vpow2.f32 %v3912_v30 }
 0x508   : > { %v8462_v28 = vpop.eup %6267  ;;  %6279 = vpow2.f32 %v3918_v1 }
 0x509   : > { %8917 = vst [vmem:[#allocation18_spill] sm:$0xff] %v8462_v28  ;;  %v4082_v32 = vsel %vm3535_vm2, %v8462_v28, 0.0  ;;  %v8469_v12 = vpop.eup %6269  ;;  %4098 = vadd.xlane.f32.xlu0 %v4097_v24  ;;  %v3898_v24 = vmul.f32 1.442695, %v3781_v42 }
 0x50a   : > { %8918 = vst [vmem:[#allocation17_spill] sm:$0xff] %v8469_v12  ;;  %4083 = vadd.xlane.f32.xlu1 %v4082_v32  ;;  %v8471_v34 = vpop.xlane.xlu1 %3951  ;;  %v3931_v63 = vpop.xlane.xlu0 %3930  ;;  %v4064_v40 = vsel %vm3535_vm2, %v8469_v12, 0.0  ;;  %v3789_v32 = vsub.f32 %v8188_v33, %v3721_v18 }
 0x50b   : > { %6281 = vpow2.f32 %v3898_v24 }
 0x50c   : > { %v8476_v5 = vpop.eup %6271  ;;  %v3914_v1 = vmul.f32 1.442695, %v3789_v32 }
 0x50d   : > { %8919 = vst [vmem:[#allocation21_spill] sm:$0xff] %v8476_v5  ;;  %4065 = vadd.xlane.f32.xlu0 %v4064_v40  ;;  %v4106_v17 = vsel %vm3535_vm2, %v8476_v5, 0.0  ;;  %v8921_v40 = vld [vmem:[#allocation20_spill] sm:$0xff]  ;;  %v3784_v5 = vsub.f32 %v8922_v52, %v8424_v54  ;;  %v4742_v54 = vld [vmem:[%s8830_s6] sm:$0xff] }
 0x50e   : > { %v8478_v61 = vpop.xlane.xlu1 %3921  ;;  %v8480_v15 = vpop.xlane.xlu0 %3954  ;;  %v3777_v19 = vsub.f32 %v8921_v40, %v8426_v41  ;;  %6283 = vpow2.f32 %v3914_v1  ;;  %v3785_v40 = vsub.f32 %v8145_v49, %v8433_v9  ;;  %v4743_v49 = vld [vmem:[%s8830_s6 + $0x8] sm:$0xff] }
 0x510   : > { %v8485_v30 = vpop.eup %6273  ;;  %v3890_v28 = vmul.f32 1.442695, %v3777_v19  ;;  %v3904_v19 = vmul.f32 1.442695, %v3784_v5 }
 0x511   : > { %8920 = vst [vmem:[#allocation28_spill] sm:$0xff] %v8485_v30  ;;  %4107 = vadd.xlane.f32.xlu0 %v4106_v17  ;;  %v8491_v12 = vpop.eup %6275  ;;  %v4076_v33 = vsel %vm3535_vm2, %v8485_v30, 0.0  ;;  %v1943_v17 = vld [vmem:[%s8828_s4 + $0x50] sm:$0xff] }
 0x512   : > { %v8487_v43 = vpop.xlane.xlu1 %3945  ;;  %v8489_v45 = vpop.xlane.xlu0 %3924  ;;  %v4085_v41 = vsel %vm3535_vm2, %v8491_v12, 0.0 }
 0x514   : > { %v8506_v24 = vpop.eup %6277 }
 0x515   : > { %4077 = vadd.xlane.f32.xlu0 %v4076_v33  ;;  %v4100_v52 = vsel %vm3535_vm2, %v8506_v24, 0.0  ;;  %v8515_v1 = vpop.eup %6279 }
 0x516   : > { %v3940_v18 = vpop.xlane.xlu1 %3939  ;;  %v8497_v42 = vpop.xlane.xlu0 %3948  ;;  %v4109_v9 = vsel %vm3535_vm2, %v8515_v1, 0.0 }
 0x517   : > { %6285 = vrcp.f32 %v3940_v18 }
 0x519   : > { %4086 = vadd.xlane.f32.xlu0 %v4085_v41  ;;  %v3906_v41 = vmul.f32 1.442695, %v3785_v40 }
 0x51a   : > { %v3964_v32 = vpop.xlane.xlu1 %3963  ;;  %v3943_v33 = vpop.xlane.xlu0 %3942 }
 0x51b   : > { %1997 = vperm.xlu1 %5816, %v1943_v17   ;;  %6287 = vrcp.f32 %v3943_v33 }
 0x51c   : > { %6289 = vpow2.f32 %v3890_v28  ;;  %v8522_v28 = vpop.eup %6281 }
 0x51d   : > { %6291 = vrcp.f32 %v3964_v32  ;;  %4101 = vadd.xlane.f32.xlu0 %v4100_v52  ;;  %v4079_v32 = vsel %vm3535_vm2, %v8522_v28, 0.0  ;;  %v8529_v40 = vpop.eup %6283 }
 0x51e   : > { %v3934_v18 = vpop.xlane.xlu1 %3933  ;;  %v3967_v30 = vpop.xlane.xlu0 %3966 }
 0x51f   : > { %4748 = vperm.xlu1 %5816, %v4742_v54   ;;  %6293 = vrcp.f32 %v3967_v30  ;;  %v4744_v30 = vld [vmem:[%s8830_s6 + $0x10] sm:$0xff] }
 0x520   : > { %6295 = vpow2.f32 %v3904_v19  ;;  %v4745_v19 = vld [vmem:[%s8830_s6 + $0x18] sm:$0xff] }
 0x521   : > { %6297 = vrcp.f32 %v3934_v18  ;;  %4110 = vadd.xlane.f32.xlu0 %v4109_v9 }
 0x522   : > { %6299 = vpow2.f32 %v3906_v41  ;;  %v3958_v5 = vpop.xlane.xlu1 %3957  ;;  %v3937_v17 = vpop.xlane.xlu0 %3936 }
 0x523   : > { %4753 = vperm.xlu1 %5816, %v4743_v49   ;;  %6301 = vrcp.f32 %v3937_v17 }
 0x524   : > { %6303 = vrcp.f32 %v3931_v63  ;;  %v6286_v33 = vpop.eup %6285  ;;  %v4103_v63 = vsel %vm3535_vm2, %v8529_v40, 0.0 }
 0x525   : > { %6305 = vrcp.f32 %v3958_v5  ;;  %4080 = vadd.xlane.f32.xlu0 %v4079_v32  ;;  %v4182_v41 = vmul.f32 %v6286_v33, %v8225_v47 }
 0x526   : > { %6307 = vrcp.f32 %v8460_v7  ;;  %v3961_v54 = vpop.xlane.xlu0 %3960 }
 0x527   : > { %4758 = vperm.xlu1 %5816, %v4744_v30   ;;  %6309 = vrcp.f32 %v3961_v54  ;;  %v8545_v30 = vpop.xlane.xlu1 %3975 }
 0x528   : > { %v6288_v52 = vpop.eup %6287  ;;  %6311 = vrcp.f32 %v8480_v15 }
 0x529   : > { %v8537_v18 = vpop.eup %6289  ;;  %4104 = vadd.xlane.f32.xlu0 %v4103_v63  ;;  %v4183_v7 = vmul.f32 %v6288_v52, %v8239_v39  ;;  %6313 = vrcp.f32 %v8471_v34  ;;  %v8923_v63 = vmov 0.0  }
 0x52a   : > { %v6292_v49 = vpop.eup %6291  ;;  %v8542_v9 = vpop.xlane.xlu0 %3969  ;;  %v4067_v32 = vsel %vm3535_vm2, %v8537_v18, 0.0  ;;  %6315 = vrcp.f32 %v8489_v45 }
 0x52b   : > { %4763 = vperm.xlu1 %5816, %v4745_v19   ;;  %v4251_v5 = vpack.c.bf16 %v4183_v7, %v4182_v41  ;;  %v4190_v39 = vmul.f32 %v6292_v49, %v8234_v3  ;;  %6317 = vrcp.f32 %v8478_v61 }
 0x52c   : > { %v6294_v17 = vpop.eup %6293  ;;  %6319 = vrcp.f32 %v8497_v42 }
 0x52d   : > { %v8549_v54 = vpop.eup %6295  ;;  %4068 = vadd.xlane.f32.xlu0 %v4067_v32  ;;  %v4293_v47 = vsel %vm3535_vm2, %v4251_v5, 0  ;;  %v4191_v15 = vmul.f32 %v6294_v17, %v8248_v60  ;;  %v8567_v17 = vpop.xlane.xlu1 %3999  ;;  %6321 = vrcp.f32 %v8487_v43 }
 0x52e   : > { %v6298_v33 = vpop.eup %6297  ;;  %5631 = vmatpush3.bf16.xpose.msra.mxu1 %v4293_v47  ;;  %v8555_v34 = vpop.xlane.xlu0 %3978  ;;  %v4088_v45 = vsel %vm3535_vm2, %v8549_v54, 0.0 }
 0x52f   : > { %v8557_v19 = vpop.eup %6299  ;;  %v4255_v52 = vpack.c.bf16 %v4191_v15, %v4190_v39  ;;  %5632 = vmatprep.subr.bf16.mxu1 %v8923_v63  ;;  %v4180_v60 = vmul.f32 %v6298_v33, %v8243_v37 }
 0x530   : > { %v6302_v41 = vpop.eup %6301  ;;  %v4091_v39 = vsel %vm3535_vm2, %v8557_v19, 0.0 }
 0x531   : > { %v6304_v7 = vpop.eup %6303  ;;  %4089 = vadd.xlane.f32.xlu0 %v4088_v45  ;;  %v4348_v3 = vsel %vm3535_vm2, %v4255_v52, 0  ;;  %v4181_v49 = vmul.f32 %v6302_v41, %v8258_v26 }
 0x532   : > { %v6306_v5 = vpop.eup %6305  ;;  %5643 = vmatpush3.bf16.xpose.msra.mxu0 %v4348_v3  ;;  %v8569_v61 = vpop.xlane.xlu0 %3993  ;;  %v4179_v33 = vmul.f32 %v6304_v7, %v8200_v36 }
 0x533   : > { %v6308_v32 = vpop.eup %6307  ;;  %v4250_v47 = vpack.c.bf16 %v4181_v49, %v4180_v60  ;;  %5644 = vmatprep.subr.bf16.mxu0 %v8923_v63  ;;  %v4188_v26 = vmul.f32 %v6306_v5, %v8254_v14  ;;  %v3988_v60 = vpop.xlane.xlu1 %3987 }
 0x534   : > { %v6310_v42 = vpop.eup %6309  ;;  %v4178_v45 = vmul.f32 %v6308_v32, %v8185_v59  ;;  %6323 = vrcp.f32 %v3988_v60  ;;  %v8924_v60 = vld [vmem:[#allocation13_spill] sm:$0xff] }
 0x535   : > { %4092 = vadd.xlane.f32.xlu0 %v4091_v39  ;;  %v4290_v37 = vsel %vm3535_vm2, %v4250_v47, 0  ;;  %v4189_v15 = vmul.f32 %v6310_v42, %v8268_v58  ;;  %v6312_v52 = vpop.eup %6311 }
 0x536   : > { %5633 = vmatpush3.bf16.xpose.msra.mxu1 %v4290_v37  ;;  %v8579_v41 = vpop.xlane.xlu0 %4002  ;;  %v6314_v3 = vpop.eup %6313  ;;  %v4249_v47 = vpack.c.bf16 %v4179_v33, %v4178_v45  ;;  %v4187_v14 = vmul.f32 %v6312_v52, %v8210_v51 }
 0x537   : > { %v4254_v43 = vpack.c.bf16 %v4189_v15, %v4188_v26  ;;  %5634 = vmatprep.subr.bf16.mxu1 %v8923_v63  ;;  %v6316_v5 = vpop.eup %6315  ;;  %v4186_v36 = vmul.f32 %v6314_v3, %v8195_v55  ;;  %v4012_v37 = vpop.xlane.xlu1 %4011 }
 0x538   : > { %v6318_v7 = vpop.eup %6317  ;;  %v4287_v42 = vsel %vm3535_vm2, %v4249_v47, 0  ;;  %v4177_v59 = vmul.f32 %v6316_v5, %v8217_v11  ;;  %v8925_v47 = vld [vmem:[#allocation6_spill] sm:$0xff] }
 0x539   : > { %v4345_v49 = vsel %vm3535_vm2, %v4254_v43, 0  ;;  %v4253_v39 = vpack.c.bf16 %v4187_v14, %v4186_v36  ;;  %v6320_v32 = vpop.eup %6319  ;;  %v4176_v51 = vmul.f32 %v6318_v7, %v8202_v29  ;;  %v2132_v14 = vadd.f32 %v8925_v47, %v8924_v60 }
 0x53a   : > { %5645 = vmatpush3.bf16.xpose.msra.mxu0 %v4345_v49  ;;  %v3973_v58 = vpop.xlane.xlu0 %3972  ;;  %v6322_v15 = vpop.eup %6321  ;;  %v4185_v52 = vmul.f32 %v6320_v32, %v8229_v53  ;;  %v1944_v53 = vld [vmem:[%s8828_s4 + $0x58] sm:$0xff] }
 0x53b   : > { %5646 = vmatprep.subr.bf16.mxu0 %v8923_v63  ;;  %v4342_v33 = vsel %vm3535_vm2, %v4253_v39, 0  ;;  %v4248_v55 = vpack.c.bf16 %v4177_v59, %v4176_v51  ;;  %v4184_v11 = vmul.f32 %v6322_v15, %v8212_v62  ;;  %v3982_v45 = vpop.xlane.xlu1 %3981  ;;  %v2174_v7 = vcombine.high %v2132_v14, %v2132_v14 }
 0x53d   : > { %v4284_v3 = vsel %vm3535_vm2, %v4248_v55, 0  ;;  %v4252_v49 = vpack.c.bf16 %v4185_v52, %v4184_v11  ;;  %v4241_v32 = vpack.c.bf16 %v2174_v7, %v2174_v7 }
 0x53e   : > { %5635 = vmatpush3.bf16.xpose.msra.mxu1 %v4287_v42  ;;  %v8589_v26 = vpop.xlane.xlu0 %3996  ;;  %v4240_v42 = vpack.c.bf16 %v2132_v14, %v2132_v14 }
 0x53f   : > { %5636 = vmatprep.subr.bf16.mxu1 %v8923_v63  ;;  %v4339_v62 = vsel %vm3535_vm2, %v4252_v49, 0  ;;  %v4006_v5 = vpop.xlane.xlu1 %4005 }
 0x541   : > { %v6324_v39 = vpop.eup %6323 }
 0x542   : > { %5647 = vmatpush3.bf16.xpose.msra.mxu0 %v4342_v33  ;;  %v3991_v43 = vpop.xlane.xlu0 %3990  ;;  %v4198_v51 = vmul.f32 %v6324_v39, %v8289_v48 }
 0x543   : > { %6325 = vrcp.f32 %v3991_v43  ;;  %5648 = vmatprep.subr.bf16.mxu0 %v8923_v63  ;;  %v8645_v39 = vpop.xlane.xlu1 %4047 }
 0x544   : > { %6327 = vrcp.f32 %v4012_v37 }
 0x546   : > { %5637 = vmatpush3.bf16.xpose.msra.mxu1 %v4284_v3  ;;  %v4015_v29 = vpop.xlane.xlu0 %4014 }
 0x547   : > { %6329 = vrcp.f32 %v4015_v29  ;;  %5654 = vmatprep.subr.bf16.mxu1 %v8923_v63 }
 0x548   : > { %6331 = vrcp.f32 %v3982_v45 }
 0x54a   : > { %5649 = vmatpush3.bf16.xpose.msra.mxu0 %v4339_v62  ;;  %v3985_v36 = vpop.xlane.xlu0 %3984 }
 0x54b   : > { %6333 = vrcp.f32 %v3985_v36  ;;  %2002 = vperm.xlu0 %5815, %v1944_v53   ;;  %5666 = vmatprep.subr.bf16.mxu0 %v8923_v63 }
 0x54c   : > { %6335 = vrcp.f32 %v8555_v34 }
 0x54d   : > { %6337 = vrcp.f32 %v4006_v5  ;;  %5639 = vmatmul.mubr.msk.bf16.vlgmr.msra.gmra.mxu1 %vm3535_vm2, %v4240_v42 }
 0x54e   : > { %6339 = vrcp.f32 %v8545_v30  ;;  %v4009_v59 = vpop.xlane.xlu0 %4008  ;;  %5662 = vmatprep.mubr.msk.bf16.mxu1 %vm6484_vm3, %v8923_v63 }
 0x54f   : > { %6341 = vrcp.f32 %v4009_v59 }
 0x550   : > { %v6326_v37 = vpop.eup %6325  ;;  %6343 = vrcp.f32 %v8579_v41 }
 0x551   : > { %5651 = vmatmul.mubr.msk.bf16.vlgmr.msra.gmra.mxu0 %vm3535_vm2, %v4241_v32  ;;  %v4199_v34 = vmul.f32 %v6326_v37, %v8328_v6  ;;  %v6328_v15 = vpop.eup %6327  ;;  %6345 = vrcp.f32 %v8567_v17 }
 0x552   : > { %v8615_v33 = vpop.xlane.xlu0 %4023  ;;  %5674 = vmatprep.mubr.msk.bf16.mxu0 %vm6484_vm3, %v8923_v63  ;;  %6347 = vrcp.f32 %v3973_v58  ;;  %v4206_v41 = vmul.f32 %v6328_v15, %v8298_v35 }
 0x553   : > { %v4259_v30 = vpack.c.bf16 %v4199_v34, %v4198_v51  ;;  %6349 = vrcp.f32 %v8542_v9  ;;  %v4036_v34 = vpop.xlane.xlu1 %4035 }
 0x554   : > { %v6330_v55 = vpop.eup %6329  ;;  %6351 = vrcp.f32 %v8589_v26 }
 0x555   : > { %v4403_v52 = vsel %vm3535_vm2, %v4259_v30, 0  ;;  %v4207_v43 = vmul.f32 %v6330_v55, %v8340_v31  ;;  %v6332_v48 = vpop.eup %6331  ;;  %6353 = vrcp.f32 %v8569_v61 }
 0x556   : > { %5655 = vmatpush3.bf16.xpose.msra.mxu1 %v4403_v52  ;;  %v8623_v6 = vpop.xlane.xlu0 %4026  ;;  %v4196_v3 = vmul.f32 %v6332_v48, %v8307_v56  ;;  %6355 = vrcp.f32 %v4036_v34 }
 0x557   : > { %v4263_v11 = vpack.c.bf16 %v4207_v43, %v4206_v41  ;;  %5656 = vmatprep.subr.bf16.mxu1 %v8923_v63  ;;  %v1993_v43 = vpop.permute.xlu1 %1992 }
 0x558   : > { %v6334_v45 = vpop.eup %6333 }
 0x559   : > { %v6336_v17 = vpop.eup %6335  ;;  %v4458_v58 = vsel %vm3535_vm2, %v4263_v11, 0  ;;  %v4197_v35 = vmul.f32 %v6334_v45, %v8345_v8 }
 0x55a   : > { %v6338_v31 = vpop.eup %6337  ;;  %5667 = vmatpush3.bf16.xpose.msra.mxu0 %v4458_v58  ;;  %v8631_v49 = vpop.xlane.xlu0 %4050  ;;  %v4195_v56 = vmul.f32 %v6336_v17, %v8286_v23  ;;  %v8926_v17 = vld [vmem:[#allocation8_spill] sm:$0xff] }
 0x55b   : > { %v6340_v29 = vpop.eup %6339  ;;  %v4258_v9 = vpack.c.bf16 %v4197_v35, %v4196_v3  ;;  %5668 = vmatprep.subr.bf16.mxu0 %v8923_v63  ;;  %v4204_v26 = vmul.f32 %v6338_v31, %v8319_v27 }
 0x55c   : > { %v6342_v60 = vpop.eup %6341  ;;  %v4194_v61 = vmul.f32 %v6340_v29, %v8263_v46 }
 0x55d   : > { %v4400_v47 = vsel %vm3535_vm2, %v4258_v9, 0  ;;  %v4205_v14 = vmul.f32 %v6342_v60, %v8350_v20  ;;  %v6344_v8 = vpop.eup %6343 }
 0x55e   : > { %5657 = vmatpush3.bf16.xpose.msra.mxu1 %v4400_v47  ;;  %v8639_v53 = vpop.xlane.xlu0 %4017  ;;  %v6346_v5 = vpop.eup %6345  ;;  %v4257_v7 = vpack.c.bf16 %v4195_v56, %v4194_v61  ;;  %v4203_v42 = vmul.f32 %v6344_v8, %v8300_v13 }
 0x55f   : > { %v4262_v62 = vpack.c.bf16 %v4205_v14, %v4204_v26  ;;  %5658 = vmatprep.subr.bf16.mxu1 %v8923_v63  ;;  %v6348_v27 = vpop.eup %6347  ;;  %v4202_v20 = vmul.f32 %v6346_v5, %v8273_v4 }
 0x560   : > { %v6350_v59 = vpop.eup %6349  ;;  %v4397_v32 = vsel %vm3535_vm2, %v4257_v7, 0  ;;  %v4193_v37 = vmul.f32 %v6348_v27, %v8316_v0 }
 0x561   : > { %v4455_v36 = vsel %vm3535_vm2, %v4262_v62, 0  ;;  %v4261_v46 = vpack.c.bf16 %v4203_v42, %v4202_v20  ;;  %v6352_v51 = vpop.eup %6351  ;;  %v4192_v15 = vmul.f32 %v6350_v59, %v8278_v25  ;;  %v2135_v25 = vadd.f32 %v8926_v17, %v1993_v43  ;;  %v8930_v43 = vld [vmem:[#allocation25_spill] sm:$0xff]  ;;  %v8931_v17 = vld [vmem:[#allocation22_spill] sm:$0xff] }
 0x562   : > { %5669 = vmatpush3.bf16.xpose.msra.mxu0 %v4455_v36  ;;  %v8647_v23 = vpop.xlane.xlu0 %4020  ;;  %v6354_v30 = vpop.eup %6353  ;;  %v4201_v4 = vmul.f32 %v6352_v51, %v8325_v22  ;;  %v8927_v51 = vld [vmem:[#allocation11_spill] sm:$0xff] }
 0x563   : > { %5670 = vmatprep.subr.bf16.mxu0 %v8923_v63  ;;  %v4452_v55 = vsel %vm3535_vm2, %v4261_v46, 0  ;;  %v4256_v52 = vpack.c.bf16 %v4193_v37, %v4192_v15  ;;  %v4200_v0 = vmul.f32 %v6354_v30, %v8293_v21  ;;  %v2175_v3 = vcombine.high %v2135_v25, %v2135_v25  ;;  %v6356_v60 = vpop.eup %6355 }
 0x564   : > { %v4242_v35 = vpack.c.bf16 %v2135_v25, %v2135_v25  ;;  %v4214_v14 = vmul.f32 %v6356_v60, %v8354_v50  ;;  %v8933_v60 = vld [vmem:[#allocation26_spill] sm:$0xff] }
 0x565   : > { %v4394_v48 = vsel %vm3535_vm2, %v4256_v52, 0  ;;  %v4260_v11 = vpack.c.bf16 %v4201_v4, %v4200_v0  ;;  %v4243_v31 = vpack.c.bf16 %v2175_v3, %v2175_v3 }
 0x566   : > { %5659 = vmatpush3.bf16.xpose.msra.mxu1 %v4397_v32  ;;  %v8653_v13 = vpop.xlane.xlu0 %4041 }
 0x567   : > { %5660 = vmatprep.subr.bf16.mxu1 %v8923_v63  ;;  %v4449_v58 = vsel %vm3535_vm2, %v4260_v11, 0 }
 0x56a   : > { %5671 = vmatpush3.bf16.xpose.msra.mxu0 %v4452_v55  ;;  %v4045_v41 = vpop.xlane.xlu0 %4044 }
 0x56b   : > { %5672 = vmatprep.subr.bf16.mxu0 %v8923_v63 }
 0x56e   : > { %5661 = vmatpush3.bf16.xpose.msra.mxu1 %v4394_v48  ;;  %v4060_v45 = vpop.xlane.xlu0 %4059 }
 0x56f   : > { %5678 = vmatprep.subr.bf16.mxu1 %v8923_v63 }
 0x572   : > { %5673 = vmatpush3.bf16.xpose.msra.mxu0 %v4449_v58  ;;  %v4030_v22 = vpop.xlane.xlu0 %4029 }
 0x573   : > { %5690 = vmatprep.subr.bf16.mxu0 %v8923_v63 }
 0x575   : > { %5663 = vmatmul.mubr.msk.bf16.vlgmr.msra.gmra.mxu1 %vm3535_vm2, %v4242_v35  ;;  %v8932_v35 = vld [vmem:[#allocation27_spill] sm:$0xff] }
 0x576   : > { %v4039_v21 = vpop.xlane.xlu0 %4038  ;;  %5686 = vmatprep.mubr.msk.bf16.mxu1 %vm6484_vm3, %v8923_v63 }
 0x577   : > { %6357 = vrcp.f32 %v4039_v21 }
 0x578   : > { %6359 = vrcp.f32 %v4060_v45 }
 0x579   : > { %5675 = vmatmul.mubr.msk.bf16.vlgmr.msra.gmra.mxu0 %vm3535_vm2, %v4243_v31 }
 0x57a   : > { %v4054_v29 = vpop.xlane.xlu0 %4053  ;;  %5698 = vmatprep.mubr.msk.bf16.mxu0 %vm6484_vm3, %v8923_v63 }
 0x57e   : > { %v4063_v9 = vpop.xlane.xlu0 %4062 }
 0x57f   : > { %6361 = vrcp.f32 %v4063_v9 }
 0x580   : > { %6363 = vrcp.f32 %v4030_v22 }
 0x582   : > { %v4033_v47 = vpop.xlane.xlu0 %4032 }
 0x583   : > { %6365 = vrcp.f32 %v4033_v47 }
 0x584   : > { %v6358_v26 = vpop.eup %6357  ;;  %6367 = vrcp.f32 %v8623_v6 }
 0x585   : > { %6369 = vrcp.f32 %v4054_v29  ;;  %v4215_v56 = vmul.f32 %v6358_v26, %v8411_v2  ;;  %v6360_v5 = vpop.eup %6359 }
 0x586   : > { %6371 = vrcp.f32 %v8615_v33  ;;  %v4057_v8 = vpop.xlane.xlu0 %4056  ;;  %v4222_v2 = vmul.f32 %v6360_v5, %v8401_v44  ;;  %v8935_v5 = vld [vmem:[#allocation10_spill] sm:$0xff] }
 0x587   : > { %6373 = vrcp.f32 %v4057_v8  ;;  %v4267_v62 = vpack.c.bf16 %v4215_v56, %v4214_v14  ;;  %v4096_v11 = vpop.xlane.xlu1 %4095  ;;  %v8934_v8 = vld [vmem:[#allocation9_spill] sm:$0xff] }
 0x588   : > { %6375 = vrcp.f32 %v8631_v49 }
 0x589   : > { %v4513_v61 = vsel %vm3535_vm2, %v4267_v62, 0  ;;  %6377 = vrcp.f32 %v8645_v39 }
 0x58a   : > { %5679 = vmatpush3.bf16.xpose.msra.mxu1 %v4513_v61  ;;  %v8678_v36 = vpop.xlane.xlu0 %4071  ;;  %6379 = vrcp.f32 %v8647_v23 }
 0x58b   : > { %5680 = vmatprep.subr.bf16.mxu1 %v8923_v63  ;;  %6381 = vrcp.f32 %v8639_v53 }
 0x58c   : > { %v6362_v50 = vpop.eup %6361  ;;  %6383 = vrcp.f32 %v4045_v41 }
 0x58d   : > { %v4223_v33 = vmul.f32 %v6362_v50, %v8422_v10  ;;  %v6364_v6 = vpop.eup %6363  ;;  %6385 = vrcp.f32 %v8653_v13  ;;  %v8929_v13 = vld [vmem:[#allocation23_spill] sm:$0xff] }
 0x58e   : > { %v8685_v7 = vpop.xlane.xlu0 %4074  ;;  %v4212_v20 = vmul.f32 %v6364_v6, %v8406_v38  ;;  %v8928_v38 = vld [vmem:[#allocation24_spill] sm:$0xff] }
 0x58f   : > { %v4271_v49 = vpack.c.bf16 %v4223_v33, %v4222_v2 }
 0x590   : > { %v6366_v42 = vpop.eup %6365 }
 0x591   : > { %v6368_v27 = vpop.eup %6367  ;;  %v4568_v39 = vsel %vm3535_vm2, %v4271_v49, 0  ;;  %v4213_v59 = vmul.f32 %v6366_v42, %v8431_v57  ;;  %v8936_v42 = vld [vmem:[#allocation5_spill] sm:$0xff] }
 0x592   : > { %v6370_v23 = vpop.eup %6369  ;;  %5691 = vmatpush3.bf16.xpose.msra.mxu0 %v4568_v39  ;;  %v8691_v44 = vpop.xlane.xlu0 %4098  ;;  %v4211_v15 = vmul.f32 %v6368_v27, %v8928_v38 }
 0x593   : > { %v6372_v10 = vpop.eup %6371  ;;  %v4266_v32 = vpack.c.bf16 %v4213_v59, %v4212_v20  ;;  %5692 = vmatprep.subr.bf16.mxu0 %v8923_v63  ;;  %v4220_v37 = vmul.f32 %v6370_v23, %v8417_v16  ;;  %v4084_v29 = vpop.xlane.xlu1 %4083 }
 0x594   : > { %v6374_v53 = vpop.eup %6373  ;;  %v4210_v52 = vmul.f32 %v6372_v10, %v8929_v13  ;;  %6387 = vrcp.f32 %v4084_v29 }
 0x595   : > { %v4510_v46 = vsel %vm3535_vm2, %v4266_v32, 0  ;;  %v4221_v34 = vmul.f32 %v6374_v53, %v8927_v51  ;;  %v6376_v57 = vpop.eup %6375 }
 0x596   : > { %5681 = vmatpush3.bf16.xpose.msra.mxu1 %v4510_v46  ;;  %v8699_v30 = vpop.xlane.xlu0 %4065  ;;  %v6378_v4 = vpop.eup %6377  ;;  %v4265_v0 = vpack.c.bf16 %v4211_v15, %v4210_v52  ;;  %v4219_v48 = vmul.f32 %v6376_v57, %v8930_v43 }
 0x597   : > { %v4270_v55 = vpack.c.bf16 %v4221_v34, %v4220_v37  ;;  %5682 = vmatprep.subr.bf16.mxu1 %v8923_v63  ;;  %v6380_v16 = vpop.eup %6379  ;;  %v4218_v25 = vmul.f32 %v6378_v4, %v8931_v17  ;;  %v1998_v2 = vpop.permute.xlu1 %1997  ;;  %v8937_v37 = vld [vmem:[#allocation18_spill] sm:$0xff] }
 0x598   : > { %v6382_v58 = vpop.eup %6381  ;;  %v4507_v22 = vsel %vm3535_vm2, %v4265_v0, 0  ;;  %v4209_v21 = vmul.f32 %v6380_v16, %v8932_v35  ;;  %v2140_v27 = vadd.f32 %v8936_v42, %v1998_v2  ;;  %v8939_v16 = vld [vmem:[#allocation28_spill] sm:$0xff] }
 0x599   : > { %v4565_v41 = vsel %vm3535_vm2, %v4270_v55, 0  ;;  %v4269_v3 = vpack.c.bf16 %v4219_v48, %v4218_v25  ;;  %v6384_v31 = vpop.eup %6383  ;;  %v4208_v47 = vmul.f32 %v6382_v58, %v8933_v60 }
 0x59a   : > { %5693 = vmatpush3.bf16.xpose.msra.mxu0 %v4565_v41  ;;  %v4108_v45 = vpop.xlane.xlu0 %4107  ;;  %v6386_v26 = vpop.eup %6385  ;;  %v4217_v62 = vmul.f32 %v6384_v31, %v8934_v8  ;;  %v2176_v59 = vcombine.high %v2140_v27, %v2140_v27  ;;  %v4244_v23 = vpack.c.bf16 %v2140_v27, %v2140_v27 }
 0x59b   : > { %5694 = vmatprep.subr.bf16.mxu0 %v8923_v63  ;;  %v4562_v14 = vsel %vm3535_vm2, %v4269_v3, 0  ;;  %v4264_v56 = vpack.c.bf16 %v4209_v21, %v4208_v47  ;;  %v4216_v50 = vmul.f32 %v6386_v26, %v8935_v5  ;;  %v8940_v21 = vld [vmem:[#allocation15_spill] sm:$0xff] }
 0x59c   : > { %v4245_v53 = vpack.c.bf16 %v2176_v59, %v2176_v59 }
 0x59d   : > { %v4504_v33 = vsel %vm3535_vm2, %v4264_v56, 0  ;;  %v4268_v6 = vpack.c.bf16 %v4217_v62, %v4216_v50  ;;  %v8942_v56 = vld [vmem:[#allocation16_spill] sm:$0xff] }
 0x59e   : > { %5683 = vmatpush3.bf16.xpose.msra.mxu1 %v4507_v22  ;;  %v4078_v9 = vpop.xlane.xlu0 %4077 }
 0x59f   : > { %5684 = vmatprep.subr.bf16.mxu1 %v8923_v63  ;;  %v4559_v39 = vsel %vm3535_vm2, %v4268_v6, 0  ;;  %v8944_v6 = vld [vmem:[#allocation17_spill] sm:$0xff] }
 0x5a1   : > { %v6388_v10 = vpop.eup %6387 }
 0x5a2   : > { %5695 = vmatpush3.bf16.xpose.msra.mxu0 %v4562_v14  ;;  %v4087_v61 = vpop.xlane.xlu0 %4086  ;;  %v4230_v51 = vmul.f32 %v6388_v10, %v8937_v37 }
 0x5a3   : > { %6389 = vrcp.f32 %v4087_v61  ;;  %5696 = vmatprep.subr.bf16.mxu0 %v8923_v63 }
 0x5a4   : > { %6391 = vrcp.f32 %v4108_v45 }
 0x5a6   : > { %5685 = vmatpush3.bf16.xpose.msra.mxu1 %v4504_v33  ;;  %v4102_v49 = vpop.xlane.xlu0 %4101 }
 0x5a7   : > { %5702 = vmatprep.subr.bf16.mxu1 %v8923_v63 }
 0x5aa   : > { %5697 = vmatpush3.bf16.xpose.msra.mxu0 %v4559_v39  ;;  %v4111_v20 = vpop.xlane.xlu0 %4110 }
 0x5ab   : > { %6393 = vrcp.f32 %v4111_v20  ;;  %5714 = vmatprep.subr.bf16.mxu0 %v8923_v63 }
 0x5ac   : > { %6395 = vrcp.f32 %v4078_v9  ;;  %v8941_v9 = vld [vmem:[#allocation14_spill] sm:$0xff] }
 0x5ad   : > { %5687 = vmatmul.mubr.msk.bf16.vlgmr.msra.gmra.mxu1 %vm3535_vm2, %v4244_v23 }
 0x5ae   : > { %v4081_v32 = vpop.xlane.xlu0 %4080  ;;  %5710 = vmatprep.mubr.msk.bf16.mxu1 %vm6484_vm3, %v8923_v63 }
 0x5af   : > { %6397 = vrcp.f32 %v4081_v32  ;;  %v8945_v32 = vld [vmem:[#allocation7_spill] sm:$0xff] }
 0x5b0   : > { %v6390_v46 = vpop.eup %6389  ;;  %6399 = vrcp.f32 %v8685_v7 }
 0x5b1   : > { %6401 = vrcp.f32 %v4102_v49  ;;  %5699 = vmatmul.mubr.msk.bf16.vlgmr.msra.gmra.mxu0 %vm3535_vm2, %v4245_v53  ;;  %v4231_v34 = vmul.f32 %v6390_v46, %v8491_v12  ;;  %v6392_v7 = vpop.eup %6391  ;;  %v8938_v12 = vld [vmem:[#allocation21_spill] sm:$0xff] }
 0x5b2   : > { %6403 = vrcp.f32 %v8678_v36  ;;  %v4105_v38 = vpop.xlane.xlu0 %4104  ;;  %5722 = vmatprep.mubr.msk.bf16.mxu0 %vm6484_vm3, %v8923_v63  ;;  %v4238_v36 = vmul.f32 %v6392_v7, %v8938_v12  ;;  %v6159_v12 = vld [vmem:[%s8829_s5] sm:$0xff]  }
 0x5b3   : > { %6405 = vrcp.f32 %v4105_v38  ;;  %v4275_v15 = vpack.c.bf16 %v4231_v34, %v4230_v51 }
 0x5b4   : > { %6407 = vrcp.f32 %v8691_v44 }
 0x5b5   : > { %v4623_v57 = vsel %vm3535_vm2, %v4275_v15, 0  ;;  %6409 = vrcp.f32 %v4096_v11 }
 0x5b6   : > { %5703 = vmatpush3.bf16.xpose.msra.mxu1 %v4623_v57  ;;  %v4069_v55 = vpop.xlane.xlu0 %4068 }
 0x5b7   : > { %5704 = vmatprep.subr.bf16.mxu1 %v8923_v63  ;;  %6411 = vrcp.f32 %v4069_v55 }
 0x5b8   : > { %v6394_v13 = vpop.eup %6393  ;;  %6413 = vrcp.f32 %v8699_v30 }
 0x5b9   : > { %v4239_v52 = vmul.f32 %v6394_v13, %v8515_v1  ;;  %v6396_v4 = vpop.eup %6395 }
 0x5ba   : > { %v4090_v41 = vpop.xlane.xlu0 %4089  ;;  %v4228_v45 = vmul.f32 %v6396_v4, %v8939_v16 }
 0x5bb   : > { %v4279_v0 = vpack.c.bf16 %v4239_v52, %v4238_v36  ;;  %6415 = vrcp.f32 %v4090_v41 }
 0x5bc   : > { %v6398_v44 = vpop.eup %6397 }
 0x5bd   : > { %v6400_v43 = vpop.eup %6399  ;;  %v4678_v48 = vsel %vm3535_vm2, %v4279_v0, 0  ;;  %v4229_v11 = vmul.f32 %v6398_v44, %v8522_v28 }
 0x5be   : > { %v6402_v17 = vpop.eup %6401  ;;  %5715 = vmatpush3.bf16.xpose.msra.mxu0 %v4678_v48  ;;  %v4093_v25 = vpop.xlane.xlu0 %4092  ;;  %v4227_v31 = vmul.f32 %v6400_v43, %v8940_v21 }
 0x5bf   : > { %v6404_v58 = vpop.eup %6403  ;;  %6417 = vrcp.f32 %v4093_v25  ;;  %v4274_v1 = vpack.c.bf16 %v4229_v11, %v4228_v45  ;;  %5716 = vmatprep.subr.bf16.mxu0 %v8923_v63  ;;  %v4236_v3 = vmul.f32 %v6402_v17, %v8506_v24  ;;  %v8943_v24 = vld [vmem:[#allocation12_spill] sm:$0xff] }
 0x5c0   : > { %v6406_v22 = vpop.eup %6405  ;;  %v4226_v60 = vmul.f32 %v6404_v58, %v8941_v9 }
 0x5c1   : > { %v4620_v30 = vsel %vm3535_vm2, %v4274_v1, 0  ;;  %v4237_v35 = vmul.f32 %v6406_v22, %v8529_v40  ;;  %v6408_v29 = vpop.eup %6407 }
 0x5c2   : > { %5705 = vmatpush3.bf16.xpose.msra.mxu1 %v4620_v30  ;;  %v6410_v47 = vpop.eup %6409  ;;  %v4273_v14 = vpack.c.bf16 %v4227_v31, %v4226_v60  ;;  %v4235_v8 = vmul.f32 %v6408_v29, %v8942_v56 }
 0x5c3   : > { %v4278_v28 = vpack.c.bf16 %v4237_v35, %v4236_v3  ;;  %5706 = vmatprep.subr.bf16.mxu1 %v8923_v63  ;;  %v4234_v40 = vmul.f32 %v6410_v47, %v8943_v24 }
 0x5c4   : > { %v6412_v62 = vpop.eup %6411  ;;  %v4617_v5 = vsel %vm3535_vm2, %v4273_v14, 0 }
 0x5c5   : > { %v4675_v26 = vsel %vm3535_vm2, %v4278_v28, 0  ;;  %v6414_v61 = vpop.eup %6413  ;;  %v4277_v50 = vpack.c.bf16 %v4235_v8, %v4234_v40  ;;  %v4225_v2 = vmul.f32 %v6412_v62, %v8537_v18  ;;  %v6160_v8 = vld [vmem:[%s8829_s5 + $0x8] sm:$0xff]   ;;  %v4749_v62 = vpop.permute.xlu1 %4748 }
 0x5c6   : > { %5717 = vmatpush3.bf16.xpose.msra.mxu0 %v4675_v26  ;;  %v4224_v49 = vmul.f32 %v6414_v61, %v8944_v6  ;;  %v2003_v23 = vpop.permute.xlu0 %2002 }
 0x5c7   : > { %5718 = vmatprep.subr.bf16.mxu0 %v8923_v63  ;;  %v4672_v27 = vsel %vm3535_vm2, %v4277_v50, 0  ;;  %v2143_v53 = vadd.f32 %v8945_v32, %v2003_v23 }
 0x5c8   : > { %v6416_v33 = vpop.eup %6415  ;;  %v4272_v39 = vpack.c.bf16 %v4225_v2, %v4224_v49 }
 0x5c9   : > { %v4232_v59 = vmul.f32 %v6416_v33, %v8549_v54  ;;  %v2177_v37 = vcombine.high %v2143_v53, %v2143_v53  ;;  %v4246_v51 = vpack.c.bf16 %v2143_v53, %v2143_v53  ;;  %v4754_v24 = vpop.permute.xlu1 %4753 }
 0x5ca   : > { %5707 = vmatpush3.bf16.xpose.msra.mxu1 %v4617_v5  ;;  %v4614_v18 = vsel %vm3535_vm2, %v4272_v39, 0 }
 0x5cb   : > { %5708 = vmatprep.subr.bf16.mxu1 %v8923_v63 }
 0x5cc   : > { %v6418_v42 = vpop.eup %6417 }
 0x5cd   : > { %v4233_v20 = vmul.f32 %v6418_v42, %v8557_v19  ;;  %v4247_v19 = vpack.c.bf16 %v2177_v37, %v2177_v37  ;;  %v4759_v40 = vpop.permute.xlu1 %4758 }
 0x5ce   : > { %5719 = vmatpush3.bf16.xpose.msra.mxu0 %v4672_v27 }
 0x5cf   : > { %5720 = vmatprep.subr.bf16.mxu0 %v8923_v63  ;;  %v4276_v10 = vpack.c.bf16 %v4233_v20, %v4232_v59 }
 0x5d1   : > { %v4669_v46 = vsel %vm3535_vm2, %v4276_v10, 0  ;;  %v4764_v33 = vpop.permute.xlu1 %4763 }
 0x5d2   : > { %5709 = vmatpush3.bf16.xpose.msra.mxu1 %v4614_v18 }
 0x5d6   : > { %5721 = vmatpush3.bf16.xpose.msra.mxu0 %v4669_v46 }
 0x5d9   : > { %5711 = vmatmul.mubr.msk.bf16.vlgmr.msra.gmra.mxu1 %vm3535_vm2, %v4246_v51 }
 0x5da   : > { %5730 = vmatprep.mubr.msk.bf16.mxu1 %vm1751_vm0, %v6159_v12 }
 0x5dd   : > { %5723 = vmatmul.mubr.msk.bf16.vlgmr.msra.gmra.mxu0 %vm3535_vm2, %v4247_v19 }
 0x60d   : > { %v4329_v63 = vpop.f32.mrf.mxu1 }
 0x60f   : > { %v5640_v34 = vpop.f32.mrf.mxu1 }
 0x611   : > { %v4332_v54 = vpop.f32.mrf.mxu1  ;;  %v4384_v38 = vpop.f32.mrf.mxu0 }
 0x612   : > { %v4732_v15 = vcombine.low %v4329_v63, %v4384_v38 }
 0x613   : > { %v5641_v57 = vpop.f32.mrf.mxu1  ;;  %v5652_v7 = vpop.f32.mrf.mxu0 }
 0x615   : > { %v4387_v55 = vpop.f32.mrf.mxu0 }
 0x617   : > { %v5653_v13 = vpop.f32.mrf.mxu0 }
 0x635   : > { %v4439_v36 = vpop.f32.mrf.mxu1 }
 0x637   : > { %v5664_v52 = vpop.f32.mrf.mxu1 }
 0x639   : > { %v4442_v4 = vpop.f32.mrf.mxu1  ;;  %v4494_v41 = vpop.f32.mrf.mxu0 }
 0x63a   : > { %v4733_v0 = vcombine.low %v4439_v36, %v4494_v41 }
 0x63b   : > { %v5665_v44 = vpop.f32.mrf.mxu1  ;;  %v5676_v43 = vpop.f32.mrf.mxu0 }
 0x63c   : > { %v4740_v48 = vpack.c.bf16 %v4733_v0, %v4732_v15 }
 0x63d   : > { %v4497_v16 = vpop.f32.mrf.mxu0 }
 0x63f   : > { %v5677_v45 = vpop.f32.mrf.mxu0 }
 0x66d   : > { %v4549_v11 = vpop.f32.mrf.mxu1 }
 0x66f   : > { %v5688_v17 = vpop.f32.mrf.mxu1 }
 0x671   : > { %v4552_v25 = vpop.f32.mrf.mxu1  ;;  %v4604_v58 = vpop.f32.mrf.mxu0 }
 0x672   : > { %v4734_v28 = vcombine.low %v4549_v11, %v4604_v58 }
 0x673   : > { %v5689_v1 = vpop.f32.mrf.mxu1  ;;  %v5700_v22 = vpop.f32.mrf.mxu0 }
 0x675   : > { %v4607_v30 = vpop.f32.mrf.mxu0 }
 0x677   : > { %v5701_v3 = vpop.f32.mrf.mxu0 }
 0x699   : > { %v4659_v35 = vpop.f32.mrf.mxu1 }
 0x69b   : > { %v5712_v21 = vpop.f32.mrf.mxu1 }
 0x69d   : > { %v4662_v31 = vpop.f32.mrf.mxu1  ;;  %v4714_v29 = vpop.f32.mrf.mxu0 }
 0x69e   : > { %v4735_v9 = vcombine.low %v4659_v35, %v4714_v29 }
 0x69f   : > { %v5713_v60 = vpop.f32.mrf.mxu1  ;;  %v5724_v47 = vpop.f32.mrf.mxu0 }
 0x6a0   : > { %v4741_v26 = vpack.c.bf16 %v4735_v9, %v4734_v28 }
 0x6a1   : > { %v4717_v14 = vpop.f32.mrf.mxu0 }
 0x6a2   : > { %5726 = vmatprep.subr.bf16.mxu1 %v4741_v26 }
 0x6a3   : > { %v5725_v56 = vpop.f32.mrf.mxu0  ;;  %5727 = vmatpush3.bf16.msra.mxu1 %v4741_v26 }
 0x6a4   : > { %5728 = vmatprep.subr.bf16.mxu1 %v4740_v48 }
 0x6a7   : > { %5729 = vmatpush3.bf16.msra.mxu1 %v4740_v48 }
 0x6aa   : > { %5731 = vmatmul.mubr.msk.bf16.vlgmr.msra.gmra.mxu1 %vm1751_vm0, %v6160_v8 }
 0x76a   : > { %v5732_v61 = vpop.f32.mrf.mxu1 }
 0x76b   : > { %v4825_v5 = vadd.f32 %v5732_v61, %v4759_v40 }
 0x76c   : > { %v4816_v50 = vpop.f32.mrf.mxu1 }
 0x76d   : > { %4833 = vst.msk [vmem:[%s271_s29 + $0x10] sm:$0xff] %vm3535_vm2, %v4825_v5  ;;  %v4817_v2 = vadd.f32 %v4816_v50, %v4749_v62 }
 0x76e   : > { %v5733_v6 = vpop.f32.mrf.mxu1 }
 0x76f   : > { %4831 = vst.msk [vmem:[%s271_s29] sm:$0xff] %vm3535_vm2, %v4817_v2  ;;  %v4828_v49 = vadd.f32 %v5733_v6, %v4764_v33 }
 0x770   : > { %v4819_v42 = vpop.f32.mrf.mxu1 }
 0x771   : > { %4834 = vst.msk [vmem:[%s271_s29 + $0x18] sm:$0xff] %vm3535_vm2, %v4828_v49  ;;  %v4820_v27 = vadd.f32 %v4819_v42, %v4754_v24 }
 0x773   : > { %4832 = vst.msk [vmem:[%s271_s29 + $0x8] sm:$0xff] %vm3535_vm2, %v4820_v27 }
 0x774   : > { %6433 = shalt.err (!%p6430_p3)
}
 0x775   : > { %s6434_s20 = scalar_lea.hbm %s8781_s15, 512  ;;  %s6438_s23 = scalar_lea.hbm %s8831_s7, 1024 }
 0x776   : > { %p6435_p4 = scmp.ne.s32.totalorder %s8781_s15, %s6434_s20  ;;  %p6439_p9 = scmp.lt.s32.totalorder %s8781_s15, %s8831_s7 }
 0x777   : > { %p6440_p10 = scmp.lt.s32.totalorder %s6438_s23, %s6434_s20 }
 0x778   : > { %p6436_p7 = pnand %p6435_p4, %p6566_p5 }
 0x779   : > { %p6441_p11 = por %p6440_p10, %p6439_p9 }
 0x77a   : > { %p6437_p8 = pneg %p6436_p7 }
 0x77c   : > { %p6442_p12 = pnand %p6441_p11, %p6437_p8 }
 0x77e   : > { %6445 = shalt.err (!%p6442_p12)
}
 0x77f   : > { %s6486_s13 = smov 128   ;;  %s6487_s14 = smov 8  }
 0x780   : > { %5771 = dma.vmem_to_hbm [thread:$0]  (%p6566_p5), %s8775_s8, 512, %s8781_s15, %s8784_s28, %s6486_s13, %s6486_s13, %s6487_s14  }
 0x781 PF: > { %p5777_p13 = scmp.ge.s32.totalorder %s6480_s27, 2  ;;  %s4864_s16 = sand.u32 1, %s6468_s24  }
 0x782   : > { %s4865_s17 = scalar_lea.sflag [#allocation3], %s4864_s16 }
 0x783   : > { %p5774_p0 = pnand %p5777_p13, %p6570_p6 }
 0x785   : > { %p5775_p1 = pneg %p5774_p0 }
 0x787   : > { %6463 = dma.done.wait (%p5775_p1), %s4865_s17, 512  }
 0x788   : > { %6465 = vsyncadd (%p5775_p1), %s4865_s17, 4294966784  ;;  %p17_p2 = scmp.ge.s32.totalorder %s6553_s30, 4   ;;  %s8946_s24 = smov %s6472_s25 }
 0x789   : > { %s8947_s25 = smov %s6476_s26  ;;  %s8948_s26 = smov %s6564_s10 }
 0x78a   : > { %s8949_s27 = smov %s6553_s30  ;;  %19 = sbr.rel (!%p17_p2) target bundleno = 3 (0x3), region = 91 }
 0x78f   :  { %4870 = vsyncpa [#allocation3], 1 }
 0x790   :  { %4872 = vsyncpa [#allocation3 + $0x1], 1 }

</bundles_post_ra>
